<compile_context>
chip_gen: v5e
topology: v5e:2x2
jax: 0.10.0
libtpu: 0.0.40
codegen_flags: <defaults>
</compile_context>

<pallas_src>
import jax
import jax.numpy as jnp
from jax import lax
from jax.experimental import pallas as pl
from jax.experimental.pallas import tpu as pltpu

_EPS = 1e-5  # nn.GroupNorm default eps


# ---------------------------------------------------------------------------
# Fused ResnetBlock kernel factory
# ---------------------------------------------------------------------------
def _make_fused_resnet_block_kernel(H, W, cin_p, cout, cout_p, groups, has_res_conv):
    HW = H * W
    cpg = cout // groups
    # zero border (>= W+1) rounded up to a lane multiple so the interior store
    # of the image into the scratch is 128-lane aligned.
    L = ((W + 1 + 127) // 128) * 128
    PAD = L + HW + L

    def conv3x3(xpad, w2d, mask_l, mask_r):
        # xpad: (c_p, PAD) bf16 row-flattened image with zero borders
        # w2d : (cout, 9*c_p) bf16 im2col weights
        cols = []
        for ky in range(3):
            for kx in range(3):
                s = L - W - 1 + ky * W + kx
                patch = xpad[:, s:s + HW]
                if kx == 0:      # flat layout wraps: x==0 reads end of previous row
                    patch = jnp.where(mask_l, patch, 0.0)
                elif kx == 2:    # x==W-1 reads start of next row
                    patch = jnp.where(mask_r, patch, 0.0)
                cols.append(patch)
        patches = jnp.concatenate(cols, axis=0)               # (9*c_p, HW) bf16
        # bf16 x bf16 -> f32 accumulate: MXU-native rate.
        return jnp.dot(w2d, patches, preferred_element_type=jnp.float32)

    def group_avg_matrix():
        # block-diagonal (cout, cout) group-averaging matrix, built from iota
        # threshold counts (no vector int div/rem, no HBM input).
        io = lax.broadcasted_iota(jnp.int32, (cout, cout), 0)
        jo = lax.broadcasted_iota(jnp.int32, (cout, cout), 1)
        gi = jnp.zeros((cout, cout), jnp.int32)
        gj = jnp.zeros((cout, cout), jnp.int32)
        for g in range(1, groups):
            thr = g * cpg
            gi = gi + (io >= thr).astype(jnp.int32)
            gj = gj + (jo >= thr).astype(jnp.int32)
        return jnp.where(gi == gj, 1.0 / cpg, 0.0).astype(jnp.float32)

    def group_reduce(v, mavg):
        # v: (cout, 1) per-channel statistic -> per-channel group average
        if cpg == 1:
            return v
        return jnp.dot(mavg, v, precision=lax.Precision.HIGHEST,
                       preferred_element_type=jnp.float32)

    def gn_film_silu(acc, bias, gamma, beta, mavg, scale=None, shift=None):
        # acc: (cout, HW) f32 conv output WITHOUT bias; per-channel params (cout,1)
        # Fold the conv bias into the mean subtraction: (acc+b) - mu_g == acc - (mu_g - b)
        mean_c = jnp.mean(acc, axis=1, keepdims=True) + bias     # per-channel mean incl bias
        gmean = group_reduce(mean_c, mavg)
        d = acc - (gmean - bias)                                 # == h - mu_g
        var_c = jnp.mean(d * d, axis=1, keepdims=True)           # centered -> no cancellation
        gvar = group_reduce(var_c, mavg)
        inv = lax.rsqrt(gvar + _EPS)
        # fold GroupNorm affine (+ optional FiLM) into one per-channel scale/shift
        if scale is not None:
            g_scale = inv * gamma * (scale + 1.0)
            g_shift = beta * (scale + 1.0) + shift
        else:
            g_scale = inv * gamma
            g_shift = beta
        y = d * g_scale + g_shift
        return y * jax.nn.sigmoid(y)                             # SiLU

    def kernel(x_ref, w1_ref, w2_ref, pslab_ref, film_ref, *rest):
        if has_res_conv:
            wres_ref, out_ref, xpad1, xpad2 = rest
        else:
            out_ref, xpad1, xpad2 = rest

        # per-column masks for the +-1 horizontal taps
        pos = lax.broadcasted_iota(jnp.int32, (1, HW), 1)
        col = (pos & (W - 1)) if (W & (W - 1)) == 0 else lax.rem(pos, W)
        mask_l = col != 0
        mask_r = col != (W - 1)

        mavg = group_avg_matrix() if cpg > 1 else None

        # packed per-channel params (one DMA descriptor instead of ~7)
        pslab = pslab_ref[...]                                   # (cout, 8) f32
        b1, g1, be1 = pslab[:, 0:1], pslab[:, 1:2], pslab[:, 2:3]
        b2, g2, be2 = pslab[:, 3:4], pslab[:, 4:5], pslab[:, 5:6]
        film = film_ref[0]                                       # (cout, 2) f32
        scale, shift = film[:, 0:1], film[:, 1:2]

        x_f32 = x_ref[0].astype(jnp.float32)                     # (cin_p, HW), pre-padded channels

        # ---- block 1: conv3x3 + GroupNorm + FiLM + SiLU ----
        # zero ONLY the halo borders; interior is fully overwritten each step.
        xpad1[:, :L] = jnp.zeros((cin_p, L), jnp.bfloat16)
        xpad1[:, L + HW:] = jnp.zeros((cin_p, PAD - L - HW), jnp.bfloat16)
        xpad1[:, L:L + HW] = x_f32.astype(jnp.bfloat16)
        h = conv3x3(xpad1[...], w1_ref[...], mask_l, mask_r)
        h = gn_film_silu(h, b1, g1, be1, mavg, scale, shift)

        # ---- block 2: conv3x3 + GroupNorm + SiLU ----
        xpad2[:, :L] = jnp.zeros((cout_p, L), jnp.bfloat16)
        xpad2[:, L + HW:] = jnp.zeros((cout_p, PAD - L - HW), jnp.bfloat16)
        if cout_p > cout:
            xpad2[:cout, L:L + HW] = h.astype(jnp.bfloat16)
            xpad2[cout:, L:L + HW] = jnp.zeros((cout_p - cout, HW), jnp.bfloat16)
        else:
            xpad2[:, L:L + HW] = h.astype(jnp.bfloat16)
        h = conv3x3(xpad2[...], w2_ref[...], mask_l, mask_r)
        h = gn_film_silu(h, b2, g2, be2, mavg)

        # ---- residual ----
        if has_res_conv:
            bres = pslab[:, 6:7]
            res = jnp.dot(wres_ref[...], x_f32.astype(jnp.bfloat16),
                          preferred_element_type=jnp.float32) + bres
        else:
            res = x_f32[:cout, :]                                # nn.Identity(): plain add
        out_ref[0] = (h + res).astype(out_ref.dtype)

    return kernel, PAD


# ---------------------------------------------------------------------------
# ResnetBlock.forward wrapper
# ---------------------------------------------------------------------------
def resnet_block_forward(x, time_emb, params, groups=8):
    """x: (B, Cin, H, W) NCHW; time_emb: (B, time_emb_dim) or None -> (B, Cout, H, W)."""
    B, cin, H, W = x.shape
    cout = params["w1"].shape[-1]
    HW = H * W
    dtype = x.dtype
    has_res_conv = "wres" in params
    if not has_res_conv:
        assert cin == cout, "identity residual requires cin == cout"
    assert cout % groups == 0

    # time MLP (SiLU -> Linear) in plain JAX: too small to be its own kernel.
    if time_emb is not None:
        temb = jnp.dot(jax.nn.silu(time_emb), params["mlp_w"],
                       precision=lax.Precision.HIGHEST) + params["mlp_b"]
        scale, shift = temb[:, :cout], temb[:, cout:]            # chunk(2, dim=1)
    else:
        scale = jnp.zeros((B, cout), jnp.float32)
        shift = jnp.zeros((B, cout), jnp.float32)

    # bf16 sublane packing -> pad channel counts to 16
    cin_p = ((cin + 15) // 16) * 16
    cout_p = ((cout + 15) // 16) * 16

    # one-time parameter prep (layout only)
    w1 = jnp.pad(params["w1"], ((0, 0), (0, 0), (0, cin_p - cin), (0, 0)))
    w1_2d = w1.reshape(9 * cin_p, cout).T.astype(jnp.bfloat16)            # (cout, 9*cin_p)
    w2 = jnp.pad(params["w2"], ((0, 0), (0, 0), (0, cout_p - cout), (0, 0)))
    w2_2d = w2.reshape(9 * cout_p, cout).T.astype(jnp.bfloat16)           # (cout, 9*cout_p)

    bres = params["bres"] if has_res_conv else jnp.zeros((cout,), jnp.float32)
    pslab = jnp.stack(
        [params["b1"], params["g1"], params["be1"],
         params["b2"], params["g2"], params["be2"],
         bres, jnp.zeros((cout,), jnp.float32)], axis=1).astype(jnp.float32)   # (cout, 8)
    film = jnp.stack([scale, shift], axis=-1).astype(jnp.float32)              # (B, cout, 2)

    x_flat = x.reshape(B, cin, HW).astype(jnp.float32)          # free reshape (NCHW contiguous)
    if cin_p > cin:                 # tiny channel pad so every in-kernel store is full-height
        x_flat = jnp.pad(x_flat, ((0, 0), (0, cin_p - cin), (0, 0)))

    kernel, PAD = _make_fused_resnet_block_kernel(
        H, W, cin_p, cout, cout_p, groups, has_res_conv)

    inputs = [x_flat, w1_2d, w2_2d, pslab, film]
    in_specs = [
        pl.BlockSpec((1, cin_p, HW), lambda b: (b, 0, 0)),
        pl.BlockSpec((cout, 9 * cin_p), lambda b: (0, 0)),
        pl.BlockSpec((cout, 9 * cout_p), lambda b: (0, 0)),
        pl.BlockSpec((cout, 8), lambda b: (0, 0)),
        pl.BlockSpec((1, cout, 2), lambda b: (b, 0, 0)),
    ]
    if has_res_conv:
        wres2d = params["wres"].T                                # (cout, cin)
        if cin_p > cin:
            wres2d = jnp.pad(wres2d, ((0, 0), (0, cin_p - cin)))
        inputs.append(wres2d.astype(jnp.bfloat16))
        in_specs.append(pl.BlockSpec((cout, cin_p), lambda b: (0, 0)))

    out = pl.pallas_call(
        kernel,
        out_shape=jax.ShapeDtypeStruct((B, cout, HW), dtype),
        grid_spec=pltpu.PrefetchScalarGridSpec(
            num_scalar_prefetch=0,
            grid=(B,),                         # batch on a parallel axis -> both v7x TCs
            in_specs=in_specs,
            out_specs=pl.BlockSpec((1, cout, HW), lambda b: (b, 0, 0)),
            scratch_shapes=[
                pltpu.VMEM((cin_p, PAD), jnp.bfloat16),   # zero-bordered conv1 input
                pltpu.VMEM((cout_p, PAD), jnp.bfloat16),  # zero-bordered conv2 input
            ],
        ),
        compiler_params=pltpu.CompilerParams(
            dimension_semantics=("parallel",),
            vmem_limit_bytes=32 * 1024 * 1024,             # explicit, v7x-safe budget
        ),
    )(*inputs)
    return out.reshape(B, cout, H, W)


# ---------------------------------------------------------------------------
# Pure-JAX reference (NCHW, full precision) for the correctness check
# ---------------------------------------------------------------------------
def _reference(x, t, p, groups):
    cout = p["w1"].shape[-1]
    if t is not None:
        temb = jnp.dot(jax.nn.silu(t), p["mlp_w"],
                       precision=lax.Precision.HIGHEST) + p["mlp_b"]
        film = (temb[:, :cout], temb[:, cout:])
    else:
        film = None

    def block(y, w, b, g, be, ss=None):
        y = lax.conv_general_dilated(
            y, w, (1, 1), "SAME",
            dimension_numbers=("NCHW", "HWIO", "NCHW"),
            precision=lax.Precision.HIGHEST) + b[None, :, None, None]
        B, C, H, W = y.shape
        yr = y.reshape(B, groups, C // groups, H, W)
        mean = yr.mean(axis=(2, 3, 4), keepdims=True)
        var = yr.var(axis=(2, 3, 4), keepdims=True)
        yn = ((yr - mean) / jnp.sqrt(var + _EPS)).reshape(B, C, H, W)
        yn = yn * g[None, :, None, None] + be[None, :, None, None]
        if ss is not None:
            s, sh = ss
            yn = yn * (s[:, :, None, None] + 1.0) + sh[:, :, None, None]
        return jax.nn.silu(yn)

    h = block(x, p["w1"], p["b1"], p["g1"], p["be1"], film)
    h = block(h, p["w2"], p["b2"], p["g2"], p["be2"])
    if "wres" in p:
        res = jnp.einsum("bchw,co->bohw", x, p["wres"],
                         precision=lax.Precision.HIGHEST) + p["bres"][None, :, None, None]
    else:
        res = x
    return h + res


if __name__ == "__main__":
    B, dim, dim_out, H, W = 2, 16, 32, 16, 16
    groups, time_emb_dim = 8, 32

    key = jax.random.PRNGKey(0)
    ks = jax.random.split(key, 14)
    x = jax.random.normal(ks[0], (B, dim, H, W), jnp.float32)     # NCHW (PyTorch layout)
    time_emb = jax.random.normal(ks[1], (B, time_emb_dim), jnp.float32)

    params = dict(
        mlp_w=0.1 * jax.random.normal(ks[2], (time_emb_dim, 2 * dim_out), jnp.float32),
        mlp_b=0.1 * jax.random.normal(ks[3], (2 * dim_out,), jnp.float32),
        w1=0.2 * jax.random.normal(ks[4], (3, 3, dim, dim_out), jnp.float32),
        b1=0.1 * jax.random.normal(ks[5], (dim_out,), jnp.float32),
        g1=1.0 + 0.1 * jax.random.normal(ks[6], (dim_out,), jnp.float32),
        be1=0.1 * jax.random.normal(ks[7], (dim_out,), jnp.float32),
        w2=0.2 * jax.random.normal(ks[8], (3, 3, dim_out, dim_out), jnp.float32),
        b2=0.1 * jax.random.normal(ks[9], (dim_out,), jnp.float32),
        g2=1.0 + 0.1 * jax.random.normal(ks[10], (dim_out,), jnp.float32),
        be2=0.1 * jax.random.normal(ks[11], (dim_out,), jnp.float32),
        wres=0.2 * jax.random.normal(ks[12], (dim, dim_out), jnp.float32),
        bres=0.1 * jax.random.normal(ks[13], (dim_out,), jnp.float32),
    )

    out = jax.block_until_ready(resnet_block_forward(x, time_emb, params, groups=groups))
    assert out.shape == (B, dim_out, H, W), out.shape

    # bf16 MXU operands (f32 accumulation) through two stacked convs -> tolerance
    # loosened vs. the pure-f32 version.
    ref = _reference(x, time_emb, params, groups)
    if not jnp.allclose(out, ref, atol=1e-1, rtol=1e-1):
        max_err = jnp.max(jnp.abs(out - ref))
        raise AssertionError(f"mismatch vs reference, max abs err = {max_err}")

    print("KERNEL_OK")
</pallas_src>

<mosaic_0001>
module attributes {stable_mosaic.version = 11 : i64} {
  func.func @kernel(%arg0: i32, %arg1: memref<1x16x256xf32, #tpu.memory_space<vmem>>, %arg2: memref<32x144xbf16, #tpu.memory_space<vmem>>, %arg3: memref<32x288xbf16, #tpu.memory_space<vmem>>, %arg4: memref<32x8xf32, #tpu.memory_space<vmem>>, %arg5: memref<1x32x2xf32, #tpu.memory_space<vmem>>, %arg6: memref<32x16xbf16, #tpu.memory_space<vmem>>, %arg7: memref<1x32x256xf32, #tpu.memory_space<vmem>>, %arg8: memref<16x512xbf16, #tpu.memory_space<vmem>>, %arg9: memref<32x512xbf16, #tpu.memory_space<vmem>>) attributes {dimension_semantics = [#tpu.dimension_semantics<parallel>], iteration_bounds = array<i64: 2>, scalar_prefetch = 0 : i64, scratch_operands = 2 : i64, tpu.core_type = #tpu.core_type<tc>, window_params = [{transform_indices = @transform_0, window_bounds = array<i64: 1, 16, 256>}, {pipeline_mode = #tpu.pipeline_mode<synchronous>, transform_indices = @transform_1, window_bounds = array<i64: 32, 144>}, {pipeline_mode = #tpu.pipeline_mode<synchronous>, transform_indices = @transform_2, window_bounds = array<i64: 32, 288>}, {pipeline_mode = #tpu.pipeline_mode<synchronous>, transform_indices = @transform_3, window_bounds = array<i64: 32, 8>}, {transform_indices = @transform_4, window_bounds = array<i64: 1, 32, 2>}, {pipeline_mode = #tpu.pipeline_mode<synchronous>, transform_indices = @transform_5, window_bounds = array<i64: 32, 16>}, {transform_indices = @transform_6, window_bounds = array<i64: 1, 32, 256>}]} {
    %0 = tpu.iota {dimensions = array<i32: 1>} : vector<1x256xi32>
    %c15_i32 = arith.constant 15 : i32
    %1 = vector.broadcast %c15_i32 : i32 to vector<1x256xi32>
    %2 = arith.andi %0, %1 : vector<1x256xi32>
    %c0_i32 = arith.constant 0 : i32
    %3 = vector.broadcast %c0_i32 : i32 to vector<1x256xi32>
    %4 = arith.cmpi ne, %2, %3 : vector<1x256xi32>
    %c15_i32_0 = arith.constant 15 : i32
    %5 = vector.broadcast %c15_i32_0 : i32 to vector<1x256xi32>
    %6 = arith.cmpi ne, %2, %5 : vector<1x256xi32>
    %7 = tpu.iota {dimensions = array<i32: 0>} : vector<32x32xi32>
    %8 = tpu.iota {dimensions = array<i32: 1>} : vector<32x32xi32>
    %c0_i32_1 = arith.constant 0 : i32
    %9 = vector.broadcast %c0_i32_1 : i32 to vector<32x32xi32>
    %c0_i32_2 = arith.constant 0 : i32
    %10 = vector.broadcast %c0_i32_2 : i32 to vector<32x32xi32>
    %c4_i32 = arith.constant 4 : i32
    %11 = vector.broadcast %c4_i32 : i32 to vector<32x32xi32>
    %12 = arith.cmpi sge, %7, %11 : vector<32x32xi32>
    %13 = arith.extui %12 : vector<32x32xi1> to vector<32x32xi32>
    %14 = arith.addi %9, %13 : vector<32x32xi32>
    %c4_i32_3 = arith.constant 4 : i32
    %15 = vector.broadcast %c4_i32_3 : i32 to vector<32x32xi32>
    %16 = arith.cmpi sge, %8, %15 : vector<32x32xi32>
    %17 = arith.extui %16 : vector<32x32xi1> to vector<32x32xi32>
    %18 = arith.addi %10, %17 : vector<32x32xi32>
    %c8_i32 = arith.constant 8 : i32
    %19 = vector.broadcast %c8_i32 : i32 to vector<32x32xi32>
    %20 = arith.cmpi sge, %7, %19 : vector<32x32xi32>
    %21 = arith.extui %20 : vector<32x32xi1> to vector<32x32xi32>
    %22 = arith.addi %14, %21 : vector<32x32xi32>
    %c8_i32_4 = arith.constant 8 : i32
    %23 = vector.broadcast %c8_i32_4 : i32 to vector<32x32xi32>
    %24 = arith.cmpi sge, %8, %23 : vector<32x32xi32>
    %25 = arith.extui %24 : vector<32x32xi1> to vector<32x32xi32>
    %26 = arith.addi %18, %25 : vector<32x32xi32>
    %c12_i32 = arith.constant 12 : i32
    %27 = vector.broadcast %c12_i32 : i32 to vector<32x32xi32>
    %28 = arith.cmpi sge, %7, %27 : vector<32x32xi32>
    %29 = arith.extui %28 : vector<32x32xi1> to vector<32x32xi32>
    %30 = arith.addi %22, %29 : vector<32x32xi32>
    %c12_i32_5 = arith.constant 12 : i32
    %31 = vector.broadcast %c12_i32_5 : i32 to vector<32x32xi32>
    %32 = arith.cmpi sge, %8, %31 : vector<32x32xi32>
    %33 = arith.extui %32 : vector<32x32xi1> to vector<32x32xi32>
    %34 = arith.addi %26, %33 : vector<32x32xi32>
    %c16_i32 = arith.constant 16 : i32
    %35 = vector.broadcast %c16_i32 : i32 to vector<32x32xi32>
    %36 = arith.cmpi sge, %7, %35 : vector<32x32xi32>
    %37 = arith.extui %36 : vector<32x32xi1> to vector<32x32xi32>
    %38 = arith.addi %30, %37 : vector<32x32xi32>
    %c16_i32_6 = arith.constant 16 : i32
    %39 = vector.broadcast %c16_i32_6 : i32 to vector<32x32xi32>
    %40 = arith.cmpi sge, %8, %39 : vector<32x32xi32>
    %41 = arith.extui %40 : vector<32x32xi1> to vector<32x32xi32>
    %42 = arith.addi %34, %41 : vector<32x32xi32>
    %c20_i32 = arith.constant 20 : i32
    %43 = vector.broadcast %c20_i32 : i32 to vector<32x32xi32>
    %44 = arith.cmpi sge, %7, %43 : vector<32x32xi32>
    %45 = arith.extui %44 : vector<32x32xi1> to vector<32x32xi32>
    %46 = arith.addi %38, %45 : vector<32x32xi32>
    %c20_i32_7 = arith.constant 20 : i32
    %47 = vector.broadcast %c20_i32_7 : i32 to vector<32x32xi32>
    %48 = arith.cmpi sge, %8, %47 : vector<32x32xi32>
    %49 = arith.extui %48 : vector<32x32xi1> to vector<32x32xi32>
    %50 = arith.addi %42, %49 : vector<32x32xi32>
    %c24_i32 = arith.constant 24 : i32
    %51 = vector.broadcast %c24_i32 : i32 to vector<32x32xi32>
    %52 = arith.cmpi sge, %7, %51 : vector<32x32xi32>
    %53 = arith.extui %52 : vector<32x32xi1> to vector<32x32xi32>
    %54 = arith.addi %46, %53 : vector<32x32xi32>
    %c24_i32_8 = arith.constant 24 : i32
    %55 = vector.broadcast %c24_i32_8 : i32 to vector<32x32xi32>
    %56 = arith.cmpi sge, %8, %55 : vector<32x32xi32>
    %57 = arith.extui %56 : vector<32x32xi1> to vector<32x32xi32>
    %58 = arith.addi %50, %57 : vector<32x32xi32>
    %c28_i32 = arith.constant 28 : i32
    %59 = vector.broadcast %c28_i32 : i32 to vector<32x32xi32>
    %60 = arith.cmpi sge, %7, %59 : vector<32x32xi32>
    %61 = arith.extui %60 : vector<32x32xi1> to vector<32x32xi32>
    %62 = arith.addi %54, %61 : vector<32x32xi32>
    %c28_i32_9 = arith.constant 28 : i32
    %63 = vector.broadcast %c28_i32_9 : i32 to vector<32x32xi32>
    %64 = arith.cmpi sge, %8, %63 : vector<32x32xi32>
    %65 = arith.extui %64 : vector<32x32xi1> to vector<32x32xi32>
    %66 = arith.addi %58, %65 : vector<32x32xi32>
    %67 = arith.cmpi eq, %62, %66 : vector<32x32xi32>
    %cst = arith.constant 2.500000e-01 : f32
    %cst_10 = arith.constant 0.000000e+00 : f32
    %68 = vector.broadcast %cst : f32 to vector<32x32xf32>
    %69 = vector.broadcast %cst_10 : f32 to vector<32x32xf32>
    %70 = arith.select %67, %68, %69 : vector<32x32xi1>, vector<32x32xf32>
    %c0 = arith.constant 0 : index
    %c0_11 = arith.constant 0 : index
    %71 = vector.load %arg4[%c0, %c0_11] : memref<32x8xf32, #tpu.memory_space<vmem>>, vector<32x8xf32>
    %72 = vector.extract_strided_slice %71 {offsets = [0, 0], sizes = [32, 1], strides = [1, 1]} : vector<32x8xf32> to vector<32x1xf32>
    %73 = vector.extract_strided_slice %71 {offsets = [0, 1], sizes = [32, 1], strides = [1, 1]} : vector<32x8xf32> to vector<32x1xf32>
    %74 = vector.extract_strided_slice %71 {offsets = [0, 2], sizes = [32, 1], strides = [1, 1]} : vector<32x8xf32> to vector<32x1xf32>
    %75 = vector.extract_strided_slice %71 {offsets = [0, 3], sizes = [32, 1], strides = [1, 1]} : vector<32x8xf32> to vector<32x1xf32>
    %76 = vector.extract_strided_slice %71 {offsets = [0, 4], sizes = [32, 1], strides = [1, 1]} : vector<32x8xf32> to vector<32x1xf32>
    %77 = vector.extract_strided_slice %71 {offsets = [0, 5], sizes = [32, 1], strides = [1, 1]} : vector<32x8xf32> to vector<32x1xf32>
    %c0_12 = arith.constant 0 : index
    %c0_13 = arith.constant 0 : index
    %c0_14 = arith.constant 0 : index
    %78 = vector.load %arg5[%c0_12, %c0_13, %c0_14] : memref<1x32x2xf32, #tpu.memory_space<vmem>>, vector<1x32x2xf32>
    %79 = vector.shape_cast %78 : vector<1x32x2xf32> to vector<32x2xf32>
    %80 = vector.extract_strided_slice %79 {offsets = [0, 0], sizes = [32, 1], strides = [1, 1]} : vector<32x2xf32> to vector<32x1xf32>
    %81 = vector.extract_strided_slice %79 {offsets = [0, 1], sizes = [32, 1], strides = [1, 1]} : vector<32x2xf32> to vector<32x1xf32>
    %c0_15 = arith.constant 0 : index
    %c0_16 = arith.constant 0 : index
    %c0_17 = arith.constant 0 : index
    %82 = vector.load %arg1[%c0_15, %c0_16, %c0_17] : memref<1x16x256xf32, #tpu.memory_space<vmem>>, vector<1x16x256xf32>
    %83 = vector.shape_cast %82 : vector<1x16x256xf32> to vector<16x256xf32>
    %cst_18 = arith.constant 0.000000e+00 : bf16
    %84 = vector.broadcast %cst_18 : bf16 to vector<16x128xbf16>
    %c0_19 = arith.constant 0 : index
    %c0_20 = arith.constant 0 : index
    %85 = vector.load %arg8[%c0_19, %c0_20] : memref<16x512xbf16, #tpu.memory_space<vmem>>, vector<16x128xbf16>
    tpu.vector_store %arg8[%c0_19, %c0_20], %84 {strides = array<i32>} : memref<16x512xbf16, #tpu.memory_space<vmem>>, vector<16x128xbf16>,
    %cst_21 = arith.constant 0.000000e+00 : bf16
    %86 = vector.broadcast %cst_21 : bf16 to vector<16x128xbf16>
    %c0_22 = arith.constant 0 : index
    %c384 = arith.constant 384 : index
    %87 = vector.load %arg8[%c0_22, %c384] : memref<16x512xbf16, #tpu.memory_space<vmem>>, vector<16x128xbf16>
    tpu.vector_store %arg8[%c0_22, %c384], %86 {strides = array<i32>} : memref<16x512xbf16, #tpu.memory_space<vmem>>, vector<16x128xbf16>,
    %88 = arith.truncf %83 : vector<16x256xf32> to vector<16x256xbf16>
    %c0_23 = arith.constant 0 : index
    %c128 = arith.constant 128 : index
    %89 = vector.load %arg8[%c0_23, %c128] : memref<16x512xbf16, #tpu.memory_space<vmem>>, vector<16x256xbf16>
    tpu.vector_store %arg8[%c0_23, %c128], %88 {strides = array<i32>} : memref<16x512xbf16, #tpu.memory_space<vmem>>, vector<16x256xbf16>,
    %c0_24 = arith.constant 0 : index
    %c0_25 = arith.constant 0 : index
    %90 = vector.load %arg8[%c0_24, %c0_25] : memref<16x512xbf16, #tpu.memory_space<vmem>>, vector<16x512xbf16>
    %c0_26 = arith.constant 0 : index
    %c0_27 = arith.constant 0 : index
    %91 = vector.load %arg2[%c0_26, %c0_27] : memref<32x144xbf16, #tpu.memory_space<vmem>>, vector<32x144xbf16>
    %92 = vector.extract_strided_slice %90 {offsets = [0, 111], sizes = [16, 256], strides = [1, 1]} : vector<16x512xbf16> to vector<16x256xbf16>
    %cst_28 = arith.constant 0.000000e+00 : f32
    %93 = arith.truncf %cst_28 : f32 to bf16
    %94 = vector.shape_cast %4 : vector<1x256xi1> to vector<1x256xi1>
    %95 = vector.broadcast %94 : vector<1x256xi1> to vector<16x256xi1>
    %96 = vector.broadcast %93 : bf16 to vector<16x256xbf16>
    %97 = arith.select %95, %92, %96 : vector<16x256xi1>, vector<16x256xbf16>
    %98 = vector.extract_strided_slice %90 {offsets = [0, 112], sizes = [16, 256], strides = [1, 1]} : vector<16x512xbf16> to vector<16x256xbf16>
    %99 = vector.extract_strided_slice %90 {offsets = [0, 113], sizes = [16, 256], strides = [1, 1]} : vector<16x512xbf16> to vector<16x256xbf16>
    %cst_29 = arith.constant 0.000000e+00 : f32
    %100 = arith.truncf %cst_29 : f32 to bf16
    %101 = vector.shape_cast %6 : vector<1x256xi1> to vector<1x256xi1>
    %102 = vector.broadcast %101 : vector<1x256xi1> to vector<16x256xi1>
    %103 = vector.broadcast %100 : bf16 to vector<16x256xbf16>
    %104 = arith.select %102, %99, %103 : vector<16x256xi1>, vector<16x256xbf16>
    %105 = vector.extract_strided_slice %90 {offsets = [0, 127], sizes = [16, 256], strides = [1, 1]} : vector<16x512xbf16> to vector<16x256xbf16>
    %cst_30 = arith.constant 0.000000e+00 : f32
    %106 = arith.truncf %cst_30 : f32 to bf16
    %107 = vector.shape_cast %4 : vector<1x256xi1> to vector<1x256xi1>
    %108 = vector.broadcast %107 : vector<1x256xi1> to vector<16x256xi1>
    %109 = vector.broadcast %106 : bf16 to vector<16x256xbf16>
    %110 = arith.select %108, %105, %109 : vector<16x256xi1>, vector<16x256xbf16>
    %111 = vector.extract_strided_slice %90 {offsets = [0, 128], sizes = [16, 256], strides = [1, 1]} : vector<16x512xbf16> to vector<16x256xbf16>
    %112 = vector.extract_strided_slice %90 {offsets = [0, 129], sizes = [16, 256], strides = [1, 1]} : vector<16x512xbf16> to vector<16x256xbf16>
    %cst_31 = arith.constant 0.000000e+00 : f32
    %113 = arith.truncf %cst_31 : f32 to bf16
    %114 = vector.shape_cast %6 : vector<1x256xi1> to vector<1x256xi1>
    %115 = vector.broadcast %114 : vector<1x256xi1> to vector<16x256xi1>
    %116 = vector.broadcast %113 : bf16 to vector<16x256xbf16>
    %117 = arith.select %115, %112, %116 : vector<16x256xi1>, vector<16x256xbf16>
    %118 = vector.extract_strided_slice %90 {offsets = [0, 143], sizes = [16, 256], strides = [1, 1]} : vector<16x512xbf16> to vector<16x256xbf16>
    %cst_32 = arith.constant 0.000000e+00 : f32
    %119 = arith.truncf %cst_32 : f32 to bf16
    %120 = vector.shape_cast %4 : vector<1x256xi1> to vector<1x256xi1>
    %121 = vector.broadcast %120 : vector<1x256xi1> to vector<16x256xi1>
    %122 = vector.broadcast %119 : bf16 to vector<16x256xbf16>
    %123 = arith.select %121, %118, %122 : vector<16x256xi1>, vector<16x256xbf16>
    %124 = vector.extract_strided_slice %90 {offsets = [0, 144], sizes = [16, 256], strides = [1, 1]} : vector<16x512xbf16> to vector<16x256xbf16>
    %125 = vector.extract_strided_slice %90 {offsets = [0, 145], sizes = [16, 256], strides = [1, 1]} : vector<16x512xbf16> to vector<16x256xbf16>
    %cst_33 = arith.constant 0.000000e+00 : f32
    %126 = arith.truncf %cst_33 : f32 to bf16
    %127 = vector.shape_cast %6 : vector<1x256xi1> to vector<1x256xi1>
    %128 = vector.broadcast %127 : vector<1x256xi1> to vector<16x256xi1>
    %129 = vector.broadcast %126 : bf16 to vector<16x256xbf16>
    %130 = arith.select %128, %125, %129 : vector<16x256xi1>, vector<16x256xbf16>
    %131 = tpu.concatenate %97, %98, %104, %110, %111, %117, %123, %124, %130 in 0 : vector<16x256xbf16>, vector<16x256xbf16>, vector<16x256xbf16>, vector<16x256xbf16>, vector<16x256xbf16>, vector<16x256xbf16>, vector<16x256xbf16>, vector<16x256xbf16>, vector<16x256xbf16> -> vector<144x256xbf16>
    %cst_34 = arith.constant dense<0.000000e+00> : vector<32x256xf32>
    %132 = tpu.matmul %91, %131, %cst_34 {dimension_numbers = #tpu.dot_dimension_numbers<[1], [0], [0], [1], [0, 0, 1, 1], [], []>} : vector<32x144xbf16>, vector<144x256xbf16>, vector<32x256xf32> -> vector<32x256xf32>
    %cst_35 = arith.constant dense<0.000000e+00> : vector<32xf32>
    %133 = vector.multi_reduction <add>, %132, %cst_35 [1] : vector<32x256xf32> to vector<32xf32>
    %134 = vector.shape_cast %133 : vector<32xf32> to vector<32x1xf32>
    %cst_36 = arith.constant 2.560000e+02 : f32
    %135 = vector.broadcast %cst_36 : f32 to vector<32x1xf32>
    %136 = arith.divf %134, %135 : vector<32x1xf32>
    %137 = arith.addf %136, %72 : vector<32x1xf32>
    %cst_37 = arith.constant dense<0.000000e+00> : vector<32x1xf32>
    %138 = tpu.matmul %70, %137, %cst_37 {dimension_numbers = #tpu.dot_dimension_numbers<[1], [0], [0], [1], [0, 0, 1, 1], [], []>, precision = #tpu.contract_precision<fp32>} : vector<32x32xf32>, vector<32x1xf32>, vector<32x1xf32> -> vector<32x1xf32>
    %139 = arith.subf %138, %72 : vector<32x1xf32>
    %140 = vector.broadcast %139 : vector<32x1xf32> to vector<32x256xf32>
    %141 = arith.subf %132, %140 : vector<32x256xf32>
    %142 = arith.mulf %141, %141 : vector<32x256xf32>
    %cst_38 = arith.constant dense<0.000000e+00> : vector<32xf32>
    %143 = vector.multi_reduction <add>, %142, %cst_38 [1] : vector<32x256xf32> to vector<32xf32>
    %144 = vector.shape_cast %143 : vector<32xf32> to vector<32x1xf32>
    %cst_39 = arith.constant 2.560000e+02 : f32
    %145 = vector.broadcast %cst_39 : f32 to vector<32x1xf32>
    %146 = arith.divf %144, %145 : vector<32x1xf32>
    %cst_40 = arith.constant dense<0.000000e+00> : vector<32x1xf32>
    %147 = tpu.matmul %70, %146, %cst_40 {dimension_numbers = #tpu.dot_dimension_numbers<[1], [0], [0], [1], [0, 0, 1, 1], [], []>, precision = #tpu.contract_precision<fp32>} : vector<32x32xf32>, vector<32x1xf32>, vector<32x1xf32> -> vector<32x1xf32>
    %cst_41 = arith.constant 9.99999974E-6 : f32
    %148 = vector.broadcast %cst_41 : f32 to vector<32x1xf32>
    %149 = arith.addf %147, %148 : vector<32x1xf32>
    %150 = math.rsqrt %149 : vector<32x1xf32>
    %151 = arith.mulf %150, %73 : vector<32x1xf32>
    %cst_42 = arith.constant 1.000000e+00 : f32
    %152 = vector.broadcast %cst_42 : f32 to vector<32x1xf32>
    %153 = arith.addf %80, %152 : vector<32x1xf32>
    %154 = arith.mulf %151, %153 : vector<32x1xf32>
    %cst_43 = arith.constant 1.000000e+00 : f32
    %155 = vector.broadcast %cst_43 : f32 to vector<32x1xf32>
    %156 = arith.addf %80, %155 : vector<32x1xf32>
    %157 = arith.mulf %74, %156 : vector<32x1xf32>
    %158 = arith.addf %157, %81 : vector<32x1xf32>
    %159 = vector.broadcast %154 : vector<32x1xf32> to vector<32x256xf32>
    %160 = arith.mulf %141, %159 : vector<32x256xf32>
    %161 = vector.broadcast %158 : vector<32x1xf32> to vector<32x256xf32>
    %162 = arith.addf %160, %161 : vector<32x256xf32>
    %163 = arith.negf %162 : vector<32x256xf32>
    %164 = math.exp %163 : vector<32x256xf32>
    %cst_44 = arith.constant 1.000000e+00 : f32
    %165 = vector.broadcast %cst_44 : f32 to vector<32x256xf32>
    %166 = arith.addf %165, %164 : vector<32x256xf32>
    %167 = arith.divf %165, %166 : vector<32x256xf32>
    %168 = arith.mulf %162, %167 : vector<32x256xf32>
    %cst_45 = arith.constant 0.000000e+00 : bf16
    %169 = vector.broadcast %cst_45 : bf16 to vector<32x128xbf16>
    %c0_46 = arith.constant 0 : index
    %c0_47 = arith.constant 0 : index
    %170 = vector.load %arg9[%c0_46, %c0_47] : memref<32x512xbf16, #tpu.memory_space<vmem>>, vector<32x128xbf16>
    tpu.vector_store %arg9[%c0_46, %c0_47], %169 {strides = array<i32>} : memref<32x512xbf16, #tpu.memory_space<vmem>>, vector<32x128xbf16>,
    %cst_48 = arith.constant 0.000000e+00 : bf16
    %171 = vector.broadcast %cst_48 : bf16 to vector<32x128xbf16>
    %c0_49 = arith.constant 0 : index
    %c384_50 = arith.constant 384 : index
    %172 = vector.load %arg9[%c0_49, %c384_50] : memref<32x512xbf16, #tpu.memory_space<vmem>>, vector<32x128xbf16>
    tpu.vector_store %arg9[%c0_49, %c384_50], %171 {strides = array<i32>} : memref<32x512xbf16, #tpu.memory_space<vmem>>, vector<32x128xbf16>,
    %173 = arith.truncf %168 : vector<32x256xf32> to vector<32x256xbf16>
    %c0_51 = arith.constant 0 : index
    %c128_52 = arith.constant 128 : index
    %174 = vector.load %arg9[%c0_51, %c128_52] : memref<32x512xbf16, #tpu.memory_space<vmem>>, vector<32x256xbf16>
    tpu.vector_store %arg9[%c0_51, %c128_52], %173 {strides = array<i32>} : memref<32x512xbf16, #tpu.memory_space<vmem>>, vector<32x256xbf16>,
    %c0_53 = arith.constant 0 : index
    %c0_54 = arith.constant 0 : index
    %175 = vector.load %arg9[%c0_53, %c0_54] : memref<32x512xbf16, #tpu.memory_space<vmem>>, vector<32x512xbf16>
    %c0_55 = arith.constant 0 : index
    %c0_56 = arith.constant 0 : index
    %176 = vector.load %arg3[%c0_55, %c0_56] : memref<32x288xbf16, #tpu.memory_space<vmem>>, vector<32x288xbf16>
    %177 = vector.extract_strided_slice %175 {offsets = [0, 111], sizes = [32, 256], strides = [1, 1]} : vector<32x512xbf16> to vector<32x256xbf16>
    %cst_57 = arith.constant 0.000000e+00 : f32
    %178 = arith.truncf %cst_57 : f32 to bf16
    %179 = vector.shape_cast %4 : vector<1x256xi1> to vector<1x256xi1>
    %180 = vector.broadcast %179 : vector<1x256xi1> to vector<32x256xi1>
    %181 = vector.broadcast %178 : bf16 to vector<32x256xbf16>
    %182 = arith.select %180, %177, %181 : vector<32x256xi1>, vector<32x256xbf16>
    %183 = vector.extract_strided_slice %175 {offsets = [0, 112], sizes = [32, 256], strides = [1, 1]} : vector<32x512xbf16> to vector<32x256xbf16>
    %184 = vector.extract_strided_slice %175 {offsets = [0, 113], sizes = [32, 256], strides = [1, 1]} : vector<32x512xbf16> to vector<32x256xbf16>
    %cst_58 = arith.constant 0.000000e+00 : f32
    %185 = arith.truncf %cst_58 : f32 to bf16
    %186 = vector.shape_cast %6 : vector<1x256xi1> to vector<1x256xi1>
    %187 = vector.broadcast %186 : vector<1x256xi1> to vector<32x256xi1>
    %188 = vector.broadcast %185 : bf16 to vector<32x256xbf16>
    %189 = arith.select %187, %184, %188 : vector<32x256xi1>, vector<32x256xbf16>
    %190 = vector.extract_strided_slice %175 {offsets = [0, 127], sizes = [32, 256], strides = [1, 1]} : vector<32x512xbf16> to vector<32x256xbf16>
    %cst_59 = arith.constant 0.000000e+00 : f32
    %191 = arith.truncf %cst_59 : f32 to bf16
    %192 = vector.shape_cast %4 : vector<1x256xi1> to vector<1x256xi1>
    %193 = vector.broadcast %192 : vector<1x256xi1> to vector<32x256xi1>
    %194 = vector.broadcast %191 : bf16 to vector<32x256xbf16>
    %195 = arith.select %193, %190, %194 : vector<32x256xi1>, vector<32x256xbf16>
    %196 = vector.extract_strided_slice %175 {offsets = [0, 128], sizes = [32, 256], strides = [1, 1]} : vector<32x512xbf16> to vector<32x256xbf16>
    %197 = vector.extract_strided_slice %175 {offsets = [0, 129], sizes = [32, 256], strides = [1, 1]} : vector<32x512xbf16> to vector<32x256xbf16>
    %cst_60 = arith.constant 0.000000e+00 : f32
    %198 = arith.truncf %cst_60 : f32 to bf16
    %199 = vector.shape_cast %6 : vector<1x256xi1> to vector<1x256xi1>
    %200 = vector.broadcast %199 : vector<1x256xi1> to vector<32x256xi1>
    %201 = vector.broadcast %198 : bf16 to vector<32x256xbf16>
    %202 = arith.select %200, %197, %201 : vector<32x256xi1>, vector<32x256xbf16>
    %203 = vector.extract_strided_slice %175 {offsets = [0, 143], sizes = [32, 256], strides = [1, 1]} : vector<32x512xbf16> to vector<32x256xbf16>
    %cst_61 = arith.constant 0.000000e+00 : f32
    %204 = arith.truncf %cst_61 : f32 to bf16
    %205 = vector.shape_cast %4 : vector<1x256xi1> to vector<1x256xi1>
    %206 = vector.broadcast %205 : vector<1x256xi1> to vector<32x256xi1>
    %207 = vector.broadcast %204 : bf16 to vector<32x256xbf16>
    %208 = arith.select %206, %203, %207 : vector<32x256xi1>, vector<32x256xbf16>
    %209 = vector.extract_strided_slice %175 {offsets = [0, 144], sizes = [32, 256], strides = [1, 1]} : vector<32x512xbf16> to vector<32x256xbf16>
    %210 = vector.extract_strided_slice %175 {offsets = [0, 145], sizes = [32, 256], strides = [1, 1]} : vector<32x512xbf16> to vector<32x256xbf16>
    %cst_62 = arith.constant 0.000000e+00 : f32
    %211 = arith.truncf %cst_62 : f32 to bf16
    %212 = vector.shape_cast %6 : vector<1x256xi1> to vector<1x256xi1>
    %213 = vector.broadcast %212 : vector<1x256xi1> to vector<32x256xi1>
    %214 = vector.broadcast %211 : bf16 to vector<32x256xbf16>
    %215 = arith.select %213, %210, %214 : vector<32x256xi1>, vector<32x256xbf16>
    %216 = tpu.concatenate %182, %183, %189, %195, %196, %202, %208, %209, %215 in 0 : vector<32x256xbf16>, vector<32x256xbf16>, vector<32x256xbf16>, vector<32x256xbf16>, vector<32x256xbf16>, vector<32x256xbf16>, vector<32x256xbf16>, vector<32x256xbf16>, vector<32x256xbf16> -> vector<288x256xbf16>
    %cst_63 = arith.constant dense<0.000000e+00> : vector<32x256xf32>
    %217 = tpu.matmul %176, %216, %cst_63 {dimension_numbers = #tpu.dot_dimension_numbers<[1], [0], [0], [1], [0, 0, 1, 1], [], []>} : vector<32x288xbf16>, vector<288x256xbf16>, vector<32x256xf32> -> vector<32x256xf32>
    %cst_64 = arith.constant dense<0.000000e+00> : vector<32xf32>
    %218 = vector.multi_reduction <add>, %217, %cst_64 [1] : vector<32x256xf32> to vector<32xf32>
    %219 = vector.shape_cast %218 : vector<32xf32> to vector<32x1xf32>
    %cst_65 = arith.constant 2.560000e+02 : f32
    %220 = vector.broadcast %cst_65 : f32 to vector<32x1xf32>
    %221 = arith.divf %219, %220 : vector<32x1xf32>
    %222 = arith.addf %221, %75 : vector<32x1xf32>
    %cst_66 = arith.constant dense<0.000000e+00> : vector<32x1xf32>
    %223 = tpu.matmul %70, %222, %cst_66 {dimension_numbers = #tpu.dot_dimension_numbers<[1], [0], [0], [1], [0, 0, 1, 1], [], []>, precision = #tpu.contract_precision<fp32>} : vector<32x32xf32>, vector<32x1xf32>, vector<32x1xf32> -> vector<32x1xf32>
    %224 = arith.subf %223, %75 : vector<32x1xf32>
    %225 = vector.broadcast %224 : vector<32x1xf32> to vector<32x256xf32>
    %226 = arith.subf %217, %225 : vector<32x256xf32>
    %227 = arith.mulf %226, %226 : vector<32x256xf32>
    %cst_67 = arith.constant dense<0.000000e+00> : vector<32xf32>
    %228 = vector.multi_reduction <add>, %227, %cst_67 [1] : vector<32x256xf32> to vector<32xf32>
    %229 = vector.shape_cast %228 : vector<32xf32> to vector<32x1xf32>
    %cst_68 = arith.constant 2.560000e+02 : f32
    %230 = vector.broadcast %cst_68 : f32 to vector<32x1xf32>
    %231 = arith.divf %229, %230 : vector<32x1xf32>
    %cst_69 = arith.constant dense<0.000000e+00> : vector<32x1xf32>
    %232 = tpu.matmul %70, %231, %cst_69 {dimension_numbers = #tpu.dot_dimension_numbers<[1], [0], [0], [1], [0, 0, 1, 1], [], []>, precision = #tpu.contract_precision<fp32>} : vector<32x32xf32>, vector<32x1xf32>, vector<32x1xf32> -> vector<32x1xf32>
    %cst_70 = arith.constant 9.99999974E-6 : f32
    %233 = vector.broadcast %cst_70 : f32 to vector<32x1xf32>
    %234 = arith.addf %232, %233 : vector<32x1xf32>
    %235 = math.rsqrt %234 : vector<32x1xf32>
    %236 = arith.mulf %235, %76 : vector<32x1xf32>
    %237 = vector.broadcast %236 : vector<32x1xf32> to vector<32x256xf32>
    %238 = arith.mulf %226, %237 : vector<32x256xf32>
    %239 = vector.broadcast %77 : vector<32x1xf32> to vector<32x256xf32>
    %240 = arith.addf %238, %239 : vector<32x256xf32>
    %241 = arith.negf %240 : vector<32x256xf32>
    %242 = math.exp %241 : vector<32x256xf32>
    %cst_71 = arith.constant 1.000000e+00 : f32
    %243 = vector.broadcast %cst_71 : f32 to vector<32x256xf32>
    %244 = arith.addf %243, %242 : vector<32x256xf32>
    %245 = arith.divf %243, %244 : vector<32x256xf32>
    %246 = arith.mulf %240, %245 : vector<32x256xf32>
    %247 = vector.extract_strided_slice %71 {offsets = [0, 6], sizes = [32, 1], strides = [1, 1]} : vector<32x8xf32> to vector<32x1xf32>
    %c0_72 = arith.constant 0 : index
    %c0_73 = arith.constant 0 : index
    %248 = vector.load %arg6[%c0_72, %c0_73] : memref<32x16xbf16, #tpu.memory_space<vmem>>, vector<32x16xbf16>
    %249 = arith.truncf %83 : vector<16x256xf32> to vector<16x256xbf16>
    %cst_74 = arith.constant dense<0.000000e+00> : vector<32x256xf32>
    %250 = tpu.matmul %248, %249, %cst_74 {dimension_numbers = #tpu.dot_dimension_numbers<[1], [0], [0], [1], [0, 0, 1, 1], [], []>} : vector<32x16xbf16>, vector<16x256xbf16>, vector<32x256xf32> -> vector<32x256xf32>
    %251 = vector.broadcast %247 : vector<32x1xf32> to vector<32x256xf32>
    %252 = arith.addf %250, %251 : vector<32x256xf32>
    %253 = arith.addf %246, %252 : vector<32x256xf32>
    %c0_75 = arith.constant 0 : index
    %c0_76 = arith.constant 0 : index
    %c0_77 = arith.constant 0 : index
    %254 = vector.load %arg7[%c0_75, %c0_76, %c0_77] : memref<1x32x256xf32, #tpu.memory_space<vmem>>, vector<1x32x256xf32>
    %255 = vector.shape_cast %254 : vector<1x32x256xf32> to vector<32x256xf32>
    %256 = vector.shape_cast %253 : vector<32x256xf32> to vector<1x32x256xf32>
    tpu.vector_store %arg7[%c0_75, %c0_76, %c0_77], %256 {strides = array<i32>} : memref<1x32x256xf32, #tpu.memory_space<vmem>>, vector<1x32x256xf32>,
    return
  }
  func.func @transform_0(%arg0: i32) -> (i32, i32, i32) {
    %c0_i32 = arith.constant 0 : i32
    %c0_i32_0 = arith.constant 0 : i32
    %c0_i32_1 = arith.constant 0 : i32
    return %arg0, %c0_i32, %c0_i32_0 : i32, i32, i32
  }
  func.func @transform_1(%arg0: i32) -> (i32, i32) {
    %c0_i32 = arith.constant 0 : i32
    %c0_i32_0 = arith.constant 0 : i32
    %c0_i32_1 = arith.constant 0 : i32
    return %c0_i32, %c0_i32_0 : i32, i32
  }
  func.func @transform_2(%arg0: i32) -> (i32, i32) {
    %c0_i32 = arith.constant 0 : i32
    %c0_i32_0 = arith.constant 0 : i32
    %c0_i32_1 = arith.constant 0 : i32
    return %c0_i32, %c0_i32_0 : i32, i32
  }
  func.func @transform_3(%arg0: i32) -> (i32, i32) {
    %c0_i32 = arith.constant 0 : i32
    %c0_i32_0 = arith.constant 0 : i32
    %c0_i32_1 = arith.constant 0 : i32
    return %c0_i32, %c0_i32_0 : i32, i32
  }
  func.func @transform_4(%arg0: i32) -> (i32, i32, i32) {
    %c0_i32 = arith.constant 0 : i32
    %c0_i32_0 = arith.constant 0 : i32
    %c0_i32_1 = arith.constant 0 : i32
    return %arg0, %c0_i32, %c0_i32_0 : i32, i32, i32
  }
  func.func @transform_5(%arg0: i32) -> (i32, i32) {
    %c0_i32 = arith.constant 0 : i32
    %c0_i32_0 = arith.constant 0 : i32
    %c0_i32_1 = arith.constant 0 : i32
    return %c0_i32, %c0_i32_0 : i32, i32
  }
  func.func @transform_6(%arg0: i32) -> (i32, i32, i32) {
    %c0_i32 = arith.constant 0 : i32
    %c0_i32_0 = arith.constant 0 : i32
    %c0_i32_1 = arith.constant 0 : i32
    return %arg0, %c0_i32, %c0_i32_0 : i32, i32, i32
  }
}

</mosaic_0001>

<bundles_post_ra>
// kernel: tpu_custom_call.1
= control target key start
LH: loop header
LB: loop body
LE: loop exit
PB: predicated region body
PF: predicated region fallthrough
CT: control target
= control target key end

     0   :  { %11 = vsyncpa [#allocation5], 0  ;;  %s6011_s0 = inlined_call_operand.vmem [shape: f32[2,16,256], index: 0, kind: input, shape index: {}]   ;;  %s6012_s1 = inlined_call_operand.hbm [shape: bf16[32,144], index: 1, kind: input, shape index: {}]   ;;  %s6013_s2 = inlined_call_operand.vmem [shape: bf16[32,288], index: 2, kind: input, shape index: {}]   ;;  %s6014_s3 = inlined_call_operand.vmem [shape: f32[32,8], index: 3, kind: input, shape index: {}]   ;;  %s6015_s4 = inlined_call_operand.vmem [shape: f32[2,32,2], index: 4, kind: input, shape index: {}]   ;;  %s6016_s5 = inlined_call_operand.vmem [shape: bf16[32,16], index: 5, kind: input, shape index: {}]   ;;  %s6017_s6 = inlined_call_operand.hbm [shape: f32[2,32,256], index: 6, kind: output, shape index: {}]  }
   0x1   :  { %12 = vsyncpa [#allocation6], 0 }
   0x2   :  { %14 = vsyncpa [#allocation6 + $0x1], 0  ;;  %s4347_s21 = smov 0   ;;  %s4349_s22 = smov 0  }
   0x3   :  { %s4351_s23 = smov 0   ;;  %s4353_s24 = smov 0  }
   0x4 LB: > { %s4368_s25 = sadd.s32 4294967295, %s4288_s24   ;;  %s3782_s26 = sadd.s32 4294967294, %s4288_s24   ;;  %s4288_s24 = sphi %s4353_s24, %s6224_s24   ;;  %s4284_s23 = sphi %s4351_s23, %s6223_s23   ;;  %s4280_s22 = sphi %s4349_s22, %s6222_s22   ;;  %s4276_s21 = sphi %s4347_s21, %s6221_s21  }
   0x5   : > { %s4372_s27 = sadd.s32 1, %s4288_s24   ;;  %s163_s28 = sadd.s32 1, %s4284_s23 }
   0x6   : > { %s160_s29 = ssub.s32 %s4288_s24, %s4372_s27  ;;  %p173_p0 = scmp.ne.s32.totalorder %s4284_s23, %s4280_s22 }
   0x7   : > { %p161_p1 = scmp.eq.s32.totalorder %s160_s29, 0  ;;  %p174_p2 = scmp.eq.s32.totalorder %s4368_s25, 1 }
   0x8   : > { %p179_p3 = scmp.ne.s32.totalorder %s4280_s22, %s4276_s21  ;;  %p180_p4 = scmp.eq.s32.totalorder %s3782_s26, 1 }
   0x9   : > { %s4383_s30 = scalar_select %p161_p1, %s4284_s23, %s163_s28  }
   0xa   : > { %p4385_p5 = por %p174_p2, %p173_p0  ;;  %p4389_p6 = por %p180_p4, %p179_p3 }
   0xb   : > { %p3783_p7 = scmp.ge.s32.totalorder %s4288_s24, 1  ;;  %p187_p8 = scmp.lt.s32.totalorder %s4288_s24, 3 }
   0xc   : > { %p4020_p9 = scmp.eq.s32.totalorder %s4368_s25, 0  ;;  %s198_s11 = sshll.u32 %s6012_s1, 4  ;;  %s199_s11 = int_to_ptr.hbm [resolvable:$true] %s198_s11 }
   0xd   : > { %p188_p10 = pnand %p3783_p7, %p187_p8  ;;  %s4290_s12 = smov [#allocation4]  }
   0xe   : > { %s200_s13 = sshll.u32 %s4290_s12, 4  ;;  %s4291_s14 = smov 128   ;;  %s201_s13 = int_to_ptr.vmem [resolvable:$true] %s200_s13 }
   0xf   : > { %p4012_p11 = pneg %p188_p10  ;;  %s4292_s15 = smov 8  }
  0x10   : > { %241 = sbr.rel (%p188_p10) target bundleno = 3358 (0xd1e), region = 44 }
  0x11   : > { %p4013_p12 = pnand %p4020_p9, %p4012_p11 }
  0x13   : > { %4015 = dma.hbm_to_vmem [thread:$0]  (!%p4013_p12), %s199_s11, 512, %s201_s13, [#allocation5], %s4291_s14, %s4291_s14, %s4292_s15  }
  0x15   : > { %4265 = dma.done.wait (%p4020_p9), [#allocation5], 512  }
  0x16   : > { %4267 = vsyncadd (%p4020_p9), [#allocation5], 4294966784  ;;  %p277_p13 = scmp.lt.s32.totalorder %s4368_s25, 1  ;;  %v6024_v0 = vmov 0   ;;  %v290_v1 = vlaneseq  ;;  %v6059_v12 = vmov 0  ;;  %s4294_s26 = smov 127  }
  0x17   : > { %425 = vst [vmem:[#allocation2 + $0x10] sm:$0xf] %v6024_v0  ;;  %4078 = vset.pattern.permute.xlu1 %v6024_v0  ;;  %4077 = vset.pattern.permute.xlu0 %v6024_v0  ;;  %s4295_s28 = smov 113   ;;  %s4296_s29 = smov 111   ;;  %v6062_v20 = vmov 0  ;;  %vm6040_vm6 = vcmask 1039360   ;;  %v4493_v32 = vunpack.c.l.b16 %v6024_v0  ;;  %v4496_v33 = vunpack.c.h.b16 %v6024_v0 }
  0x18   : > { %s4410_s16 = scalar_select %p277_p13, %s4368_s25, 1  ;;  %424 = vst [vmem:[#allocation2] sm:$0xf] %v6024_v0  ;;  %4079 = vset.pattern.permute.xlu2 %v6024_v0  ;;  %v4424_v2 = vand.u32 127, %v290_v1  ;;  %vm6021_vm10 = vcmask 924672   ;;  %vm6042_vm11 = vcmask 1043456  }
  0x19   : > { %426 = vst [vmem:[#allocation2 + $0xc] sm:$0xf] %v6024_v0  ;;  %s4297_s9 = smov 95   ;;  %s4298_s10 = smov 112  }
  0x1a   : > { %s3970_s17 = sshll.u32 %s4410_s16, 5  ;;  %427 = vst [vmem:[#allocation2 + $0x1c] sm:$0xf] %v6024_v0  ;;  %v292_v6 = vadd.s32 128, %v4424_v2  ;;  %v293_v9 = vand.u32 15, %v4424_v2  ;;  %s4299_s11 = smov 126  }
  0x1b   : > { %s281_s20 = scalar_lea.vmem %s6011_s0, %s3970_s17  ;;  %1884 = vst [vmem:[#allocation3] sm:$0xf] %v6024_v0  ;;  %s4300_s12 = smov 17  }
  0x1c   : > { %1885 = vst [vmem:[#allocation3 + $0x10] sm:$0xf] %v6024_v0  ;;  %v422_v3 = vld [vmem:[%s281_s20 + $0x10] sm:$0xff]  ;;  %v423_v4 = vld [vmem:[%s281_s20 + $0x18] sm:$0xff]  ;;  %v420_v5 = vld [vmem:[%s281_s20] sm:$0xff]  ;;  %v294_v10 = vand.u32 15, %v292_v6  ;;  %s4982_s19 = scalar_lea.vmem %s6015_s4, %s3970_s17 }
  0x1d   : > { %1886 = vst [vmem:[#allocation3 + $0x20] sm:$0xf] %v6024_v0  ;;  %v429_v7 = vpack.c.bf16 %v423_v4, %v422_v3  ;;  %v421_v8 = vld [vmem:[%s281_s20 + $0x8] sm:$0xff]  ;;  %vm295_vm0 = vcmp.ne.s32.totalorder %v293_v9, 0  ;;  %vm297_vm3 = vcmp.ne.s32.totalorder %v293_v9, 15  ;;  %s4303_s16 = smov 2  }
  0x1e   : > { %1887 = vst [vmem:[#allocation3 + $0x30] sm:$0xf] %v6024_v0  ;;  %v428_v11 = vpack.c.bf16 %v421_v8, %v420_v5  ;;  %vm296_vm1 = vcmp.ne.s32.totalorder %v294_v10, 0  ;;  %vm298_vm4 = vcmp.ne.s32.totalorder %v294_v10, 15  ;;  %v3974_v37 = vld [vmem:[#allocation2 + $0xc] sm:$0xf0] }
  0x1f   : > { %1888 = vst [vmem:[#allocation3 + $0xc] sm:$0xf] %v6024_v0  ;;  %vm4434_vm2 = vmpackc.low %vm296_vm1, %vm295_vm0  ;;  %v3795_v36 = vld [vmem:[#allocation2] sm:$0xf]  ;;  %v6067_v8 = vmov 0  ;;  %s4304_s17 = smov 1  }
  0x20   : > { %431 = vst [vmem:[#allocation2 + $0x14] sm:$0xff] %v429_v7  ;;  %v6060_v12 = vsel %vm4434_vm2, 4294967295, %v6059_v12  ;;  %v445_v13 = vsel %vm4434_vm2, 65537, %v6024_v0  ;;  %vm4469_vm5 = vmpackc.low %vm298_vm4, %vm297_vm3  ;;  %v3973_v23 = vld [vmem:[#allocation2 + $0xc] sm:$0xf]  ;;  %v3796_v38 = vor.u32 %v3974_v37, %v3795_v36  ;;  %vm6020_vm3 = vcmask 777216  }
  0x21   : > { %1889 = vst [vmem:[#allocation3 + $0x1c] sm:$0xf] %v6024_v0  ;;  %498 = vrot.lane.b32.xlu2 %v445_v13, %s4294_s26  ;;  %v6063_v20 = vsel %vm4469_vm5, 4294967295, %v6062_v20  ;;  %v474_v22 = vsel %vm4469_vm5, 65537, %v6024_v0  ;;  %v3805_v24 = vld [vmem:[#allocation2 + $0x18] sm:$0xf0] }
  0x22   : > { %1890 = vst [vmem:[#allocation3 + $0x2c] sm:$0xf] %v6024_v0  ;;  %v3808_v25 = vor.u32 %v3973_v23, %v3805_v24  ;;  %s4306_s18 = smov 125   ;;  %s274_s13 = sand.u32 1, %s4280_s22  }
  0x23   : > { %6061 = vst [vmem:[#allocation10_spill] sm:$0xff] %v6060_v12  ;;  %s3788_s14 = sshll.u32 %s274_s13, 6 }
  0x24   : > { %1891 = vst [vmem:[#allocation3 + $0x3c] sm:$0xf] %v6024_v0  ;;  %s5928_s15 = scalar_lea.vmem [#allocation7], %s3788_s14 }
  0x25   : > { %430 = vst [vmem:[#allocation2 + $0x4] sm:$0xff] %v428_v11 }
  0x26   : > { %6064 = vst [vmem:[#allocation11_spill] sm:$0xff] %v6063_v20 }
  0x27   : > { %v4443_v14 = vld [vmem:[#allocation2 + $0x10] sm:$0xff]  ;;  %v4453_v16 = vld [vmem:[#allocation2 + $0x18] sm:$0xff] }
  0x28   : > { %550 = vrot.lane.b32.xlu1 %v4443_v14, %s4295_s28  ;;  %v3797_v19 = vld [vmem:[#allocation2 + $0x10] sm:$0xf0]  ;;  %v3975_v27 = vld [vmem:[#allocation2 + $0x14] sm:$0xf0] }
  0x2c   : > { %v4447_v15 = vld [vmem:[#allocation2] sm:$0xff]  ;;  %v4457_v17 = vld [vmem:[#allocation2 + $0x8] sm:$0xff] }
  0x2d   : > { %546 = vrot.lane.b32.xlu0 %v4447_v15, %s4295_s28  ;;  %525 = vrot.lane.b32.xlu2 %v4447_v15, %s4294_s26  ;;  %v3972_v18 = vld [vmem:[#allocation2 + $0x4] sm:$0xf]  ;;  %v3803_v26 = vld [vmem:[#allocation2 + $0x8] sm:$0xf] }
  0x2e   : > { %v3800_v21 = vor.u32 %v3972_v18, %v3797_v19  ;;  %v3804_v28 = vor.u32 %v3975_v27, %v3803_v26 }
  0x30   : > { %552 = vrot.lane.b32.xlu1 %v4453_v16, %s4295_s28 }
  0x35   : > { %548 = vrot.lane.b32.xlu0 %v4457_v17, %s4295_s28  ;;  %527 = vrot.lane.b32.xlu2 %v4457_v17, %s4294_s26 }
  0x38   : > { %531 = vrot.lane.b32.xlu1 %v4453_v16, %s4294_s26 }
  0x3d   : > { %529 = vrot.lane.b32.xlu0 %v4443_v14, %s4294_s26  ;;  %568 = vrot.lane.b32.xlu2 %v4457_v17, %s4296_s29 }
  0x40   : > { %566 = vrot.lane.b32.xlu1 %v4447_v15, %s4296_s29 }
  0x45   : > { %475 = vrot.lane.b32.xlu0 %v474_v22, %s4295_s28  ;;  %694 = vrot.lane.b32.xlu2 %v3800_v21, %s4297_s9 }
  0x48   : > { %572 = vrot.lane.b32.xlu1 %v4453_v16, %s4296_s29 }
  0x4d   : > { %570 = vrot.lane.b32.xlu0 %v4443_v14, %s4296_s29  ;;  %610 = vrot.lane.b32.xlu2 %v3800_v21, %s4294_s26 }
  0x50   : > { %698 = vrot.lane.b32.xlu1 %v3808_v25, %s4297_s9  ;;  %v6070_v25 = vmov 0 }
  0x55   : > { %696 = vrot.lane.b32.xlu0 %v3804_v28, %s4297_s9 }
  0x58   : > { %662 = vrot.lane.b32.xlu1 %v3804_v28, %s4296_s29 }
  0x5d   : > { %660 = vrot.lane.b32.xlu0 %v3800_v21, %s4296_s29 }
  0x60   : > { %446 = vrot.lane.b32.xlu1 %v445_v13, %s4296_s29 }
  0x65   : > { %612 = vrot.lane.b32.xlu0 %v3804_v28, %s4294_s26 }
  0x68   : > { %608 = vrot.lane.b32.xlu1 %v3796_v38, %s4294_s26 }
  0x7b   : > { %v499_v29 = vpop.permute.xlu2 %498 }
  0x7c   : > { %v500_v30 = vrot.slane %v499_v29, 4 }
  0x7e   : > { %v502_v31 = vsel %vm6040_vm6, %v500_v30, %v499_v29  ;;  %v510_v6 = vunpack.c.l.b16 %v500_v30  ;;  %v511_v7 = vunpack.c.h.b16 %v500_v30 }
  0x7f   : > { %v503_v34 = vunpack.c.l.b16 %v502_v31  ;;  %v504_v35 = vunpack.c.h.b16 %v502_v31 }
  0x80   : > { %vm514_vm15 = vcmp.ne.s32.totalorder %v510_v6, %v4493_v32  ;;  %vm515_vm0 = vcmp.ne.s32.totalorder %v511_v7, %v4496_v33 }
  0x81   : > { %vm507_vm7 = vcmp.ne.s32.totalorder %v503_v34, %v4493_v32  ;;  %vm508_vm8 = vcmp.ne.s32.totalorder %v504_v35, %v4496_v33  ;;  %vm4565_vm1 = vmpackc.low %vm515_vm0, %vm514_vm15  ;;  %vm6023_vm15 = vcmask 138240   ;;  %vm6018_vm0 = vcmask 1031168  }
  0x82   : > { %vm4500_vm9 = vmpackc.low %vm508_vm8, %vm507_vm7  ;;  %v6071_v25 = vsel %vm4565_vm1, 4294967295, %v6070_v25  ;;  %v518_v37 = vsel %vm4565_vm1, %v4457_v17, 0  ;;  %v520_v38 = vsel %vm4565_vm1, %v4453_v16, 0 }
  0x83   : > { %v4508_v40 = vsel %vm4500_vm9, %v4447_v15, 0  ;;  %v4513_v41 = vsel %vm4500_vm9, %v4443_v14, 0  ;;  %6072 = vst [vmem:[#allocation13_spill] sm:$0xff] %v6071_v25 }
  0x84   : > { %v642_v42 = vunpack.c.l.b16 %v4508_v40  ;;  %v645_v43 = vunpack.c.l.b16 %v4513_v41 }
  0x86   : > { %v648_v44 = vpack.c.b16 %v645_v43, %v642_v42  ;;  %v644_v43 = vunpack.c.l.b16 %v518_v37 }
  0x87   : > { %v526_v49 = vpop.permute.xlu2 %525 }
  0x88   : > { %651 = vrot.lane.b32.xlu1 %v648_v44, %s4298_s10  ;;  %v533_v56 = vrot.slane %v526_v49, 4  ;;  %v647_v44 = vunpack.c.l.b16 %v520_v38  ;;  %v643_v49 = vunpack.c.h.b16 %v4508_v40 }
  0x8f   : > { %v528_v52 = vpop.permute.xlu2 %527 }
  0x90   : > { %v534_v58 = vrot.slane %v528_v52, 4 }
  0x92   : > { %v538_v3 = vsel %vm6042_vm11, %v533_v56, %v534_v58  ;;  %v650_v56 = vpack.c.b16 %v647_v44, %v644_v43 }
  0x93   : > { %v539_v13 = vsel %vm6040_vm6, %v538_v3, %v528_v52 }
  0x94   : > { %v4558_v23 = vsel %vm4469_vm5, %v539_v13, 0 }
  0x95   : > { %v667_v28 = vunpack.c.l.b16 %v4558_v23 }
  0x97   : > { %v4533_v5 = vpop.permute.xlu2 %568 }
  0x9a   : > { %v4518_v45 = vpop.permute.xlu1 %550 }
  0x9f   : > { %v4520_v46 = vpop.permute.xlu0 %546  ;;  %v4569_v27 = vpop.permute.xlu2 %694 }
  0xa0   : > { %v554_v40 = vrot.slane %v4520_v46, 4 }
  0xa2   : > { %v4522_v47 = vpop.permute.xlu1 %552 }
  0xa3   : > { %v557_v52 = vrot.slane %v4522_v47, 4 }
  0xa7   : > { %v4524_v48 = vpop.permute.xlu0 %548 }
  0xaa   : > { %v532_v50 = vpop.permute.xlu1 %531 }
  0xab   : > { %v536_v57 = vrot.slane %v532_v50, 4 }
  0xaf   : > { %v530_v51 = vpop.permute.xlu0 %529 }
  0xb0   : > { %v535_v59 = vrot.slane %v530_v51, 4  ;;  %v6073_v51 = vmov 0 }
  0xb2   : > { %v4526_v53 = vpop.permute.xlu1 %566  ;;  %v540_v4 = vsel %vm6042_vm11, %v535_v59, %v536_v57  ;;  %v556_v59 = vrot.slane %v4518_v45, 4 }
  0xb3   : > { %v541_v21 = vsel %vm6040_vm6, %v540_v4, %v532_v50  ;;  %v646_v50 = vunpack.c.h.b16 %v4513_v41 }
  0xb4   : > { %v4562_v24 = vsel %vm4469_vm5, %v541_v21, 0 }
  0xb5   : > { %v669_v31 = vunpack.c.l.b16 %v4562_v24  ;;  %v649_v57 = vpack.c.b16 %v646_v50, %v643_v49  ;;  %v670_v37 = vunpack.c.h.b16 %v4562_v24 }
  0xb7   : > { %v476_v54 = vpop.permute.xlu0 %475  ;;  %v671_v42 = vpack.c.b16 %v669_v31, %v667_v28  ;;  %v574_v31 = vrot.slane %v4526_v53, 4 }
  0xb8   : > { %v477_v55 = vrot.slane %v476_v54, 4 }
  0xba   : > { %v479_v60 = vsel %vm6021_vm10, %v477_v55, %v476_v54  ;;  %v4529_v63 = vpop.permute.xlu1 %572  ;;  %v487_v29 = vunpack.c.l.b16 %v477_v55  ;;  %v488_v30 = vunpack.c.h.b16 %v477_v55  ;;  %v555_v54 = vrot.slane %v4524_v48, 4 }
  0xbb   : > { %v480_v61 = vunpack.c.l.b16 %v479_v60  ;;  %v481_v62 = vunpack.c.h.b16 %v479_v60 }
  0xbc   : > { %vm491_vm4 = vcmp.ne.s32.totalorder %v487_v29, %v4493_v32  ;;  %vm492_vm7 = vcmp.ne.s32.totalorder %v488_v30, %v4496_v33  ;;  %v558_v45 = vsel %vm6042_vm11, %v554_v40, %v555_v54 }
  0xbd   : > { %vm484_vm12 = vcmp.ne.s32.totalorder %v480_v61, %v4493_v32  ;;  %vm485_vm13 = vcmp.ne.s32.totalorder %v481_v62, %v4496_v33  ;;  %vm4589_vm8 = vmpackc.low %vm492_vm7, %vm491_vm4  ;;  %v560_v62 = vsel %vm6042_vm11, %v556_v59, %v557_v52  ;;  %v559_v13 = vsel %vm6021_vm10, %v558_v45, %v4524_v48  ;;  %v4645_v52 = vpop.permute.xlu2 %610 }
  0xbe   : > { %vm4537_vm14 = vmpackc.low %vm485_vm13, %vm484_vm12  ;;  %v6074_v51 = vsel %vm4589_vm8, 4294967295, %v6073_v51  ;;  %vm6041_vm12 = vcmask 908288   ;;  %v495_v41 = vsel %vm4589_vm8, %v4457_v17, 0  ;;  %v497_v60 = vsel %vm4589_vm8, %v4453_v16, 0 }
  0xbf   : > { %v6068_v8 = vsel %vm4537_vm14, 4294967295, %v6067_v8  ;;  %v4541_v9 = vpop.permute.xlu0 %570  ;;  %v4546_v10 = vsel %vm4537_vm14, %v4447_v15, 0  ;;  %v496_v11 = vsel %vm4537_vm14, %v4443_v14, 0  ;;  %6075 = vst [vmem:[#allocation14_spill] sm:$0xff] %v6074_v51  ;;  %v622_v3 = vunpack.c.l.b16 %v495_v41 }
  0xc0   : > { %6069 = vst [vmem:[#allocation12_spill] sm:$0xff] %v6068_v8  ;;  %v620_v18 = vunpack.c.l.b16 %v4546_v10  ;;  %v623_v19 = vunpack.c.l.b16 %v496_v11  ;;  %v625_v46 = vunpack.c.l.b16 %v497_v60  ;;  %v621_v4 = vunpack.c.h.b16 %v4546_v10 }
  0xc1   : > { %v624_v6 = vunpack.c.h.b16 %v496_v11  ;;  %v561_v7 = vsel %vm6021_vm10, %v560_v62, %v4522_v47  ;;  %v577_v48 = vrot.slane %v4529_v63, 4  ;;  %v576_v30 = vrot.slane %v4541_v9, 4 }
  0xc2   : > { %v626_v22 = vpack.c.b16 %v623_v19, %v620_v18  ;;  %v699_v26 = vpop.permute.xlu1 %698  ;;  %v628_v18 = vpack.c.b16 %v625_v46, %v622_v3  ;;  %v565_v21 = vsel %vm4434_vm2, %v561_v7, 0  ;;  %vm6019_vm13 = vcmask 916480  }
  0xc3   : > { %v627_v19 = vpack.c.b16 %v624_v6, %v621_v4  ;;  %v682_v10 = vunpack.c.l.b16 %v565_v21  ;;  %v683_v11 = vunpack.c.h.b16 %v565_v21 }
  0xc4   : > { %629 = vrot.lane.b32.xlu1 %v626_v22, %s4299_s11  ;;  %v564_v22 = vsel %vm4434_vm2, %v559_v13, 0 }
  0xc5   : > { %v681_v28 = vunpack.c.h.b16 %v564_v22 }
  0xc7   : > { %v697_v34 = vpop.permute.xlu0 %696  ;;  %v685_v47 = vpack.c.b16 %v683_v11, %v681_v28 }
  0xc8   : > { %v702_v35 = vsel %vm6020_vm3, %v697_v34, %v699_v26  ;;  %v701_v36 = vsel %vm6020_vm3, %v4569_v27, %v697_v34  ;;  %v680_v26 = vunpack.c.l.b16 %v564_v22  ;;  %v575_v34 = vrot.slane %v4533_v5, 4 }
  0xc9   : > { %780 = vrot.lane.b32.xlu0 %v702_v35, %s4300_s12  ;;  %778 = vrot.lane.b32.xlu2 %v701_v36, %s4300_s12  ;;  %v580_v35 = vsel %vm6042_vm11, %v576_v30, %v577_v48  ;;  %v668_v36 = vunpack.c.h.b16 %v4558_v23 }
  0xca   : > { %v663_v55 = vpop.permute.xlu1 %662  ;;  %v684_v29 = vpack.c.b16 %v682_v10, %v680_v26  ;;  %v578_v38 = vsel %vm6042_vm11, %v574_v31, %v575_v34  ;;  %v581_v9 = vsel %vm6041_vm12, %v580_v35, %v4529_v63 }
  0xcb   : > { %v579_v53 = vsel %vm6041_vm12, %v578_v38, %v4533_v5 }
  0xcc   : > { %673 = vrot.lane.b32.xlu1 %v671_v42, %s4296_s29  ;;  %v672_v42 = vpack.c.b16 %v670_v37, %v668_v36  ;;  %v584_v23 = vsel %vm4469_vm5, %v579_v53, 0 }
  0xcd   : > { %v705_v44 = vunpack.c.l.b16 %v584_v23  ;;  %v706_v49 = vunpack.c.h.b16 %v584_v23 }
  0xcf   : > { %v661_v58 = vpop.permute.xlu0 %660 }
  0xd0   : > { %v664_v61 = vsel %vm6041_vm12, %v661_v58, %v663_v55 }
  0xd1   : > { %655 = vrot.lane.b32.xlu0 %v650_v56, %s4298_s10  ;;  %653 = vrot.lane.b32.xlu2 %v649_v57, %s4298_s10 }
  0xd2   : > { %v447_v5 = vpop.permute.xlu1 %446 }
  0xd4   : > { %760 = vrot.lane.b32.xlu1 %v664_v61, %s4300_s12 }
  0xd7   : > { %v613_v59 = vpop.permute.xlu0 %612 }
  0xd9   : > { %633 = vrot.lane.b32.xlu0 %v628_v18, %s4299_s11  ;;  %631 = vrot.lane.b32.xlu2 %v627_v19, %s4299_s11  ;;  %v448_v18 = vrot.slane %v447_v5, 4 }
  0xda   : > { %v4647_v54 = vpop.permute.xlu1 %608 }
  0xdb   : > { %v450_v22 = vsel %vm6041_vm12, %v448_v18, %v447_v5  ;;  %v458_v10 = vunpack.c.l.b16 %v448_v18  ;;  %v459_v11 = vunpack.c.h.b16 %v448_v18 }
  0xdc   : > { %v451_v28 = vunpack.c.l.b16 %v450_v22 }
  0xdd   : > { %vm462_vm4 = vcmp.ne.s32.totalorder %v458_v10, %v4493_v32  ;;  %vm463_vm7 = vcmp.ne.s32.totalorder %v459_v11, %v4496_v33 }
  0xde   : > { %vm4676_vm3 = vmpackc.low %vm463_vm7, %vm462_vm4  ;;  %vm326_vm4 = vcmp.ge.s32.totalorder %v4424_v2, 8  ;;  %vm341_vm7 = vcmp.ge.s32.totalorder %v4424_v2, 12 }
  0xdf   : > { %v466_v36 = vsel %vm4676_vm3, %v4457_v17, 0  ;;  %v468_v37 = vsel %vm4676_vm3, %v4453_v16, 0 }
  0xe0   : > { %v592_v17 = vunpack.c.l.b16 %v466_v36  ;;  %v3976_v36 = vld [vmem:[#allocation4 + $0x4] sm:$0xf] }
  0xe1   : > { %688 = vrot.lane.b32.xlu0 %v685_v47, %s4296_s29  ;;  %686 = vrot.lane.b32.xlu2 %v684_v29, %s4296_s29  ;;  %v452_v47 = vunpack.c.h.b16 %v450_v22 }
  0xe9   : > { %776 = vrot.lane.b32.xlu0 %v4569_v27, %s4300_s12  ;;  %762 = vrot.lane.b32.xlu2 %v663_v55, %s4300_s12  ;;  %v585_v27 = vsel %vm4469_vm5, %v581_v9, 0  ;;  %v595_v9 = vunpack.c.l.b16 %v468_v37  ;;  %v3813_v37 = vld [vmem:[#allocation4 + $0x8] sm:$0xf0] }
  0xea   : > { %v708_v24 = vunpack.c.h.b16 %v585_v27  ;;  %v707_v43 = vunpack.c.l.b16 %v585_v27 }
  0xeb   : > { %v598_v16 = vpack.c.b16 %v595_v9, %v592_v17  ;;  %v3816_v9 = vor.u32 %v3976_v36, %v3813_v37 }
  0xec   : > { %v710_v50 = vpack.c.b16 %v708_v24, %v706_v49  ;;  %v709_v63 = vpack.c.b16 %v707_v43, %v705_v44  ;;  %v614_v44 = vsel %vm6040_vm6, %v4647_v54, %v4645_v52 }
  0xf1   : > { %758 = vrot.lane.b32.xlu0 %v661_v58, %s4300_s12  ;;  %675 = vrot.lane.b32.xlu2 %v672_v42, %s4296_s29 }
  0xf9   : > { %713 = vrot.lane.b32.xlu0 %v710_v50, %s4296_s29  ;;  %711 = vrot.lane.b32.xlu2 %v709_v63, %s4296_s29 }
  0xfa   : > { %v652_v56 = vpop.permute.xlu1 %651 }
 0x123   : > { %v779_v55 = vpop.permute.xlu2 %778 }
 0x12b   : > { %v654_v57 = vpop.permute.xlu2 %653 }
 0x12c   : > { %v658_v58 = vsel %vm6019_vm13, %v652_v56, %v654_v57 }
 0x12d   : > { %752 = vrot.lane.b32.xlu0 %v658_v58, %s4300_s12 }
 0x133   : > { %v632_v40 = vpop.permute.xlu2 %631 }
 0x136   : > { %v630_v41 = vpop.permute.xlu1 %629 }
 0x137   : > { %v636_v6 = vsel %vm6018_vm0, %v630_v41, %v632_v40 }
 0x13b   : > { %v781_v60 = vpop.permute.xlu0 %780  ;;  %v687_v61 = vpop.permute.xlu2 %686 }
 0x13c   : > { %770 = vrot.lane.b32.xlu0 %v687_v61, %s4300_s12  ;;  %v804_v62 = vsel %vm6023_vm15, %v779_v55, %v781_v60 }
 0x13d   : > { %870 = vmatpush.bf16.msra.mxu2 %v804_v62 }
 0x13e   : > { %v674_v45 = vpop.permute.xlu1 %673 }
 0x143   : > { %v656_v3 = vpop.permute.xlu0 %655  ;;  %v4662_v13 = vpop.permute.xlu2 %762 }
 0x144   : > { %756 = vrot.lane.b32.xlu2 %v656_v3, %s4300_s12  ;;  %764 = vrot.lane.b32.xlu0 %v674_v45, %s4300_s12  ;;  %v659_v46 = vsel %vm6019_vm13, %v654_v57, %v656_v3  ;;  %vm456_vm13 = vcmp.ne.s32.totalorder %v452_v47, %v4496_v33 }
 0x145   : > { %754 = vrot.lane.b32.xlu1 %v659_v46, %s4300_s12 }
 0x146   : > { %v761_v5 = vpop.permute.xlu1 %760 }
 0x14b   : > { %v634_v4 = vpop.permute.xlu0 %633  ;;  %v676_v26 = vpop.permute.xlu2 %675 }
 0x14c   : > { %750 = vrot.lane.b32.xlu2 %v634_v4, %s4300_s12  ;;  %746 = vrot.lane.b32.xlu0 %v636_v6, %s4300_s12  ;;  %v637_v7 = vsel %vm6018_vm0, %v632_v40, %v634_v4  ;;  %v677_v30 = vsel %vm6041_vm12, %v674_v45, %v676_v26  ;;  %vm455_vm0 = vcmp.ne.s32.totalorder %v451_v28, %v4493_v32 }
 0x14d   : > { %748 = vrot.lane.b32.xlu1 %v637_v7, %s4300_s12  ;;  %vm4680_vm10 = vmpackc.low %vm456_vm13, %vm455_vm0  ;;  %v615_v32 = vsel %vm6040_vm6, %v4645_v52, %v613_v59  ;;  %v798_v6 = vsel %vm6023_vm15, %v761_v5, %v4662_v13  ;;  %vm6022_vm13 = vcmask 130048   ;;  %vm312_vm0 = vcmp.ge.s32.totalorder %v4424_v2, 4 }
 0x14e   : > { %v465_v33 = vsel %vm4680_vm10, %v4447_v15, 0  ;;  %v467_v38 = vsel %vm4680_vm10, %v4443_v14, 0 }
 0x14f   : > { %v591_v53 = vunpack.c.h.b16 %v465_v33  ;;  %v594_v42 = vunpack.c.h.b16 %v467_v38  ;;  %v590_v15 = vunpack.c.l.b16 %v465_v33  ;;  %v593_v14 = vunpack.c.l.b16 %v467_v38 }
 0x151   : > { %v597_v24 = vpack.c.b16 %v594_v42, %v591_v53  ;;  %v596_v49 = vpack.c.b16 %v593_v14, %v590_v15 }
 0x153   : > { %v689_v19 = vpop.permute.xlu0 %688  ;;  %v712_v27 = vpop.permute.xlu2 %711 }
 0x154   : > { %774 = vrot.lane.b32.xlu2 %v689_v19, %s4300_s12  ;;  %v690_v21 = vsel %vm6041_vm12, %v687_v61, %v689_v19 }
 0x155   : > { %772 = vrot.lane.b32.xlu1 %v690_v21, %s4300_s12 }
 0x15b   : > { %v777_v29 = vpop.permute.xlu0 %776 }
 0x15c   : > { %768 = vrot.lane.b32.xlu2 %v676_v26, %s4300_s12  ;;  %v803_v48 = vsel %vm6023_vm15, %v777_v29, %v779_v55  ;;  %v3811_v29 = vld [vmem:[#allocation4] sm:$0xf] }
 0x15d   : > { %832 = vmatpush.bf16.msra.mxu0 %v803_v48  ;;  %766 = vrot.lane.b32.xlu1 %v677_v30, %s4300_s12  ;;  %v3977_v48 = vld [vmem:[#allocation4 + $0x4] sm:$0xf0] }
 0x163   : > { %v759_v35 = vpop.permute.xlu0 %758 }
 0x164   : > { %744 = vrot.lane.b32.xlu2 %v613_v59, %s4300_s12  ;;  %v797_v4 = vsel %vm6023_vm15, %v759_v35, %v761_v5  ;;  %v3812_v35 = vor.u32 %v3977_v48, %v3811_v29 }
 0x165   : > { %742 = vrot.lane.b32.xlu1 %v615_v32, %s4300_s12 }
 0x16b   : > { %v714_v23 = vpop.permute.xlu0 %713 }
 0x16c   : > { %738 = vrot.lane.b32.xlu2 %v598_v16, %s4300_s12  ;;  %v715_v43 = vsel %vm6041_vm12, %v712_v27, %v714_v23  ;;  %v3819_v16 = vld [vmem:[#allocation4 + $0x10] sm:$0xf] }
 0x16d   : > { %736 = vrot.lane.b32.xlu1 %v597_v24, %s4300_s12  ;;  %784 = vrot.lane.b32.xlu0 %v715_v43, %s4300_s12  ;;  %v3978_v24 = vld [vmem:[#allocation4 + $0x14] sm:$0xf]  ;;  %v3821_v43 = vld [vmem:[#allocation4 + $0x18] sm:$0xf0] }
 0x16e   : > { %v3824_v15 = vor.u32 %v3978_v24, %v3821_v43 }
 0x174   : > { %740 = vrot.lane.b32.xlu2 %v614_v44, %s4300_s12 }
 0x175   : > { %786 = vrot.lane.b32.xlu1 %v714_v23, %s4300_s12  ;;  %734 = vrot.lane.b32.xlu0 %v596_v49, %s4300_s12 }
 0x17d   : > { %782 = vrot.lane.b32.xlu1 %v712_v27, %s4300_s12  ;;  %v3979_v27 = vld [vmem:[#allocation4 + $0x14] sm:$0xf0] }
 0x17e   : > { %v3820_v23 = vor.u32 %v3979_v27, %v3819_v16 }
 0x19e   : > { %v757_v50 = vpop.permute.xlu2 %756 }
 0x19f   : > { %v753_v57 = vpop.permute.xlu0 %752 }
 0x1a6   : > { %v751_v63 = vpop.permute.xlu2 %750 }
 0x1ae   : > { %v775_v55 = vpop.permute.xlu2 %774  ;;  %v771_v40 = vpop.permute.xlu0 %770 }
 0x1b6   : > { %v769_v59 = vpop.permute.xlu2 %768  ;;  %v765_v61 = vpop.permute.xlu0 %764 }
 0x1b7   : > { %v755_v56 = vpop.permute.xlu1 %754 }
 0x1b8   : > { %v795_v19 = vsel %vm6023_vm15, %v753_v57, %v755_v56  ;;  %v796_v21 = vsel %vm6023_vm15, %v755_v56, %v757_v50 }
 0x1be   : > { %v745_v60 = vpop.permute.xlu2 %744  ;;  %v747_v7 = vpop.permute.xlu0 %746 }
 0x1bf   : > { %v749_v58 = vpop.permute.xlu1 %748 }
 0x1c0   : > { %v793_v22 = vsel %vm6023_vm15, %v747_v7, %v749_v58  ;;  %v794_v10 = vsel %vm6023_vm15, %v749_v58, %v751_v63 }
 0x1c6   : > { %v739_v46 = vpop.permute.xlu2 %738 }
 0x1c7   : > { %v773_v41 = vpop.permute.xlu1 %772 }
 0x1c8   : > { %v801_v52 = vsel %vm6023_vm15, %v771_v40, %v773_v41  ;;  %v802_v54 = vsel %vm6023_vm15, %v773_v41, %v775_v55 }
 0x1c9   : > { %833 = vmatpush.bf16.msra.mxu0 %v801_v52  ;;  %871 = vmatpush.bf16.msra.mxu2 %v802_v54 }
 0x1ce   : > { %v741_v11 = vpop.permute.xlu2 %740 }
 0x1cf   : > { %v767_v62 = vpop.permute.xlu1 %766 }
 0x1d0   : > { %v799_v45 = vsel %vm6023_vm15, %v765_v61, %v767_v62  ;;  %v800_v3 = vsel %vm6023_vm15, %v767_v62, %v769_v59 }
 0x1d1   : > { %834 = vmatpush.bf16.msra.mxu0 %v799_v45  ;;  %872 = vmatpush.bf16.msra.mxu2 %v800_v3 }
 0x1d5   : > { %835 = vmatpush.bf16.msra.mxu0 %v797_v4  ;;  %873 = vmatpush.bf16.msra.mxu2 %v798_v6 }
 0x1d7   : > { %v743_v18 = vpop.permute.xlu1 %742 }
 0x1d8   : > { %v791_v13 = vsel %vm6023_vm15, %v741_v11, %v743_v18  ;;  %v792_v47 = vsel %vm6023_vm15, %v743_v18, %v745_v60  ;;  %v327_v11 = vsel %vm326_vm4, 1, %v6024_v0  ;;  %vm401_vm4 = vcmp.ge.s32.totalorder %v4424_v2, 28 }
 0x1d9   : > { %836 = vmatpush.bf16.msra.mxu0 %v795_v19  ;;  %874 = vmatpush.bf16.msra.mxu2 %v796_v21 }
 0x1dd   : > { %837 = vmatpush.bf16.msra.mxu0 %v793_v22  ;;  %875 = vmatpush.bf16.msra.mxu2 %v794_v10  ;;  %v313_v10 = vsel %vm312_vm0, 1, %v6024_v0  ;;  %vm386_vm0 = vcmp.ge.s32.totalorder %v4424_v2, 24 }
 0x1df   : > { %v785_v26 = vpop.permute.xlu0 %784  ;;  %v737_v28 = vpop.permute.xlu1 %736 }
 0x1e0   : > { %v790_v30 = vsel %vm6023_vm15, %v737_v28, %v739_v46 }
 0x1e1   : > { %838 = vmatpush.bf16.msra.mxu0 %v791_v13  ;;  %876 = vmatpush.bf16.msra.mxu2 %v792_v47  ;;  %v342_v13 = vsel %vm341_vm7, 1, %v6024_v0 }
 0x1e5   : > { %877 = vmatpush.bf16.msra.mxu2 %v790_v30 }
 0x1e7   : > { %v735_v32 = vpop.permute.xlu0 %734  ;;  %v787_v33 = vpop.permute.xlu1 %786 }
 0x1e8   : > { %878 = vmatmul.bf16.vlgmr.msra.gmra.mxu2 %v3812_v35  ;;  %v789_v38 = vsel %vm6023_vm15, %v735_v32, %v737_v28  ;;  %v806_v17 = vsel %vm6023_vm15, %v785_v26, %v787_v33  ;;  %v328_v28 = vadd.s32 %v327_v11, %v313_v10  ;;  %v387_v33 = vsel %vm386_vm0, 1, %v6024_v0 }
 0x1e9   : > { %839 = vmatpush.bf16.msra.mxu0 %v789_v38  ;;  %896 = vmatpush.bf16.msra.mxu3 %v806_v17  ;;  %v300_v38 = vshrl.u32 %v290_v1, 7 }
 0x1ea   : > { %v343_v29 = vadd.s32 %v342_v13, %v328_v28 }
 0x1ec   : > { %840 = vmatmul.bf16.vlgmr.msra.gmra.mxu0 %v3812_v35  ;;  %3827 = vmatmul.msk.bf16.vlgmr.msra.gmra.mxu3 %vm6022_vm13, %v3816_v9 }
 0x1ef   : > { %v783_v53 = vpop.permute.xlu1 %782 }
 0x1f0   : > { %v805_v42 = vsel %vm6023_vm15, %v783_v53, %v785_v26  ;;  %v4301_v26 = vmov 256.0   ;;  %vm371_vm15 = vcmp.ge.s32.totalorder %v4424_v2, 20  ;;  %v402_v53 = vsel %vm401_vm4, 1, %v6024_v0 }
 0x1f1   : > { %858 = vmatpush.bf16.msra.mxu1 %v805_v42  ;;  %4094 = vrcp.f32 %v4301_v26  ;;  %v372_v36 = vsel %vm371_vm15, 1, %v6024_v0  ;;  %v301_v42 = vadd.s32 8, %v300_v38  ;;  %vm6039_vm4 = vcmask 261120  }
 0x1f3   : > { %vm330_vm15 = vcmp.ge.s32.totalorder %v301_v42, 12 }
 0x1f4   : > { %3825 = vmatmul.msk.bf16.vlgmr.msra.gmra.mxu1 %vm6022_vm13, %v3816_v9  ;;  %v334_v1 = vsel %vm330_vm15, 1, %v6024_v0 }
 0x1f7   : > { %v4095_v47 = vpop.eup %4094 }
 0x1f8   : > { %883 = vmatmul.bf16.gmra.mxu2 %v3820_v23  ;;  %v921_v30 = vmul.f32 256.0, %v4095_v47  ;;  %vm925_vm7 = vweird.f32 %v4095_v47 }
 0x1fa   : > { %v922_v37 = vsub.f32 1.0, %v921_v30 }
 0x1fc   : > { %845 = vmatmul.bf16.gmra.mxu0 %v3820_v23  ;;  %3828 = vmatmul.msk.bf16.gmra.mxu3 %vm6022_vm13, %v3824_v15  ;;  %v923_v17 = vmul.f32 %v4095_v47, %v922_v37 }
 0x1fe   : > { %v924_v16 = vadd.f32 %v4095_v47, %v923_v17 }
 0x200   : > { %v4774_v24 = vsel %vm925_vm7, %v4095_v47, %v924_v16 }
 0x204   : > { %3826 = vmatmul.msk.bf16.gmra.mxu1 %vm6022_vm13, %v3824_v15  ;;  %vm356_vm13 = vcmp.ge.s32.totalorder %v4424_v2, 16  ;;  %v4781_v15 = vld [vmem:[%s6014_s3 + $0x10] sm:$0xff] }
 0x205   : > { %v357_v48 = vsel %vm356_vm13, 1, %v6024_v0  ;;  %vm304_vm13 = vcmp.ge.s32.totalorder %v300_v38, 4 }
 0x206   : > { %v358_v35 = vadd.s32 %v357_v48, %v343_v29  ;;  %v308_v23 = vsel %vm304_vm13, 1, %v6024_v0 }
 0x208   : > { %v373_v32 = vadd.s32 %v372_v36, %v358_v35  ;;  %v4832_v36 = vld [vmem:[%s6014_s3] sm:$0xff] }
 0x20a   : > { %v388_v9 = vadd.s32 %v387_v33, %v373_v32 }
 0x20c   : > { %v4771_v27 = vadd.s32 %v402_v53, %v388_v9 }
 0x20e   : > { %vm404_vm0 = vcmp.eq.s32.totalorder %v308_v23, %v4771_v27 }
 0x269   : > { %v841_v14 = vpop.f32.mrf.mxu0 }
 0x26b   : > { %v879_v44 = vpop.f32.mrf.mxu2 }
 0x26f   : > { %v898_v49 = vpop.f32.mrf.mxu3 }
 0x270   : > { %v4750_v19 = vadd.f32 %v898_v49, %v879_v44 }
 0x271   : > { %v860_v50 = vpop.f32.mrf.mxu1  ;;  %v843_v63 = vpop.f32.mrf.mxu0 }
 0x272   : > { %v4752_v21 = vadd.f32 %v860_v50, %v841_v14  ;;  %v302_v14 = vadd.s32 16, %v300_v38  ;;  %v4788_v50 = vld [vmem:[%s6014_s3 + $0x8] sm:$0xff] }
 0x273   : > { %v881_v5 = vpop.f32.mrf.mxu2 }
 0x274   : > { %v908_v22 = vadd.f32 %v4750_v19, %v4752_v21  ;;  %vm361_vm13 = vcmp.ge.s32.totalorder %v302_v14, 20 }
 0x277   : > { %v900_v55 = vpop.f32.mrf.mxu3 }
 0x278   : > { %v4732_v57 = vadd.f32 %v900_v55, %v881_v5  ;;  %v338_v55 = vadd.s32 2, %v334_v1 }
 0x279   : > { %v862_v56 = vpop.f32.mrf.mxu1  ;;  %v846_v40 = vpop.f32.mrf.mxu0 }
 0x27a   : > { %v4734_v58 = vadd.f32 %v862_v56, %v843_v63  ;;  %v4302_v63 = vmov 0.0   ;;  %vm405_vm7 = vcmp.eq.s32.totalorder %v338_v55, %v4771_v27 }
 0x27b   : > { %v884_v41 = vpop.f32.mrf.mxu2  ;;  %v4791_v5 = vsel %vm404_vm0, 0.25, %v4302_v63 }
 0x27c   : > { %v911_v59 = vadd.f32 %v4732_v57, %v4734_v58 }
 0x27e   : > { %912 = vadd.xlane.f32.xlu1 %v911_v59 }
 0x27f   : > { %v903_v52 = vpop.f32.mrf.mxu3 }
 0x280   : > { %v4738_v54 = vadd.f32 %v903_v52, %v884_v41  ;;  %v365_v52 = vsel %vm361_vm13, 1, %v6024_v0 }
 0x281   : > { %v865_v60 = vpop.f32.mrf.mxu1  ;;  %v848_v3 = vpop.f32.mrf.mxu0 }
 0x282   : > { %v4740_v61 = vadd.f32 %v865_v60, %v846_v40  ;;  %v937_v40 = vsel %vm6039_vm4, %v4791_v5, 0 }
 0x283   : > { %v886_v46 = vpop.f32.mrf.mxu2 }
 0x284   : > { %v914_v62 = vadd.f32 %v4738_v54, %v4740_v61 }
 0x286   : > { %915 = vadd.xlane.f32.xlu0 %v914_v62  ;;  %v4804_v62 = vld [vmem:[%s6014_s3 + $0x18] sm:$0xff] }
 0x287   : > { %v905_v45 = vpop.f32.mrf.mxu3 }
 0x288   : > { %v4744_v6 = vadd.f32 %v905_v45, %v886_v46  ;;  %v4806_v45 = vsub.f32 %v937_v40, %v937_v40 }
 0x289   : > { %v867_v4 = vpop.f32.mrf.mxu1 }
 0x28a   : > { %v4746_v7 = vadd.f32 %v867_v4, %v848_v3  ;;  %v303_v3 = vadd.s32 24, %v300_v38  ;;  %v4817_v26 = vand.u32 4294901760, %v4806_v45 }
 0x28c   : > { %v917_v18 = vadd.f32 %v4744_v6, %v4746_v7  ;;  %vm392_vm15 = vcmp.ge.s32.totalorder %v303_v3, 28  ;;  %v971_v37 = vsub.f32 %v4806_v45, %v4817_v26 }
 0x28d   : > { %v396_v30 = vsel %vm392_vm15, 1, %v6024_v0 }
 0x28e   : > { %918 = vadd.xlane.f32.xlu2 %v917_v18  ;;  %v4812_v18 = vsel %vm405_vm7, 0.25, %v4302_v63  ;;  %v400_v53 = vadd.s32 6, %v396_v30 }
 0x28f   : > { %6080 = vst [vmem:[#allocation15_spill] sm:$0xff] %v4812_v18  ;;  %v940_v47 = vsel %vm6039_vm4, %v4812_v18, 0 }
 0x290   : > { %v4836_v32 = vsub.f32 %v940_v47, %v940_v47  ;;  %vm407_vm13 = vcmp.eq.s32.totalorder %v400_v53, %v4771_v27 }
 0x291   : > { %v4862_v3 = vsel %vm407_vm13, 0.25, %v4302_v63 }
 0x292   : > { %v4850_v1 = vand.u32 4294901760, %v4836_v32  ;;  %6083 = vst [vmem:[#allocation18_spill] sm:$0xff] %v4862_v3 }
 0x296   : > { %909 = vadd.xlane.f32.xlu2 %v908_v22  ;;  %v369_v22 = vadd.s32 4, %v365_v52 }
 0x298   : > { %vm406_vm0 = vcmp.eq.s32.totalorder %v369_v22, %v4771_v27 }
 0x299   : > { %v4842_v9 = vsel %vm406_vm0, 0.25, %v4302_v63 }
 0x29a   : > { %6081 = vst [vmem:[#allocation16_spill] sm:$0xff] %v4842_v9 }
 0x2f1   : > { %v913_v43 = vpop.xlane.xlu1 %912 }
 0x2f2   : > { %v928_v44 = vmul.f32 %v4774_v24, %v913_v43  ;;  %v4847_v43 = vand.u32 4294901760, %v971_v37 }
 0x2f4   : > { %v932_v59 = vadd.f32 %v928_v44, %v4788_v50 }
 0x2f6   : > { %v4808_v46 = vand.u32 4294901760, %v932_v59 }
 0x2f8   : > { %v1026_v13 = vsub.f32 %v932_v59, %v4808_v46  ;;  %v979_v59 = vsub.f32 %v4836_v32, %v4850_v1 }
 0x2f9   : > { %v916_v2 = vpop.xlane.xlu0 %915 }
 0x2fa   : > { %v929_v49 = vmul.f32 %v4774_v24, %v916_v2  ;;  %v1027_v17 = vand.u32 4294901760, %v1026_v13 }
 0x2fc   : > { %v933_v56 = vadd.f32 %v929_v49, %v4781_v15  ;;  %v1028_v44 = vsub.f32 %v1026_v13, %v1027_v17  ;;  %v943_v49 = vsel %vm6039_vm4, %v4842_v9, 0 }
 0x2fd   : > { %v4858_v40 = vsub.f32 %v943_v49, %v943_v49 }
 0x2fe   : > { %v4797_v41 = vand.u32 4294901760, %v933_v56  ;;  %v1029_v52 = vand.u32 4294901760, %v1028_v44 }
 0x2ff   : > { %6082 = vst [vmem:[#allocation17_spill] sm:$0xff] %v4858_v40  ;;  %v4867_v22 = vand.u32 4294901760, %v4858_v40 }
 0x300   : > { %v1020_v11 = vsub.f32 %v933_v56, %v4797_v41 }
 0x301   : > { %v919_v60 = vpop.xlane.xlu2 %918  ;;  %6084 = vst [vmem:[#allocation19_spill] sm:$0xff] %v4867_v22  ;;  %v987_v63 = vsub.f32 %v4858_v40, %v4867_v22 }
 0x302   : > { %v930_v4 = vmul.f32 %v4774_v24, %v919_v60  ;;  %v1021_v48 = vand.u32 4294901760, %v1020_v11 }
 0x303   : > { %v4882_v47 = vand.u32 4294901760, %v987_v63 }
 0x304   : > { %v934_v10 = vadd.f32 %v930_v4, %v4804_v62  ;;  %v1022_v23 = vsub.f32 %v1020_v11, %v1021_v48  ;;  %v4864_v4 = vand.u32 4294901760, %v979_v59 }
 0x306   : > { %v4819_v28 = vand.u32 4294901760, %v934_v10  ;;  %v1023_v55 = vand.u32 4294901760, %v1022_v23 }
 0x308   : > { %961 = vmatpush.msrb.mxu1 %v4819_v28  ;;  %1112 = vmatpush.msrb.mxu2 %v4819_v28  ;;  %v1014_v29 = vsub.f32 %v934_v10, %v4819_v28 }
 0x309   : > { %v910_v35 = vpop.xlane.xlu2 %909 }
 0x30a   : > { %v927_v33 = vmul.f32 %v4774_v24, %v910_v35  ;;  %963 = vmatpush.msrb.mxu1 %v4797_v41  ;;  %1068 = vmatpush.msrb.mxu0 %v1014_v29  ;;  %v1015_v38 = vand.u32 4294901760, %v1014_v29 }
 0x30b   : > { %1114 = vmatpush.msrb.mxu2 %v4797_v41 }
 0x30c   : > { %v931_v42 = vadd.f32 %v927_v33, %v4832_v36  ;;  %965 = vmatpush.msrb.mxu1 %v4808_v46  ;;  %1071 = vmatpush.msrb.mxu0 %v1020_v11  ;;  %v1016_v16 = vsub.f32 %v1014_v29, %v1015_v38  ;;  %v946_v11 = vsel %vm6039_vm4, %v4862_v3, 0 }
 0x30d   : > { %1116 = vmatpush.msrb.mxu2 %v4808_v46 }
 0x30e   : > { %v966_v2 = vand.u32 4294901760, %v931_v42  ;;  %1074 = vmatpush.msrb.mxu0 %v1026_v13  ;;  %v1017_v14 = vand.u32 4294901760, %v1016_v16  ;;  %v4877_v13 = vsub.f32 %v946_v11, %v946_v11 }
 0x310   : > { %967 = vmatpush.msrb.mxu1 %v966_v2  ;;  %1018 = vmatpush.msrb.mxu3 %v1017_v14  ;;  %v1032_v56 = vsub.f32 %v931_v42, %v966_v2  ;;  %6085 = vst [vmem:[#allocation20_spill] sm:$0xff] %v4877_v13  ;;  %v4885_v29 = vand.u32 4294901760, %v4877_v13 }
 0x311   : > { %1118 = vmatpush.msrb.mxu2 %v966_v2  ;;  %973 = vmatmul.f32.vlgmr.msrb.gmra.mxu1 %v4847_v43 }
 0x312   : > { %1159 = vmatpush.msra.mxu1 %v1015_v38  ;;  %1024 = vmatpush.msrb.mxu3 %v1023_v55  ;;  %v1033_v60 = vand.u32 4294901760, %v1032_v56  ;;  %6086 = vst [vmem:[#allocation21_spill] sm:$0xff] %v4885_v29 }
 0x313   : > { %1077 = vmatpush.msrb.mxu0 %v1032_v56  ;;  %1122 = vmatmul.f32.vlgmr.msrb.gmra.mxu2 %v4817_v26 }
 0x314   : > { %1163 = vmatpush.msra.mxu1 %v1021_v48  ;;  %1030 = vmatpush.msrb.mxu3 %v1029_v52  ;;  %v1034_v27 = vsub.f32 %v1032_v56, %v1033_v60 }
 0x315   : > { %1080 = vmatmul.f32.vlgmr.msrb.gmra.mxu0 %v4806_v45 }
 0x316   : > { %1167 = vmatpush.msra.mxu1 %v1027_v17  ;;  %v1035_v10 = vand.u32 4294901760, %v1034_v27 }
 0x318   : > { %1171 = vmatpush.msra.mxu1 %v1033_v60  ;;  %1036 = vmatpush.msrb.mxu3 %v1035_v10 }
 0x319   : > { %981 = vmatmul.f32.gmra.mxu1 %v4864_v4  ;;  %3829 = vmatmul.msk.f32.vlgmr.msrb.gmra.mxu3 %vm6039_vm4, %v4791_v5 }
 0x31a   : > { %1202 = vmatpush.msra.mxu3 %v4819_v28  ;;  %v995_v28 = vsub.f32 %v4877_v13, %v4885_v29 }
 0x31b   : > { %1128 = vmatmul.f32.gmra.mxu2 %v4850_v1 }
 0x31c   : > { %1204 = vmatpush.msra.mxu3 %v4797_v41  ;;  %v4895_v41 = vand.u32 4294901760, %v995_v28 }
 0x31d   : > { %1085 = vmatmul.f32.gmra.mxu0 %v4836_v32 }
 0x31e   : > { %1206 = vmatpush.msra.mxu3 %v4808_v46  ;;  %6087 = vst [vmem:[#allocation22_spill] sm:$0xff] %v4895_v41 }
 0x320   : > { %1208 = vmatpush.msra.mxu3 %v966_v2 }
 0x321   : > { %989 = vmatmul.f32.gmra.mxu1 %v4882_v47  ;;  %3830 = vmatmul.msk.f32.gmra.mxu3 %vm6039_vm4, %v4812_v18 }
 0x323   : > { %1134 = vmatmul.f32.gmra.mxu2 %v4867_v22 }
 0x325   : > { %1090 = vmatmul.f32.gmra.mxu0 %v4858_v40 }
 0x329   : > { %997 = vmatmul.f32.gmra.mxu1 %v4895_v41  ;;  %3831 = vmatmul.msk.f32.gmra.mxu3 %vm6039_vm4, %v4842_v9 }
 0x32b   : > { %1140 = vmatmul.f32.gmra.mxu2 %v4885_v29 }
 0x32d   : > { %1095 = vmatmul.f32.gmra.mxu0 %v4877_v13 }
 0x331   : > { %3832 = vmatmul.msk.f32.gmra.mxu3 %vm6039_vm4, %v4862_v3  ;;  %3833 = vmatmul.msk.f32.vlgmr.msra.gmra.mxu1 %vm6039_vm4, %v4791_v5 }
 0x339   : > { %3834 = vmatmul.msk.f32.gmra.mxu1 %vm6039_vm4, %v4812_v18  ;;  %3837 = vmatmul.msk.f32.vlgmr.msra.gmra.mxu3 %vm6039_vm4, %v4791_v5 }
 0x341   : > { %3835 = vmatmul.msk.f32.gmra.mxu1 %vm6039_vm4, %v4842_v9  ;;  %3838 = vmatmul.msk.f32.gmra.mxu3 %vm6039_vm4, %v4812_v18 }
 0x349   : > { %3836 = vmatmul.msk.f32.gmra.mxu1 %vm6039_vm4, %v4862_v3  ;;  %3839 = vmatmul.msk.f32.gmra.mxu3 %vm6039_vm4, %v4842_v9 }
 0x351   : > { %3840 = vmatmul.msk.f32.gmra.mxu3 %vm6039_vm4, %v4862_v3 }
 0x38e   : > { %v974_v46 = vpop.f32.mrf.mxu1 }
 0x392   : > { %v1081_v38 = vpop.f32.mrf.mxu0 }
 0x396   : > { %v982_v48 = vpop.f32.mrf.mxu1  ;;  %v1123_v53 = vpop.f32.mrf.mxu2 }
 0x39a   : > { %v1086_v23 = vpop.f32.mrf.mxu0 }
 0x39c   : > { %v1039_v30 = vpop.f32.mrf.mxu3 }
 0x39e   : > { %v990_v35 = vpop.f32.mrf.mxu1  ;;  %v1129_v14 = vpop.f32.mrf.mxu2 }
 0x3a2   : > { %v1091_v56 = vpop.f32.mrf.mxu0 }
 0x3a4   : > { %v1043_v37 = vpop.f32.mrf.mxu3 }
 0x3a5   : > { %v1044_v2 = vadd.f32 %v1043_v37, %v982_v48 }
 0x3a6   : > { %v998_v33 = vpop.f32.mrf.mxu1  ;;  %v1135_v27 = vpop.f32.mrf.mxu2 }
 0x3a7   : > { %v1087_v55 = vadd.f32 %v1086_v23, %v1044_v2  ;;  %v1040_v2 = vadd.f32 %v1039_v30, %v974_v46 }
 0x3a9   : > { %v1130_v59 = vadd.f32 %v1129_v14, %v1087_v55 }
 0x3aa   : > { %v1096_v51 = vpop.f32.mrf.mxu0 }
 0x3ac   : > { %v1047_v17 = vpop.f32.mrf.mxu3 }
 0x3ad   : > { %v1048_v52 = vadd.f32 %v1047_v17, %v990_v35 }
 0x3ae   : > { %v1174_v42 = vpop.f32.mrf.mxu1  ;;  %v1141_v23 = vpop.f32.mrf.mxu2 }
 0x3af   : > { %v1092_v11 = vadd.f32 %v1091_v56, %v1048_v52 }
 0x3b1   : > { %v1136_v12 = vadd.f32 %v1135_v27, %v1092_v11 }
 0x3b4   : > { %v1051_v16 = vpop.f32.mrf.mxu3 }
 0x3b5   : > { %v1052_v20 = vadd.f32 %v1051_v16, %v998_v33 }
 0x3b6   : > { %v1178_v44 = vpop.f32.mrf.mxu1 }
 0x3b7   : > { %v1179_v60 = vadd.f32 %v1178_v44, %v1130_v59  ;;  %v1097_v8 = vadd.f32 %v1096_v51, %v1052_v20  ;;  %v1082_v44 = vadd.f32 %v1081_v38, %v1040_v2 }
 0x3b9   : > { %v1142_v14 = vadd.f32 %v1141_v23, %v1097_v8  ;;  %v1124_v52 = vadd.f32 %v1123_v53, %v1082_v44 }
 0x3bc   : > { %v1211_v49 = vpop.f32.mrf.mxu3 }
 0x3be   : > { %v1182_v28 = vpop.f32.mrf.mxu1 }
 0x3bf   : > { %v1183_v48 = vadd.f32 %v1182_v28, %v1136_v12 }
 0x3c4   : > { %v1215_v10 = vpop.f32.mrf.mxu3 }
 0x3c5   : > { %v1216_v63 = vadd.f32 %v1215_v10, %v1179_v60 }
 0x3c6   : > { %v1186_v17 = vpop.f32.mrf.mxu1 }
 0x3c7   : > { %v1227_v0 = vsub.f32 %v1216_v63, %v4788_v50  ;;  %v1187_v55 = vadd.f32 %v1186_v17, %v1142_v14 }
 0x3c9   : > { %1237 = vperm.xlu1 %4078, %v1227_v0   ;;  %v1175_v0 = vadd.f32 %v1174_v42, %v1124_v52 }
 0x3cb   : > { %v1212_v12 = vadd.f32 %v1211_v49, %v1175_v0 }
 0x3cc   : > { %v1219_v37 = vpop.f32.mrf.mxu3 }
 0x3cd   : > { %v1220_v25 = vadd.f32 %v1219_v37, %v1183_v48  ;;  %v1226_v20 = vsub.f32 %v1212_v12, %v4832_v36 }
 0x3cf   : > { %v1228_v35 = vsub.f32 %v1220_v25, %v4781_v15 }
 0x3d1   : > { %1242 = vperm.xlu0 %4077, %v1228_v35  }
 0x3d4   : > { %v1223_v56 = vpop.f32.mrf.mxu3 }
 0x3d5   : > { %v1224_v59 = vadd.f32 %v1223_v56, %v1187_v55  ;;  %v418_v56 = vld [vmem:[%s4982_s19 + $0x10] sm:$0xff] }
 0x3d7   : > { %v1229_v33 = vsub.f32 %v1224_v59, %v4804_v62 }
 0x3d9   : > { %1247 = vperm.xlu2 %4079, %v1229_v33   ;;  %v4987_v33 = vadd.f32 1.0, %v418_v56 }
 0x3e1   : > { %1232 = vperm.xlu2 %4079, %v1226_v20  }
 0x433   : > { %v1248_v51 = vpop.permute.xlu2 %1247 }
 0x434   : > { %v4926_v46 = vsub.f32 %v4746_v7, %v1248_v51  ;;  %v4929_v8 = vsub.f32 %v4744_v6, %v1248_v51 }
 0x436   : > { %v1264_v25 = vmul.f32 %v4926_v46, %v4926_v46  ;;  %v1265_v30 = vmul.f32 %v4929_v8, %v4929_v8 }
 0x438   : > { %v1275_v38 = vadd.f32 %v1265_v30, %v1264_v25  ;;  %v419_v30 = vld [vmem:[%s4982_s19 + $0x18] sm:$0xff] }
 0x43a   : > { %1276 = vadd.xlane.f32.xlu1 %v1275_v38 }
 0x43b   : > { %v1238_v53 = vpop.permute.xlu1 %1237  ;;  %v1233_v42 = vpop.permute.xlu2 %1232 }
 0x43c   : > { %v4936_v16 = vsub.f32 %v4734_v58, %v1238_v53  ;;  %v4939_v49 = vsub.f32 %v4732_v57, %v1238_v53  ;;  %v4942_v7 = vsub.f32 %v4752_v21, %v1233_v42  ;;  %v4945_v6 = vsub.f32 %v4750_v19, %v1233_v42 }
 0x43d   : > { %v4993_v42 = vadd.f32 1.0, %v419_v30 }
 0x43e   : > { %v1260_v60 = vmul.f32 %v4936_v16, %v4936_v16  ;;  %v1261_v27 = vmul.f32 %v4939_v49, %v4939_v49  ;;  %v1258_v10 = vmul.f32 %v4942_v7, %v4942_v7  ;;  %v1259_v58 = vmul.f32 %v4945_v6, %v4945_v6 }
 0x440   : > { %v1269_v57 = vadd.f32 %v1261_v27, %v1260_v60  ;;  %v1266_v11 = vadd.f32 %v1259_v58, %v1258_v10 }
 0x442   : > { %1270 = vadd.xlane.f32.xlu0 %v1269_v57  ;;  %1267 = vadd.xlane.f32.xlu1 %v1266_v11 }
 0x443   : > { %v1243_v21 = vpop.permute.xlu0 %1242 }
 0x444   : > { %v4956_v19 = vsub.f32 %v4740_v61, %v1243_v21  ;;  %v4959_v63 = vsub.f32 %v4738_v54, %v1243_v21  ;;  %v416_v21 = vld [vmem:[%s4982_s19] sm:$0xff] }
 0x446   : > { %v1262_v28 = vmul.f32 %v4956_v19, %v4956_v19  ;;  %v1263_v48 = vmul.f32 %v4959_v63, %v4959_v63 }
 0x448   : > { %v1272_v37 = vadd.f32 %v1263_v48, %v1262_v28 }
 0x44a   : > { %1273 = vadd.xlane.f32.xlu2 %v1272_v37  ;;  %v5002_v37 = vadd.f32 1.0, %v416_v21 }
 0x456   : > { %1636 = vrot.lane.b32.xlu0 %v4987_v33, %s4303_s16 }
 0x45b   : > { %1610 = vrot.lane.b32.xlu1 %v4804_v62, %s4294_s26 }
 0x45e   : > { %1606 = vrot.lane.b32.xlu0 %v4788_v50, %s4294_s26 }
 0x462   : > { %1608 = vrot.lane.b32.xlu2 %v4781_v15, %s4294_s26 }
 0x463   : > { %1604 = vrot.lane.b32.xlu1 %v4832_v36, %s4294_s26 }
 0x466   : > { %1632 = vrot.lane.b32.xlu0 %v5002_v37, %s4303_s16 }
 0x46a   : > { %1638 = vrot.lane.b32.xlu2 %v4993_v42, %s4303_s16 }
 0x46b   : > { %1658 = vrot.lane.b32.xlu1 %v419_v30, %s4304_s17 }
 0x472   : > { %1656 = vrot.lane.b32.xlu2 %v418_v56, %s4304_s17 }
 0x473   : > { %1652 = vrot.lane.b32.xlu1 %v416_v21, %s4304_s17  ;;  %v3982_v21 = vld [vmem:[#allocation3 + $0xc] sm:$0xf0] }
 0x4ad   : > { %v1277_v54 = vpop.xlane.xlu1 %1276 }
 0x4ae   : > { %v1281_v61 = vmul.f32 %v1277_v54, %v4774_v24 }
 0x4b0   : > { %v4972_v23 = vand.u32 4294901760, %v1281_v61 }
 0x4b2   : > { %v1348_v2 = vsub.f32 %v1281_v61, %v4972_v23  ;;  %1295 = vmatpush.msra.mxu0 %v4972_v23  ;;  %1446 = vmatpush.msrb.mxu3 %v4972_v23 }
 0x4b4   : > { %v1349_v35 = vand.u32 4294901760, %v1348_v2  ;;  %1402 = vmatpush.msrb.mxu1 %v1348_v2 }
 0x4b5   : > { %v1271_v17 = vpop.xlane.xlu0 %1270  ;;  %v1268_v14 = vpop.xlane.xlu1 %1267 }
 0x4b6   : > { %v1279_v44 = vmul.f32 %v1271_v17, %v4774_v24  ;;  %v1350_v55 = vsub.f32 %v1348_v2, %v1349_v35  ;;  %v1278_v59 = vmul.f32 %v1268_v14, %v4774_v24 }
 0x4b8   : > { %v1351_v52 = vand.u32 4294901760, %v1350_v55  ;;  %v1298_v0 = vand.u32 4294901760, %v1279_v44  ;;  %v1300_v12 = vand.u32 4294901760, %v1278_v59 }
 0x4ba   : > { %1352 = vmatpush.msra.mxu2 %v1351_v52  ;;  %v1360_v51 = vsub.f32 %v1279_v44, %v1298_v0  ;;  %v1366_v38 = vsub.f32 %v1278_v59, %v1300_v12  ;;  %v4305_v52 = vmov 2  }
 0x4bb   : > { %4080 = vset.pattern.permute.xlu0 %v4305_v52  ;;  %4081 = vset.pattern.permute.xlu2 %v4305_v52 }
 0x4bc   : > { %v1361_v27 = vand.u32 4294901760, %v1360_v51  ;;  %v1367_v58 = vand.u32 4294901760, %v1366_v38  ;;  %4082 = vset.pattern.permute.xlu1 %v4305_v52 }
 0x4bd   : > { %v1274_v20 = vpop.xlane.xlu2 %1273 }
 0x4be   : > { %v1280_v25 = vmul.f32 %v1274_v20, %v4774_v24  ;;  %v1362_v11 = vsub.f32 %v1360_v51, %v1361_v27  ;;  %v1368_v48 = vsub.f32 %v1366_v38, %v1367_v58 }
 0x4c0   : > { %v1296_v53 = vand.u32 4294901760, %v1280_v25  ;;  %v1363_v54 = vand.u32 4294901760, %v1362_v11  ;;  %v1369_v61 = vand.u32 4294901760, %v1368_v48  ;;  %v3863_v11 = vld [vmem:[#allocation3] sm:$0xf] }
 0x4c1   : > { %v3864_v48 = vor.u32 %v3982_v21, %v3863_v11 }
 0x4c2   : > { %v1354_v60 = vsub.f32 %v1280_v25, %v1296_v53  ;;  %1297 = vmatpush.msra.mxu0 %v1296_v53  ;;  %1448 = vmatpush.msrb.mxu3 %v1296_v53 }
 0x4c4   : > { %1299 = vmatpush.msra.mxu0 %v1298_v0  ;;  %1405 = vmatpush.msrb.mxu1 %v1354_v60  ;;  %v1355_v10 = vand.u32 4294901760, %v1354_v60 }
 0x4c5   : > { %1450 = vmatpush.msrb.mxu3 %v1298_v0 }
 0x4c6   : > { %1301 = vmatpush.msra.mxu0 %v1300_v12  ;;  %1408 = vmatpush.msrb.mxu1 %v1360_v51  ;;  %v1356_v57 = vsub.f32 %v1354_v60, %v1355_v10 }
 0x4c7   : > { %1452 = vmatpush.msrb.mxu3 %v1300_v12  ;;  %1307 = vmatmul.f32.vlgmr.msra.gmra.mxu0 %v4847_v43 }
 0x4c8   : > { %1493 = vmatpush.msrb.mxu0 %v1349_v35  ;;  %1411 = vmatpush.msrb.mxu1 %v1366_v38  ;;  %v1357_v28 = vand.u32 4294901760, %v1356_v57  ;;  %v5050_v35 = vpop.permute.xlu2 %1608  ;;  %v1637_v44 = vpop.permute.xlu0 %1636 }
 0x4c9   : > { %1456 = vmatmul.f32.vlgmr.msrb.gmra.mxu3 %v4817_v26  ;;  %1414 = vmatmul.f32.vlgmr.msrb.gmra.mxu1 %v4806_v45  ;;  %v1646_v56 = vmul.f32 %v1637_v44, %v4781_v15  ;;  %v6088_v15 = vmov 0  }
 0x4ca   : > { %1497 = vmatpush.msrb.mxu0 %v1355_v10  ;;  %1358 = vmatpush.msra.mxu2 %v1357_v28  ;;  %v3875_v10 = vld [vmem:[#allocation3 + $0x20] sm:$0xf] }
 0x4cc   : > { %1501 = vmatpush.msrb.mxu0 %v1361_v27  ;;  %1364 = vmatpush.msra.mxu2 %v1363_v54 }
 0x4cd   : > { %v5052_v17 = vpop.permute.xlu1 %1610 }
 0x4ce   : > { %1505 = vmatpush.msrb.mxu0 %v1367_v58  ;;  %1370 = vmatpush.msra.mxu2 %v1369_v61  ;;  %v3986_v58 = vld [vmem:[#allocation3 + $0x2c] sm:$0xf0]  ;;  %v3985_v61 = vld [vmem:[#allocation3 + $0x2c] sm:$0xf] }
 0x4cf   : > { %1315 = vmatmul.f32.gmra.mxu0 %v4864_v4  ;;  %3841 = vmatmul.msk.f32.vlgmr.msra.gmra.mxu2 %vm6039_vm4, %v4791_v5  ;;  %v3876_v57 = vor.u32 %v3986_v58, %v3875_v10 }
 0x4d0   : > { %1536 = vmatpush.msrb.mxu2 %v4972_v23  ;;  %v417_v23 = vld [vmem:[%s4982_s19 + $0x8] sm:$0xff]  ;;  %v1639_v14 = vpop.permute.xlu2 %1638  ;;  %v5058_v20 = vpop.permute.xlu0 %1606 }
 0x4d1   : > { %1462 = vmatmul.f32.gmra.mxu3 %v4850_v1  ;;  %1419 = vmatmul.f32.gmra.mxu1 %v4836_v32  ;;  %v5031_v2 = vadd.f32 1.0, %v417_v23 }
 0x4d2   : > { %1538 = vmatpush.msrb.mxu2 %v1296_v53  ;;  %1654 = vrot.lane.b32.xlu0 %v417_v23, %s4304_s17  ;;  %v3889_v23 = vld [vmem:[#allocation3 + $0x38] sm:$0xf0]  ;;  %s3693_s17 = sshll.u32 %s5928_s15, 4  ;;  %s3694_s17 = int_to_ptr.vmem [resolvable:$true] %s3693_s17 }
 0x4d3   : > { %1634 = vrot.lane.b32.xlu2 %v5031_v2, %s4303_s16 }
 0x4d4   : > { %1540 = vmatpush.msrb.mxu2 %v1298_v0 }
 0x4d5   : > { %v5054_v55 = vpop.permute.xlu1 %1604 }
 0x4d6   : > { %1542 = vmatpush.msrb.mxu2 %v1300_v12  ;;  %v1647_v12 = vmul.f32 %v1639_v14, %v4804_v62 }
 0x4d7   : > { %1323 = vmatmul.f32.gmra.mxu0 %v4882_v47  ;;  %3842 = vmatmul.msk.f32.gmra.mxu2 %vm6039_vm4, %v4812_v18 }
 0x4d8   : > { %v1657_v59 = vpop.permute.xlu2 %1656  ;;  %v1633_v30 = vpop.permute.xlu0 %1632 }
 0x4d9   : > { %1468 = vmatmul.f32.gmra.mxu3 %v4867_v22  ;;  %1424 = vmatmul.f32.gmra.mxu1 %v4858_v40  ;;  %v1666_v0 = vadd.f32 %v1657_v59, %v1646_v56  ;;  %v1644_v38 = vmul.f32 %v1633_v30, %v4832_v36  ;;  %v3892_v56 = vor.u32 %v3985_v61, %v3889_v23 }
 0x4db   : > { %1708 = vperm.xlu0 %4080, %v1666_v0  }
 0x4dd   : > { %v1659_v51 = vpop.permute.xlu1 %1658 }
 0x4de   : > { %v1667_v25 = vadd.f32 %v1659_v51, %v1647_v12  ;;  %v3981_v12 = vld [vmem:[#allocation3 + $0xc] sm:$0xf]  ;;  %v3885_v51 = vld [vmem:[#allocation3 + $0x18] sm:$0xf0] }
 0x4df   : > { %1331 = vmatmul.f32.gmra.mxu0 %v4895_v41  ;;  %3843 = vmatmul.msk.f32.gmra.mxu2 %vm6039_vm4, %v4842_v9 }
 0x4e0   : > { %1713 = vperm.xlu2 %4081, %v1667_v25  }
 0x4e1   : > { %1474 = vmatmul.f32.gmra.mxu3 %v4885_v29  ;;  %1429 = vmatmul.f32.gmra.mxu1 %v4877_v13 }
 0x4e5   : > { %v1653_v53 = vpop.permute.xlu1 %1652 }
 0x4e6   : > { %v1664_v60 = vadd.f32 %v1653_v53, %v1644_v38  ;;  %v3888_v38 = vor.u32 %v3981_v12, %v3885_v51 }
 0x4e7   : > { %3844 = vmatmul.msk.f32.gmra.mxu2 %vm6039_vm4, %v4862_v3  ;;  %3845 = vmatmul.msk.f32.vlgmr.msrb.gmra.mxu0 %vm6039_vm4, %v4791_v5 }
 0x4e8   : > { %1698 = vperm.xlu1 %4082, %v1664_v60   ;;  %4084 = vset.pattern.permute.xlu2 %v6088_v15 }
 0x4ef   : > { %3846 = vmatmul.msk.f32.gmra.mxu0 %vm6039_vm4, %v4812_v18  ;;  %3849 = vmatmul.msk.f32.vlgmr.msrb.gmra.mxu2 %vm6039_vm4, %v4791_v5 }
 0x4f0   : > { %4083 = vset.pattern.permute.xlu1 %v6088_v15 }
 0x4f1   : > { %2118 = vrot.lane.b32.xlu1 %v3876_v57, %s4294_s26 }
 0x4f7   : > { %3847 = vmatmul.msk.f32.gmra.mxu0 %vm6039_vm4, %v4842_v9  ;;  %3850 = vmatmul.msk.f32.gmra.mxu2 %vm6039_vm4, %v4812_v18 }
 0x4f9   : > { %2112 = vrot.lane.b32.xlu1 %v3864_v48, %s4294_s26 }
 0x4ff   : > { %3848 = vmatmul.msk.f32.gmra.mxu0 %vm6039_vm4, %v4862_v3  ;;  %3851 = vmatmul.msk.f32.gmra.mxu2 %vm6039_vm4, %v4842_v9 }
 0x501   : > { %2290 = vrot.lane.b32.xlu1 %v3892_v56, %s4297_s9 }
 0x507   : > { %3852 = vmatmul.msk.f32.gmra.mxu2 %vm6039_vm4, %v4862_v3 }
 0x509   : > { %2284 = vrot.lane.b32.xlu1 %v3888_v38, %s4297_s9 }
 0x52d   : > { %v1635_v36 = vpop.permute.xlu2 %1634 }
 0x52e   : > { %v1645_v44 = vmul.f32 %v1635_v36, %v4788_v50 }
 0x544   : > { %v1308_v27 = vpop.f32.mrf.mxu0  ;;  %v1655_v59 = vpop.permute.xlu0 %1654 }
 0x545   : > { %v1665_v52 = vadd.f32 %v1655_v59, %v1645_v44  ;;  %v1309_v53 = vadd.f32 1e-05, %v1308_v27 }
 0x546   : > { %v1415_v25 = vpop.f32.mrf.mxu1 }
 0x547   : > { %1703 = vperm.xlu0 %4080, %v1665_v52  }
 0x54c   : > { %v1316_v62 = vpop.f32.mrf.mxu0  ;;  %v1457_v60 = vpop.f32.mrf.mxu3 }
 0x54d   : > { %v1317_v57 = vadd.f32 1e-05, %v1316_v62 }
 0x54e   : > { %v1420_v21 = vpop.f32.mrf.mxu1 }
 0x54f   : > { %4085 = vset.pattern.permute.xlu0 %v6088_v15 }
 0x552   : > { %v1373_v28 = vpop.f32.mrf.mxu2 }
 0x553   : > { %v1374_v10 = vadd.f32 %v1373_v28, %v1309_v53 }
 0x554   : > { %v1324_v54 = vpop.f32.mrf.mxu0  ;;  %v1463_v61 = vpop.f32.mrf.mxu3 }
 0x555   : > { %v1416_v11 = vadd.f32 %v1415_v25, %v1374_v10  ;;  %v1325_v59 = vadd.f32 1e-05, %v1324_v54 }
 0x556   : > { %v1425_v12 = vpop.f32.mrf.mxu1 }
 0x557   : > { %v1458_v48 = vadd.f32 %v1457_v60, %v1416_v11 }
 0x55a   : > { %v1377_v14 = vpop.f32.mrf.mxu2 }
 0x55b   : > { %v1378_v36 = vadd.f32 %v1377_v14, %v1317_v57 }
 0x55c   : > { %v1332_v0 = vpop.f32.mrf.mxu0  ;;  %v1469_v28 = vpop.f32.mrf.mxu3 }
 0x55d   : > { %v1421_v52 = vadd.f32 %v1420_v21, %v1378_v36  ;;  %v1333_v62 = vadd.f32 1e-05, %v1332_v0 }
 0x55e   : > { %v1430_v54 = vpop.f32.mrf.mxu1 }
 0x55f   : > { %v1464_v51 = vadd.f32 %v1463_v61, %v1421_v52 }
 0x562   : > { %v1381_v30 = vpop.f32.mrf.mxu2 }
 0x563   : > { %v1382_v38 = vadd.f32 %v1381_v30, %v1325_v59 }
 0x564   : > { %v1508_v50 = vpop.f32.mrf.mxu0 }
 0x565   : > { %v1509_v23 = vadd.f32 %v1508_v50, %v1458_v48  ;;  %v1426_v25 = vadd.f32 %v1425_v12, %v1382_v38 }
 0x567   : > { %v1470_v57 = vadd.f32 %v1469_v28, %v1426_v25 }
 0x56a   : > { %v1385_v58 = vpop.f32.mrf.mxu2 }
 0x56b   : > { %v1386_v11 = vadd.f32 %v1385_v58, %v1333_v62 }
 0x56c   : > { %v1512_v44 = vpop.f32.mrf.mxu0 }
 0x56d   : > { %v1513_v15 = vadd.f32 %v1512_v44, %v1464_v51 }
 0x572   : > { %v1545_v56 = vpop.f32.mrf.mxu2 }
 0x573   : > { %v1546_v27 = vadd.f32 %v1545_v56, %v1509_v23  ;;  %v1431_v23 = vadd.f32 %v1430_v54, %v1386_v11  ;;  %v1475_v56 = vpop.f32.mrf.mxu3 }
 0x574   : > { %v1516_v14 = vpop.f32.mrf.mxu0 }
 0x575   : > { %4096 = vrsqrt.f32 %v1546_v27  ;;  %v1517_v48 = vadd.f32 %v1516_v14, %v1470_v57  ;;  %vm1566_vm15 = vweird.f32 %v1546_v27  ;;  %v1476_v51 = vadd.f32 %v1475_v56, %v1431_v23 }
 0x57a   : > { %v1549_v53 = vpop.f32.mrf.mxu2 }
 0x57b   : > { %v4097_v3 = vpop.eup %4096  ;;  %v1550_v10 = vadd.f32 %v1549_v53, %v1513_v15 }
 0x57c   : > { %v1561_v60 = vmul.f32 %v4097_v3, %v1546_v27  ;;  %vm1567_vm7 = vweird.f32 %v4097_v3  ;;  %v1520_v52 = vpop.f32.mrf.mxu0 }
 0x57d   : > { %4098 = vrsqrt.f32 %v1550_v10  ;;  %vm1568_vm0 = vmor %vm1566_vm15, %vm1567_vm7  ;;  %v1521_v28 = vadd.f32 %v1520_v52, %v1476_v51  ;;  %vm1576_vm4 = vweird.f32 %v1550_v10 }
 0x57e   : > { %v1562_v50 = vmul.f32 %v4097_v3, %v1561_v60 }
 0x580   : > { %v1563_v21 = vmul.f32 0.5, %v1562_v50 }
 0x582   : > { %v1564_v36 = vsub.f32 1.5, %v1563_v21  ;;  %v1553_v61 = vpop.f32.mrf.mxu2 }
 0x583   : > { %v4099_v30 = vpop.eup %4098  ;;  %v1554_v44 = vadd.f32 %v1553_v61, %v1517_v48 }
 0x584   : > { %v1565_v59 = vmul.f32 %v4097_v3, %v1564_v36  ;;  %v1571_v0 = vmul.f32 %v4099_v30, %v1550_v10  ;;  %vm1577_vm13 = vweird.f32 %v4099_v30 }
 0x585   : > { %4100 = vrsqrt.f32 %v1554_v44  ;;  %vm1578_vm7 = vmor %vm1576_vm4, %vm1577_vm13 }
 0x586   : > { %v1572_v15 = vmul.f32 %v4099_v30, %v1571_v0  ;;  %v1569_v12 = vsel %vm1568_vm0, %v4097_v3, %v1565_v59  ;;  %vm1586_vm0 = vweird.f32 %v1554_v44 }
 0x587   : > { %v1616_v58 = vmul.f32 %v5054_v55, %v1569_v12 }
 0x588   : > { %v1573_v38 = vmul.f32 0.5, %v1572_v15  ;;  %v1699_v15 = vpop.permute.xlu1 %1698 }
 0x589   : > { %v1624_v53 = vmul.f32 %v5002_v37, %v1616_v58 }
 0x58a   : > { %v1574_v62 = vsub.f32 1.5, %v1573_v38  ;;  %v1557_v25 = vpop.f32.mrf.mxu2 }
 0x58b   : > { %v4101_v60 = vpop.eup %4100  ;;  %v1558_v14 = vadd.f32 %v1557_v25, %v1521_v28  ;;  %1670 = vperm.xlu1 %4083, %v1624_v53  }
 0x58c   : > { %v1575_v27 = vmul.f32 %v4099_v30, %v1574_v62  ;;  %v1581_v50 = vmul.f32 %v4101_v60, %v1554_v44  ;;  %vm1587_vm15 = vweird.f32 %v4101_v60 }
 0x58d   : > { %4102 = vrsqrt.f32 %v1558_v14  ;;  %vm1588_vm6 = vmor %vm1586_vm0, %vm1587_vm15  ;;  %vm1596_vm13 = vweird.f32 %v1558_v14 }
 0x58e   : > { %v1582_v57 = vmul.f32 %v4101_v60, %v1581_v50  ;;  %v1579_v3 = vsel %vm1578_vm7, %v4099_v30, %v1575_v27 }
 0x58f   : > { %v1617_v11 = vmul.f32 %v5058_v20, %v1579_v3 }
 0x590   : > { %v1583_v55 = vmul.f32 0.5, %v1582_v57  ;;  %v5077_v52 = vpop.permute.xlu1 %2118 }
 0x591   : > { %v1625_v54 = vmul.f32 %v5031_v2, %v1617_v11 }
 0x592   : > { %v1584_v21 = vsub.f32 1.5, %v1583_v55 }
 0x593   : > { %v4103_v37 = vpop.eup %4102  ;;  %1675 = vperm.xlu2 %4084, %v1625_v54  }
 0x594   : > { %v1585_v48 = vmul.f32 %v4101_v60, %v1584_v21  ;;  %v1591_v36 = vmul.f32 %v4103_v37, %v1558_v14  ;;  %vm1597_vm4 = vweird.f32 %v4103_v37 }
 0x595   : > { %vm1598_vm7 = vmor %vm1596_vm13, %vm1597_vm4 }
 0x596   : > { %v1592_v61 = vmul.f32 %v4103_v37, %v1591_v36  ;;  %v1589_v10 = vsel %vm1588_vm6, %v4101_v60, %v1585_v48 }
 0x597   : > { %v1618_v23 = vmul.f32 %v5050_v35, %v1589_v10  ;;  %v5081_v35 = vpop.permute.xlu2 %1713 }
 0x598   : > { %v1593_v56 = vmul.f32 0.5, %v1592_v61  ;;  %v5079_v12 = vpop.permute.xlu1 %2112 }
 0x599   : > { %v1626_v30 = vmul.f32 %v4987_v33, %v1618_v23  ;;  %v1709_v33 = vpop.permute.xlu0 %1708 }
 0x59a   : > { %v1594_v59 = vsub.f32 1.5, %v1593_v56 }
 0x59b   : > { %1680 = vperm.xlu2 %4084, %v1626_v30  }
 0x59c   : > { %v1595_v20 = vmul.f32 %v4103_v37, %v1594_v59 }
 0x59e   : > { %v1599_v2 = vsel %vm1598_vm7, %v4103_v37, %v1595_v20 }
 0x59f   : > { %v1619_v0 = vmul.f32 %v5052_v17, %v1599_v2 }
 0x5a0   : > { %v5083_v51 = vpop.permute.xlu1 %2290 }
 0x5a1   : > { %v1627_v44 = vmul.f32 %v4993_v42, %v1619_v0 }
 0x5a3   : > { %1685 = vperm.xlu1 %4083, %v1627_v44  }
 0x5a8   : > { %v5093_v60 = vpop.permute.xlu1 %2284 }
 0x5b9   : > { %v1704_v38 = vpop.permute.xlu0 %1703 }
 0x5ed   : > { %v1676_v58 = vpop.permute.xlu2 %1675 }
 0x5ee   : > { %v1690_v28 = vmul.f32 %v1676_v58, %v4936_v16  ;;  %v1691_v53 = vmul.f32 %v1676_v58, %v4939_v49 }
 0x5f0   : > { %v5087_v17 = vadd.f32 %v1704_v38, %v1690_v28  ;;  %v5089_v42 = vadd.f32 %v1704_v38, %v1691_v53 }
 0x5f2   : > { %v3855_v62 = vmul.f32 -1.442695, %v5087_v17  ;;  %v3856_v25 = vmul.f32 -1.442695, %v5089_v42 }
 0x5f4   : > { %4104 = vpow2.f32 %v3855_v62 }
 0x5f5   : > { %4106 = vpow2.f32 %v3856_v25  ;;  %v1681_v14 = vpop.permute.xlu2 %1680 }
 0x5f6   : > { %v1692_v27 = vmul.f32 %v1681_v14, %v4956_v19  ;;  %v1693_v50 = vmul.f32 %v1681_v14, %v4959_v63 }
 0x5f8   : > { %v5097_v16 = vadd.f32 %v1709_v33, %v1692_v27  ;;  %v5099_v49 = vadd.f32 %v1709_v33, %v1693_v50 }
 0x5fa   : > { %v4105_v57 = vpop.eup %4104  ;;  %v3857_v3 = vmul.f32 -1.442695, %v5097_v16  ;;  %v3858_v54 = vmul.f32 -1.442695, %v5099_v49 }
 0x5fb   : > { %v4107_v11 = vpop.eup %4106  ;;  %v1750_v55 = vadd.f32 1.0, %v4105_v57 }
 0x5fc   : > { %v1751_v21 = vadd.f32 1.0, %v4107_v11  ;;  %4108 = vpow2.f32 %v3857_v3 }
 0x5fd   : > { %4110 = vrcp.f32 %v1750_v55  ;;  %v1671_v37 = vpop.permute.xlu1 %1670  ;;  %v1795_v44 = vand.u32 2147483647, %v1750_v55  ;;  %v1797_v33 = vand.u32 2147483648, %v1750_v55  ;;  %vm1791_vm0 = vweird.f32 %v1750_v55 }
 0x5fe   : > { %4112 = vrcp.f32 %v1751_v21  ;;  %v1688_v19 = vmul.f32 %v1671_v37, %v4942_v7  ;;  %v1689_v63 = vmul.f32 %v1671_v37, %v4945_v6  ;;  %v1812_v38 = vand.u32 2147483648, %v1751_v21 }
 0x5ff   : > { %4114 = vpow2.f32 %v3858_v54  ;;  %v1810_v53 = vand.u32 2147483647, %v1751_v21  ;;  %v1798_v14 = vor.u32 1.1754944e-38, %v1797_v33  ;;  %vm1806_vm13 = vweird.f32 %v1751_v21 }
 0x600   : > { %v5105_v48 = vadd.f32 %v1699_v15, %v1688_v19  ;;  %v5107_v61 = vadd.f32 %v1699_v15, %v1689_v63  ;;  %vm1796_vm7 = vcmp.eq.f32.partialorder %v1795_v44, 8.507059e+37  ;;  %v1813_v57 = vor.u32 1.1754944e-38, %v1812_v38 }
 0x601   : > { %vm1811_vm11 = vcmp.eq.f32.partialorder %v1810_v53, 8.507059e+37 }
 0x602   : > { %v4109_v36 = vpop.eup %4108  ;;  %v3853_v56 = vmul.f32 -1.442695, %v5105_v48  ;;  %v3854_v6 = vmul.f32 -1.442695, %v5107_v61 }
 0x603   : > { %v4111_v10 = vpop.eup %4110  ;;  %v5109_v23 = vadd.f32 1.0, %v4109_v36 }
 0x604   : > { %v4113_v30 = vpop.eup %4112  ;;  %v1787_v59 = vmul.f32 %v4111_v10, %v1750_v55  ;;  %vm1792_vm6 = vweird.f32 %v4111_v10 }
 0x605   : > { %v4115_v20 = vpop.eup %4114  ;;  %v1802_v2 = vmul.f32 %v4113_v30, %v1751_v21  ;;  %4116 = vrcp.f32 %v5109_v23  ;;  %vm1807_vm15 = vweird.f32 %v4113_v30  ;;  %vm1793_vm4 = vmor %vm1791_vm0, %vm1792_vm6  ;;  %v1827_v21 = vand.u32 2147483648, %v5109_v23 }
 0x606   : > { %v1788_v0 = vsub.f32 1.0, %v1787_v59  ;;  %v5113_v7 = vadd.f32 1.0, %v4115_v20  ;;  %4118 = vpow2.f32 %v3853_v56  ;;  %vm1808_vm12 = vmor %vm1806_vm13, %vm1807_vm15 }
 0x607   : > { %v1803_v15 = vsub.f32 1.0, %v1802_v2 }
 0x608   : > { %v1789_v58 = vmul.f32 %v4111_v10, %v1788_v0  ;;  %4120 = vrcp.f32 %v5113_v7  ;;  %v1825_v0 = vand.u32 2147483647, %v5109_v23  ;;  %v1840_v33 = vand.u32 2147483647, %v5113_v7 }
 0x609   : > { %v1804_v28 = vmul.f32 %v4113_v30, %v1803_v15  ;;  %4122 = vpow2.f32 %v3854_v6  ;;  %v1828_v15 = vor.u32 1.1754944e-38, %v1827_v21 }
 0x60a   : > { %v1790_v62 = vadd.f32 %v4111_v10, %v1789_v58  ;;  %vm1826_vm0 = vcmp.eq.f32.partialorder %v1825_v0, 8.507059e+37 }
 0x60b   : > { %v4117_v25 = vpop.eup %4116  ;;  %v1805_v27 = vadd.f32 %v4113_v30, %v1804_v28 }
 0x60c   : > { %v1794_v50 = vsel %vm1793_vm4, %v4111_v10, %v1790_v62  ;;  %v1817_v3 = vmul.f32 %v4117_v25, %v5109_v23  ;;  %v4119_v11 = vpop.eup %4118  ;;  %vm1822_vm6 = vweird.f32 %v4117_v25  ;;  %vm1836_vm4 = vweird.f32 %v5113_v7 }
 0x60d   : > { %v1799_v54 = vsel %vm1796_vm7, %v1798_v14, %v1794_v50  ;;  %v1809_v37 = vsel %vm1808_vm12, %v4113_v30, %v1805_v27  ;;  %v5119_v56 = vadd.f32 1.0, %v4119_v11  ;;  %vm1841_vm7 = vcmp.eq.f32.partialorder %v1840_v33, 8.507059e+37 }
 0x60e   : > { %v4121_v19 = vpop.eup %4120  ;;  %v1814_v63 = vsel %vm1811_vm11, %v1813_v57, %v1809_v37  ;;  %v1878_v55 = vmul.f32 %v1799_v54, %v5087_v17  ;;  %v1818_v36 = vsub.f32 1.0, %v1817_v3  ;;  %vm1821_vm11 = vweird.f32 %v5109_v23 }
 0x60f   : > { %v1879_v59 = vmul.f32 %v1814_v63, %v5089_v42  ;;  %v1832_v10 = vmul.f32 %v4121_v19, %v5113_v7  ;;  %v4123_v20 = vpop.eup %4122  ;;  %4124 = vrcp.f32 %v5119_v56  ;;  %v1842_v42 = vand.u32 2147483648, %v5113_v7  ;;  %vm1823_vm12 = vmor %vm1821_vm11, %vm1822_vm6 }
 0x610   : > { %v1819_v2 = vmul.f32 %v4117_v25, %v1818_v36  ;;  %v1749_v44 = vadd.f32 1.0, %v4123_v20  ;;  %vm1837_vm15 = vweird.f32 %v4121_v19  ;;  %vm1761_vm11 = vweird.f32 %v5119_v56 }
 0x611   : > { %v1893_v30 = vpack.c.bf16 %v1879_v59, %v1878_v55  ;;  %v1833_v6 = vsub.f32 1.0, %v1832_v10  ;;  %vm1838_vm13 = vmor %vm1836_vm4, %vm1837_vm15  ;;  %v1843_v23 = vor.u32 1.1754944e-38, %v1842_v42 }
 0x612   : > { %v1820_v17 = vadd.f32 %v4117_v25, %v1819_v2  ;;  %4126 = vrcp.f32 %v1749_v44  ;;  %v1780_v0 = vand.u32 2147483647, %v1749_v44  ;;  %vm1776_vm4 = vweird.f32 %v1749_v44 }
 0x613   : > { %1897 = vst [vmem:[#allocation3 + $0x14] sm:$0xff] %v1893_v30  ;;  %v1834_v58 = vmul.f32 %v4121_v19, %v1833_v6 }
 0x614   : > { %v1824_v38 = vsel %vm1823_vm12, %v4117_v25, %v1820_v17 }
 0x615   : > { %v1829_v28 = vsel %vm1826_vm0, %v1828_v15, %v1824_v38  ;;  %v1835_v53 = vadd.f32 %v4121_v19, %v1834_v58  ;;  %v1686_v62 = vpop.permute.xlu1 %1685  ;;  %v4125_v14 = vpop.eup %4124 }
 0x616   : > { %v1694_v27 = vmul.f32 %v1686_v62, %v4926_v46  ;;  %v1880_v57 = vmul.f32 %v1829_v28, %v5097_v16  ;;  %v1757_v3 = vmul.f32 %v4125_v14, %v5119_v56  ;;  %v1695_v11 = vmul.f32 %v1686_v62, %v4929_v8 }
 0x617   : > { %v1839_v50 = vsel %vm1838_vm13, %v4121_v19, %v1835_v53  ;;  %v1765_v46 = vand.u32 2147483647, %v5119_v56  ;;  %v1767_v19 = vand.u32 2147483648, %v5119_v56  ;;  %vm1762_vm6 = vweird.f32 %v4125_v14 }
 0x618   : > { %v1844_v25 = vsel %vm1841_vm7, %v1843_v23, %v1839_v50  ;;  %v5135_v54 = vadd.f32 %v5081_v35, %v1694_v27  ;;  %v4127_v37 = vpop.eup %4126  ;;  %v1758_v63 = vsub.f32 1.0, %v1757_v3  ;;  %v5139_v55 = vadd.f32 %v5081_v35, %v1695_v11  ;;  %vm1763_vm12 = vmor %vm1761_vm11, %vm1762_vm6 }
 0x619   : > { %v1881_v7 = vmul.f32 %v1844_v25, %v5099_v49  ;;  %v1772_v16 = vmul.f32 %v4127_v37, %v1749_v44  ;;  %v1782_v35 = vand.u32 2147483648, %v1749_v44  ;;  %v1768_v20 = vor.u32 1.1754944e-38, %v1767_v19 }
 0x61a   : > { %v3859_v36 = vmul.f32 -1.442695, %v5135_v54  ;;  %v1759_v8 = vmul.f32 %v4125_v14, %v1758_v63  ;;  %v3860_v21 = vmul.f32 -1.442695, %v5139_v55  ;;  %vm1777_vm15 = vweird.f32 %v4127_v37  ;;  %v5156_v63 = vld [vmem:[#allocation3 + $0x10] sm:$0xff] }
 0x61b   : > { %v1894_v59 = vpack.c.bf16 %v1881_v7, %v1880_v57  ;;  %v1773_v10 = vsub.f32 1.0, %v1772_v16  ;;  %vm1766_vm0 = vcmp.eq.f32.partialorder %v1765_v46, 8.507059e+37  ;;  %vm1778_vm13 = vmor %vm1776_vm4, %vm1777_vm15  ;;  %v1783_v33 = vor.u32 1.1754944e-38, %v1782_v35  ;;  %v5160_v16 = vld [vmem:[#allocation3 + $0x18] sm:$0xff] }
 0x61c   : > { %4128 = vpow2.f32 %v3859_v36  ;;  %v1760_v49 = vadd.f32 %v4125_v14, %v1759_v8  ;;  %vm1781_vm7 = vcmp.eq.f32.partialorder %v1780_v0, 8.507059e+37  ;;  %v1919_v35 = vsel %vm4676_vm3, %v5160_v16, 0 }
 0x61d   : > { %1898 = vst [vmem:[#allocation3 + $0x24] sm:$0xff] %v1894_v59  ;;  %4130 = vpow2.f32 %v3860_v21  ;;  %v1774_v2 = vmul.f32 %v4127_v37, %v1773_v10  ;;  %v1918_v21 = vsel %vm4680_vm10, %v5156_v63, 0 }
 0x61e   : > { %v1764_v30 = vsel %vm1763_vm12, %v4125_v14, %v1760_v49 }
 0x61f   : > { %v1769_v6 = vsel %vm1766_vm0, %v1768_v20, %v1764_v30  ;;  %v1775_v17 = vadd.f32 %v4127_v37, %v1774_v2 }
 0x620   : > { %v1876_v58 = vmul.f32 %v1769_v6, %v5105_v48 }
 0x621   : > { %v1779_v15 = vsel %vm1778_vm13, %v4127_v37, %v1775_v17  ;;  %v2079_v17 = vunpack.c.l.b16 %v1918_v21 }
 0x622   : > { %v4129_v42 = vpop.eup %4128  ;;  %v1784_v38 = vsel %vm1781_vm7, %v1783_v33, %v1779_v15  ;;  %v2080_v33 = vunpack.c.h.b16 %v1918_v21 }
 0x623   : > { %v4131_v56 = vpop.eup %4130  ;;  %v1754_v28 = vadd.f32 1.0, %v4129_v42  ;;  %v1877_v53 = vmul.f32 %v1784_v38, %v5107_v61 }
 0x624   : > { %v1755_v62 = vadd.f32 1.0, %v4131_v56 }
 0x625   : > { %4132 = vrcp.f32 %v1754_v28  ;;  %v1892_v23 = vpack.c.bf16 %v1877_v53, %v1876_v58  ;;  %v1857_v3 = vand.u32 2147483648, %v1754_v28  ;;  %v1855_v7 = vand.u32 2147483647, %v1754_v28 }
 0x626   : > { %4134 = vrcp.f32 %v1755_v62  ;;  %v1872_v61 = vand.u32 2147483648, %v1755_v62  ;;  %v1870_v19 = vand.u32 2147483647, %v1755_v62  ;;  %vm1851_vm12 = vweird.f32 %v1754_v28 }
 0x627   : > { %1896 = vst [vmem:[#allocation3 + $0x4] sm:$0xff] %v1892_v23  ;;  %v1858_v59 = vor.u32 1.1754944e-38, %v1857_v3  ;;  %vm1866_vm0 = vweird.f32 %v1755_v62  ;;  %vm1856_vm4 = vcmp.eq.f32.partialorder %v1855_v7, 8.507059e+37 }
 0x628   : > { %v1873_v49 = vor.u32 1.1754944e-38, %v1872_v61  ;;  %vm1871_vm7 = vcmp.eq.f32.partialorder %v1870_v19, 8.507059e+37 }
 0x62b   : > { %v4133_v14 = vpop.eup %4132 }
 0x62c   : > { %v4135_v27 = vpop.eup %4134  ;;  %v1847_v44 = vmul.f32 %v4133_v14, %v1754_v28  ;;  %vm1852_vm6 = vweird.f32 %v4133_v14  ;;  %v5182_v28 = vunpack.c.l.b16 %v1919_v35 }
 0x62d   : > { %v1862_v50 = vmul.f32 %v4135_v27, %v1755_v62  ;;  %vm1867_vm11 = vweird.f32 %v4135_v27  ;;  %vm1853_vm15 = vmor %vm1851_vm12, %vm1852_vm6 }
 0x62e   : > { %v1848_v57 = vsub.f32 1.0, %v1847_v44  ;;  %v5148_v25 = vld [vmem:[#allocation3] sm:$0xff]  ;;  %v5150_v48 = vld [vmem:[#allocation3 + $0x8] sm:$0xff]  ;;  %vm1868_vm13 = vmor %vm1866_vm0, %vm1867_vm11 }
 0x62f   : > { %v1863_v11 = vsub.f32 1.0, %v1862_v50  ;;  %1988 = vrot.lane.b32.xlu1 %v5148_v25, %s4295_s28  ;;  %1948 = vrot.lane.b32.xlu2 %v5148_v25, %s4294_s26  ;;  %v1916_v0 = vsel %vm4680_vm10, %v5148_v25, 0  ;;  %v1917_v56 = vsel %vm4676_vm3, %v5150_v48, 0  ;;  %v3980_v23 = vld [vmem:[#allocation3 + $0x4] sm:$0xf]  ;;  %v1932_v44 = vsel %vm4500_vm9, %v5148_v25, 0 }
 0x630   : > { %v1849_v37 = vmul.f32 %v4133_v14, %v1848_v57  ;;  %1990 = vrot.lane.b32.xlu0 %v5150_v48, %s4295_s28  ;;  %v2076_v15 = vunpack.c.l.b16 %v1916_v0  ;;  %v2077_v58 = vunpack.c.h.b16 %v1916_v0  ;;  %v5180_v38 = vunpack.c.l.b16 %v1917_v56  ;;  %v3871_v57 = vld [vmem:[#allocation3 + $0x8] sm:$0xf] }
 0x631   : > { %v1864_v46 = vmul.f32 %v4135_v27, %v1863_v11  ;;  %v1934_v50 = vsel %vm4500_vm9, %v5156_v63, 0  ;;  %v2178_v3 = vunpack.c.l.b16 %v1932_v44  ;;  %v3983_v11 = vld [vmem:[#allocation3 + $0x14] sm:$0xf0]  ;;  %v1933_v19 = vsel %vm4565_vm1, %v5150_v48, 0 }
 0x632   : > { %v1850_v36 = vadd.f32 %v4133_v14, %v1849_v37  ;;  %v5188_v53 = vpack.c.b16 %v2080_v33, %v2077_v58  ;;  %v2181_v37 = vunpack.c.l.b16 %v1934_v50  ;;  %v3872_v7 = vor.u32 %v3983_v11, %v3871_v57  ;;  %v5236_v58 = vld [vmem:[#allocation3 + $0x20] sm:$0xff] }
 0x633   : > { %v1865_v8 = vadd.f32 %v4135_v27, %v1864_v46  ;;  %v2180_v21 = vunpack.c.l.b16 %v1933_v19  ;;  %v1927_v56 = vsel %vm4589_vm8, %v5160_v16, 0  ;;  %v1928_v39 = vsel %vm4537_vm14, %v5236_v58, 0 }
 0x634   : > { %v1854_v10 = vsel %vm1853_vm15, %v4133_v14, %v1850_v36  ;;  %v3865_v14 = vld [vmem:[#allocation3 + $0x10] sm:$0xf0]  ;;  %v2190_v61 = vpack.c.b16 %v2181_v37, %v2178_v3  ;;  %v3984_v37 = vld [vmem:[#allocation3 + $0x24] sm:$0xf]  ;;  %vm6100_vm15 = vcmask 924672  }
 0x635   : > { %v1859_v20 = vsel %vm1856_vm4, %v1858_v59, %v1854_v10  ;;  %v1869_v2 = vsel %vm1868_vm13, %v4135_v27, %v1865_v8  ;;  %v3868_v27 = vor.u32 %v3980_v23, %v3865_v14  ;;  %v1924_v59 = vsel %vm4537_vm14, %v5148_v25, 0  ;;  %vm6101_vm0 = vmmov %vm6100_vm15 }
 0x636   : > { %v1874_v30 = vsel %vm1871_vm7, %v1873_v49, %v1869_v2  ;;  %v1882_v6 = vmul.f32 %v1859_v20, %v5135_v54  ;;  %v1935_v8 = vsel %vm4565_vm1, %v5160_v16, 0  ;;  %v1926_v10 = vsel %vm4537_vm14, %v5156_v63, 0 }
 0x637   : > { %v1883_v42 = vmul.f32 %v1874_v30, %v5139_v55  ;;  %1950 = vrot.lane.b32.xlu1 %v5150_v48, %s4294_s26  ;;  %1992 = vrot.lane.b32.xlu2 %v5156_v63, %s4295_s28  ;;  %v5186_v55 = vpack.c.b16 %v2079_v17, %v2076_v15  ;;  %v2137_v49 = vunpack.c.h.b16 %v1924_v59  ;;  %v2183_v35 = vunpack.c.l.b16 %v1935_v8 }
 0x638   : > { %2030 = vrot.lane.b32.xlu0 %v5150_v48, %s4296_s29  ;;  %v2140_v20 = vunpack.c.h.b16 %v1926_v10  ;;  %v2136_v30 = vunpack.c.l.b16 %v1924_v59  ;;  %v2139_v17 = vunpack.c.l.b16 %v1926_v10  ;;  %v2141_v23 = vunpack.c.l.b16 %v1927_v56 }
 0x639   : > { %v1895_v54 = vpack.c.bf16 %v1883_v42, %v1882_v6  ;;  %v2192_v2 = vpack.c.b16 %v2183_v35, %v2180_v21  ;;  %v2182_v6 = vunpack.c.h.b16 %v1934_v50  ;;  %v3883_v50 = vld [vmem:[#allocation3 + $0x28] sm:$0xf]  ;;  %vm6103_vm4 = vcmask 777216  }
 0x63a   : > { %v2149_v0 = vpack.c.b16 %v2140_v20, %v2137_v49  ;;  %v2148_v42 = vpack.c.b16 %v2139_v17, %v2136_v30  ;;  %vm6104_vm13 = vcmask 916480  }
 0x63b   : > { %1899 = vst [vmem:[#allocation3 + $0x34] sm:$0xff] %v1895_v54 }
 0x63f   : > { %2028 = vrot.lane.b32.xlu1 %v5148_v25, %s4296_s29  ;;  %1954 = vrot.lane.b32.xlu2 %v5160_v16, %s4294_s26  ;;  %v2179_v25 = vunpack.c.h.b16 %v1932_v44 }
 0x640   : > { %1952 = vrot.lane.b32.xlu0 %v5156_v63, %s4294_s26 }
 0x641   : > { %v2191_v33 = vpack.c.b16 %v2182_v6, %v2179_v25 }
 0x642   : > { %v3987_v44 = vld [vmem:[#allocation3 + $0x34] sm:$0xf0]  ;;  %v3877_v11 = vld [vmem:[#allocation3 + $0x30] sm:$0xf0] }
 0x643   : > { %v3884_v57 = vor.u32 %v3987_v44, %v3883_v50  ;;  %v2142_v44 = vunpack.c.l.b16 %v1928_v39 }
 0x647   : > { %1994 = vrot.lane.b32.xlu1 %v5160_v16, %s4295_s28  ;;  %2032 = vrot.lane.b32.xlu2 %v5156_v63, %s4296_s29  ;;  %v1925_v63 = vsel %vm4589_vm8, %v5150_v48, 0  ;;  %v5252_v48 = vld [vmem:[#allocation3 + $0x30] sm:$0xff] }
 0x648   : > { %2212 = vrot.lane.b32.xlu0 %v3868_v27, %s4296_s29  ;;  %v2138_v54 = vunpack.c.l.b16 %v1925_v63  ;;  %v1938_v35 = vsel %vm4500_vm9, %v5252_v48, 0 }
 0x649   : > { %v2187_v25 = vunpack.c.l.b16 %v1938_v35  ;;  %v2188_v56 = vunpack.c.h.b16 %v1938_v35 }
 0x64a   : > { %v2150_v14 = vpack.c.b16 %v2141_v23, %v2138_v54 }
 0x64f   : > { %2034 = vrot.lane.b32.xlu1 %v5160_v16, %s4296_s29  ;;  %2280 = vrot.lane.b32.xlu2 %v3868_v27, %s4297_s9  ;;  %v5260_v16 = vld [vmem:[#allocation3 + $0x38] sm:$0xff] }
 0x650   : > { %2114 = vrot.lane.b32.xlu0 %v3868_v27, %s4294_s26  ;;  %v5243_v27 = vld [vmem:[#allocation3 + $0x28] sm:$0xff]  ;;  %v1931_v49 = vsel %vm4589_vm8, %v5260_v16, 0 }
 0x651   : > { %v1937_v19 = vsel %vm4565_vm1, %v5243_v27, 0  ;;  %v1929_v46 = vsel %vm4589_vm8, %v5243_v27, 0 }
 0x652   : > { %v2186_v21 = vunpack.c.l.b16 %v1937_v19  ;;  %v2144_v30 = vunpack.c.l.b16 %v1929_v46  ;;  %v2143_v19 = vunpack.c.h.b16 %v1928_v39 }
 0x657   : > { %2282 = vrot.lane.b32.xlu1 %v3872_v7, %s4297_s9  ;;  %2214 = vrot.lane.b32.xlu2 %v3872_v7, %s4296_s29 }
 0x658   : > { %2196 = vrot.lane.b32.xlu0 %v2190_v61, %s4298_s10  ;;  %v1939_v61 = vsel %vm4565_vm1, %v5260_v16, 0 }
 0x659   : > { %v2189_v8 = vunpack.c.l.b16 %v1939_v61 }
 0x65b   : > { %v2195_v10 = vpack.c.b16 %v2189_v8, %v2186_v21 }
 0x65f   : > { %2200 = vrot.lane.b32.xlu1 %v2192_v2, %s4298_s10  ;;  %2116 = vrot.lane.b32.xlu2 %v3872_v7, %s4294_s26  ;;  %v3880_v7 = vor.u32 %v3984_v37, %v3877_v11  ;;  %v2147_v2 = vunpack.c.l.b16 %v1931_v49 }
 0x660   : > { %2156 = vrot.lane.b32.xlu0 %v2149_v0, %s4299_s11  ;;  %v1936_v0 = vsel %vm4500_vm9, %v5236_v58, 0  ;;  %vm6092_vm9 = vcmask 1043456  }
 0x661   : > { %v2184_v6 = vunpack.c.l.b16 %v1936_v0  ;;  %v2153_v17 = vpack.c.b16 %v2147_v2, %v2144_v30  ;;  %vm6096_vm8 = vmmov %vm6092_vm9 }
 0x662   : > { %vm6097_vm6 = vmmov %vm6096_vm8 }
 0x663   : > { %vm6099_vm12 = vmmov %vm6097_vm6 }
 0x664   : > { %vm6105_vm7 = vmmov %vm6097_vm6 }
 0x667   : > { %2198 = vrot.lane.b32.xlu2 %v2191_v33, %s4298_s10  ;;  %2154 = vrot.lane.b32.xlu1 %v2148_v42, %s4299_s11  ;;  %v2193_v33 = vpack.c.b16 %v2187_v25, %v2184_v6  ;;  %v1930_v42 = vsel %vm4537_vm14, %v5252_v48, 0  ;;  %vm6093_vm14 = vcmask 908288  }
 0x668   : > { %1956 = vrot.lane.b32.xlu0 %v5236_v58, %s4294_s26  ;;  %v2145_v23 = vunpack.c.l.b16 %v1930_v42  ;;  %vm6094_vm1 = vmmov %vm6093_vm14 }
 0x669   : > { %vm6098_vm11 = vmmov %vm6094_vm1 }
 0x66a   : > { %v2151_v11 = vpack.c.b16 %v2145_v23, %v2142_v44 }
 0x66f   : > { %2158 = vrot.lane.b32.xlu2 %v2150_v14, %s4299_s11  ;;  %1998 = vrot.lane.b32.xlu1 %v5243_v27, %s4295_s28  ;;  %v2185_v14 = vunpack.c.h.b16 %v1936_v0 }
 0x670   : > { %2038 = vrot.lane.b32.xlu0 %v5243_v27, %s4296_s29 }
 0x671   : > { %v2194_v50 = vpack.c.b16 %v2188_v56, %v2185_v14 }
 0x677   : > { %2036 = vrot.lane.b32.xlu1 %v5236_v58, %s4296_s29  ;;  %1996 = vrot.lane.b32.xlu2 %v5236_v58, %s4295_s28 }
 0x678   : > { %2000 = vrot.lane.b32.xlu0 %v5252_v48, %s4295_s28 }
 0x67f   : > { %1960 = vrot.lane.b32.xlu1 %v5252_v48, %s4294_s26  ;;  %1958 = vrot.lane.b32.xlu2 %v5243_v27, %s4294_s26 }
 0x680   : > { %1962 = vrot.lane.b32.xlu0 %v5260_v16, %s4294_s26 }
 0x687   : > { %2042 = vrot.lane.b32.xlu1 %v5260_v16, %s4296_s29  ;;  %2002 = vrot.lane.b32.xlu2 %v5260_v16, %s4295_s28  ;;  %s3681_s28 = scalar_lea.sflag [#allocation6], %s274_s13 }
 0x688   : > { %2288 = vrot.lane.b32.xlu0 %v3884_v57, %s4297_s9 }
 0x689   : > { %v5271_v3 = vpop.permute.xlu2 %1948 }
 0x68f   : > { %2286 = vrot.lane.b32.xlu1 %v3880_v7, %s4297_s9  ;;  %2040 = vrot.lane.b32.xlu2 %v5252_v48, %s4296_s29  ;;  %s4307_s9 = smov 124  }
 0x690   : > { %2216 = vrot.lane.b32.xlu0 %v3880_v7, %s4296_s29 }
 0x691   : > { %v5283_v59 = vpop.permute.xlu2 %1992 }
 0x697   : > { %2206 = vrot.lane.b32.xlu1 %v2195_v10, %s4298_s10  ;;  %2218 = vrot.lane.b32.xlu2 %v3884_v57, %s4296_s29 }
 0x698   : > { %2120 = vrot.lane.b32.xlu0 %v3880_v7, %s4294_s26  ;;  %v2146_v7 = vunpack.c.h.b16 %v1930_v42 }
 0x699   : > { %v5297_v20 = vpop.permute.xlu2 %1954 }
 0x69a   : > { %v2152_v8 = vpack.c.b16 %v2146_v7, %v2143_v19 }
 0x69f   : > { %2164 = vrot.lane.b32.xlu1 %v2153_v17, %s4299_s11  ;;  %2122 = vrot.lane.b32.xlu2 %v3884_v57, %s4294_s26 }
 0x6a0   : > { %2202 = vrot.lane.b32.xlu0 %v2193_v33, %s4298_s10  ;;  %v2006_v33 = vrot.slane %v5283_v59, 4 }
 0x6a1   : > { %v1989_v15 = vpop.permute.xlu1 %1988  ;;  %v2033_v63 = vpop.permute.xlu2 %2032 }
 0x6a2   : > { %v1991_v54 = vpop.permute.xlu0 %1990  ;;  %v2004_v39 = vrot.slane %v1989_v15, 4  ;;  %v2046_v14 = vrot.slane %v2033_v63, 4 }
 0x6a3   : > { %v2005_v23 = vrot.slane %v1991_v54, 4 }
 0x6a7   : > { %2204 = vrot.lane.b32.xlu2 %v2194_v50, %s4298_s10 }
 0x6a8   : > { %2160 = vrot.lane.b32.xlu0 %v2151_v11, %s4299_s11 }
 0x6a9   : > { %v5313_v57 = vpop.permute.xlu1 %1950  ;;  %v2281_v37 = vpop.permute.xlu2 %2280 }
 0x6aa   : > { %v2031_v61 = vpop.permute.xlu0 %2030 }
 0x6ab   : > { %v2045_v0 = vrot.slane %v2031_v61, 4 }
 0x6af   : > { %2162 = vrot.lane.b32.xlu2 %v2152_v8, %s4299_s11 }
 0x6b1   : > { %v2029_v36 = vpop.permute.xlu1 %2028  ;;  %v5316_v21 = vpop.permute.xlu2 %2214 }
 0x6b2   : > { %v1953_v10 = vpop.permute.xlu0 %1952  ;;  %v2044_v49 = vrot.slane %v2029_v36, 4  ;;  %v2012_v36 = vsel %vm6099_vm12, %v2004_v39, %v2005_v23  ;;  %vm6112_vm12 = vcmask 908288  }
 0x6b4   : > { %v2052_v25 = vsel %vm6092_vm9, %v2044_v49, %v2045_v0  ;;  %vm6106_vm9 = vmmov %vm6097_vm6 }
 0x6b5   : > { %v2053_v6 = vsel %vm6094_vm1, %v2052_v25, %v2031_v61  ;;  %v2013_v25 = vsel %vm6101_vm0, %v2012_v36, %v1991_v54  ;;  %v1965_v54 = vrot.slane %v5313_v57, 4  ;;  %vm6114_vm0 = vmmov %vm6112_vm12 }
 0x6b6   : > { %v2064_v7 = vsel %vm4469_vm5, %v2053_v6, 0 }
 0x6b7   : > { %2436 = vrot.lane.b32.xlu2 %v2281_v37, %s4300_s12  ;;  %v2300_v59 = vunpack.c.l.b16 %v2064_v7  ;;  %v2301_v49 = vunpack.c.h.b16 %v2064_v7  ;;  %v2024_v7 = vsel %vm4434_vm2, %v2013_v25, 0 }
 0x6b8   : > { %v2252_v36 = vunpack.c.l.b16 %v2024_v7 }
 0x6b9   : > { %v1995_v35 = vpop.permute.xlu1 %1994  ;;  %v5319_v46 = vpop.permute.xlu2 %2116 }
 0x6ba   : > { %v2213_v2 = vpop.permute.xlu0 %2212  ;;  %v2007_v17 = vrot.slane %v1995_v35, 4 }
 0x6bb   : > { %2400 = vrot.lane.b32.xlu0 %v2213_v2, %s4300_s12  ;;  %v2220_v30 = vsel %vm6093_vm14, %v2213_v2, %v5316_v21  ;;  %vm6107_vm14 = vcmask 1039360  }
 0x6bc   : > { %v2014_v19 = vsel %vm6096_vm8, %v2006_v33, %v2007_v17  ;;  %vm6108_vm1 = vmmov %vm6107_vm14 }
 0x6bd   : > { %v2015_v63 = vsel %vm6100_vm15, %v2014_v19, %v1995_v35  ;;  %v1964_v19 = vrot.slane %v5271_v3, 4  ;;  %vm6109_vm8 = vmmov %vm6104_vm13 }
 0x6be   : > { %v2025_v39 = vsel %vm4434_vm2, %v2015_v63, 0  ;;  %vm6113_vm15 = vmmov %vm6103_vm4 }
 0x6bf   : > { %2402 = vrot.lane.b32.xlu2 %v2220_v30, %s4300_s12  ;;  %v1966_v30 = vrot.slane %v1953_v10, 4 }
 0x6c1   : > { %v2035_v42 = vpop.permute.xlu1 %2034  ;;  %v2199_v56 = vpop.permute.xlu2 %2198 }
 0x6c2   : > { %v2047_v44 = vrot.slane %v2035_v42, 4  ;;  %v5328_v50 = vpop.permute.xlu0 %2114 }
 0x6c4   : > { %v2054_v8 = vsel %vm6097_vm6, %v2046_v14, %v2047_v44  ;;  %v1967_v44 = vrot.slane %v5297_v20, 4  ;;  %vm6110_vm6 = vcmask 1031168  }
 0x6c5   : > { %v2055_v61 = vsel %vm6098_vm11, %v2054_v8, %v2035_v42  ;;  %v2254_v8 = vunpack.c.l.b16 %v2025_v39  ;;  %vm6111_vm11 = vmmov %vm6105_vm7 }
 0x6c6   : > { %v2065_v15 = vsel %vm4469_vm5, %v2055_v61, 0  ;;  %v2255_v61 = vunpack.c.h.b16 %v2025_v39 }
 0x6c7   : > { %v2302_v2 = vunpack.c.l.b16 %v2065_v15  ;;  %v2303_v0 = vunpack.c.h.b16 %v2065_v15  ;;  %v2253_v15 = vunpack.c.h.b16 %v2024_v7 }
 0x6c9   : > { %v5340_v6 = vpack.c.b16 %v2302_v2, %v2300_v59  ;;  %v5342_v17 = vpack.c.b16 %v2303_v0, %v2301_v49  ;;  %v5344_v33 = vpop.permute.xlu1 %2282  ;;  %v5350_v35 = vpop.permute.xlu2 %2158  ;;  %v1972_v59 = vsel %vm6106_vm9, %v1964_v19, %v1965_v54  ;;  %v2260_v49 = vpack.c.b16 %v2254_v8, %v2252_v36 }
 0x6ca   : > { %v2292_v23 = vsel %vm6103_vm4, %v2281_v37, %v5344_v33  ;;  %v2197_v14 = vpop.permute.xlu0 %2196  ;;  %v1974_v37 = vsel %vm6105_vm7, %v1966_v30, %v1967_v44  ;;  %v1973_v0 = vsel %vm6108_vm1, %v1972_v59, %v5313_v57  ;;  %v2261_v30 = vpack.c.b16 %v2255_v61, %v2253_v15  ;;  %vm6115_vm4 = vmmov %vm6105_vm7 }
 0x6cb   : > { %2438 = vrot.lane.b32.xlu1 %v2292_v23, %s4300_s12  ;;  %v2208_v10 = vsel %vm6104_vm13, %v2197_v14, %v2199_v56  ;;  %v1975_v63 = vsel %vm6107_vm14, %v1974_v37, %v5297_v20  ;;  %v1984_v23 = vsel %vm4469_vm5, %v1973_v0, 0  ;;  %vm6116_vm13 = vmmov %vm6115_vm4  ;;  %vm6117_vm7 = vcmask 924672  }
 0x6cc   : > { %2388 = vrot.lane.b32.xlu0 %v2208_v10, %s4300_s12  ;;  %v1985_v39 = vsel %vm4469_vm5, %v1975_v63, 0  ;;  %v2226_v14 = vunpack.c.l.b16 %v1984_v23  ;;  %v2227_v37 = vunpack.c.h.b16 %v1984_v23  ;;  %vm6118_vm9 = vmmov %vm6117_vm7 }
 0x6cd   : > { %v2228_v57 = vunpack.c.l.b16 %v1985_v39  ;;  %v2229_v7 = vunpack.c.h.b16 %v1985_v39  ;;  %vm6119_vm14 = vmmov %vm6109_vm8 }
 0x6ce   : > { %vm6120_vm1 = vmmov %vm6109_vm8 }
 0x6cf   : > { %v2234_v10 = vpack.c.b16 %v2228_v57, %v2226_v14  ;;  %v2235_v61 = vpack.c.b16 %v2229_v7, %v2227_v37 }
 0x6d1   : > { %v5364_v2 = vpop.permute.xlu1 %2200  ;;  %v1997_v20 = vpop.permute.xlu2 %1996 }
 0x6d2   : > { %v2209_v3 = vsel %vm6109_vm8, %v2199_v56, %v5364_v2  ;;  %v5370_v25 = vpop.permute.xlu0 %2156  ;;  %v2008_v62 = vrot.slane %v1997_v20, 4  ;;  %vm6121_vm8 = vmmov %vm6115_vm4 }
 0x6d3   : > { %2264 = vrot.lane.b32.xlu1 %v2260_v49, %s4296_s29  ;;  %2390 = vrot.lane.b32.xlu2 %v2209_v3, %s4300_s12 }
 0x6d4   : > { %2266 = vrot.lane.b32.xlu0 %v2261_v30, %s4296_s29 }
 0x6d9   : > { %v2155_v44 = vpop.permute.xlu1 %2154  ;;  %v1959_v19 = vpop.permute.xlu2 %1958 }
 0x6da   : > { %v2166_v56 = vsel %vm6110_vm6, %v2155_v44, %v5370_v25  ;;  %v1957_v54 = vpop.permute.xlu0 %1956  ;;  %v1969_v20 = vrot.slane %v1959_v19, 4  ;;  %vm6122_vm6 = vmmov %vm6115_vm4 }
 0x6db   : > { %2376 = vrot.lane.b32.xlu2 %v2166_v56, %s4300_s12 }
 0x6dc   : > { %2238 = vrot.lane.b32.xlu0 %v2234_v10, %s4296_s29 }
 0x6e1   : > { %v1999_v8 = vpop.permute.xlu1 %1998  ;;  %v2003_v59 = vpop.permute.xlu2 %2002 }
 0x6e2   : > { %v2039_v36 = vpop.permute.xlu0 %2038 }
 0x6e3   : > { %2240 = vrot.lane.b32.xlu2 %v2235_v61, %s4296_s29  ;;  %v2049_v63 = vrot.slane %v2039_v36, 4 }
 0x6e9   : > { %v2037_v15 = vpop.permute.xlu1 %2036  ;;  %v5388_v14 = vpop.permute.xlu2 %2040 }
 0x6ea   : > { %v2048_v49 = vrot.slane %v2037_v15, 4  ;;  %v2001_v0 = vpop.permute.xlu0 %2000  ;;  %v2009_v15 = vrot.slane %v1999_v8, 4 }
 0x6ec   : > { %v2056_v3 = vsel %vm6111_vm11, %v2048_v49, %v2049_v63  ;;  %v2011_v63 = vrot.slane %v2003_v59, 4  ;;  %vm6123_vm11 = vcmask 1039360  }
 0x6ed   : > { %v5386_v30 = vsel %vm6112_vm12, %v2056_v3, %v2039_v36  ;;  %v2010_v36 = vrot.slane %v2001_v0, 4  ;;  %vm6124_vm12 = vmmov %vm6123_vm11 }
 0x6ef   : > { %v2018_v13 = vsel %vm6115_vm4, %v2010_v36, %v2011_v63 }
 0x6f0   : > { %v2019_v29 = vsel %vm6117_vm7, %v2018_v13, %v2003_v59  ;;  %vm6130_vm7 = vcmask 908288  }
 0x6f1   : > { %v1961_v57 = vpop.permute.xlu1 %1960  ;;  %v5394_v56 = vpop.permute.xlu2 %2218  ;;  %v2027_v22 = vsel %vm4434_vm2, %v2019_v29, 0 }
 0x6f2   : > { %v1963_v39 = vpop.permute.xlu0 %1962  ;;  %v1970_v41 = vrot.slane %v1961_v57, 4 }
 0x6f3   : > { %v1971_v40 = vrot.slane %v1963_v39, 4 }
 0x6f9   : > { %v5390_v23 = vpop.permute.xlu1 %2042  ;;  %v5400_v61 = vpop.permute.xlu2 %2122 }
 0x6fa   : > { %v5392_v44 = vpop.permute.xlu0 %2288 }
 0x701   : > { %v2287_v10 = vpop.permute.xlu1 %2286  ;;  %v2205_v0 = vpop.permute.xlu2 %2204 }
 0x702   : > { %v2294_v7 = vsel %vm6113_vm15, %v2287_v10, %v5392_v44  ;;  %v2217_v37 = vpop.permute.xlu0 %2216  ;;  %2442 = vrot.lane.b32.xlu1 %v2287_v10, %s4300_s12  ;;  %v2016_v10 = vsel %vm6116_vm13, %v2008_v62, %v2009_v15  ;;  %v2258_v62 = vunpack.c.l.b16 %v2027_v22  ;;  %vm6129_vm13 = vmmov %vm6122_vm6 }
 0x703   : > { %2444 = vrot.lane.b32.xlu0 %v2294_v7, %s4300_s12  ;;  %v2221_v49 = vsel %vm6114_vm0, %v2217_v37, %v5394_v56  ;;  %v2017_v9 = vsel %vm6118_vm9, %v2016_v10, %v1999_v8  ;;  %v1978_v8 = vsel %vm6121_vm8, %v1970_v41, %v1971_v40  ;;  %vm6127_vm0 = vmmov %vm6123_vm11  ;;  %vm6135_vm8 = vcmask 138240  }
 0x704   : > { %v2026_v13 = vsel %vm4434_vm2, %v2017_v9, 0  ;;  %v1979_v57 = vsel %vm6123_vm11, %v1978_v8, %v1963_v39  ;;  %vm6125_vm2 = vcmask 1031168   ;;  %v2051_v8 = vrot.slane %v5390_v23, 4  ;;  %vm6131_vm9 = vmmov %vm6127_vm0 }
 0x705   : > { %v2256_v29 = vunpack.c.l.b16 %v2026_v13  ;;  %v1987_v9 = vsel %vm4469_vm5, %v1979_v57, 0  ;;  %vm6126_vm15 = vmmov %vm6125_vm2 }
 0x706   : > { %v2233_v39 = vunpack.c.h.b16 %v1987_v9  ;;  %vm6128_vm4 = vmmov %vm6125_vm2 }
 0x709   : > { %v2207_v7 = vpop.permute.xlu1 %2206  ;;  %v2163_v63 = vpop.permute.xlu2 %2162 }
 0x70a   : > { %v5404_v3 = vpop.permute.xlu0 %2120  ;;  %2406 = vrot.lane.b32.xlu1 %v2217_v37, %s4300_s12  ;;  %v2211_v37 = vsel %vm6119_vm14, %v2205_v0, %v2207_v7  ;;  %vm6132_vm14 = vmmov %vm6127_vm0 }
 0x70b   : > { %2408 = vrot.lane.b32.xlu0 %v2221_v49, %s4300_s12  ;;  %v1968_v49 = vrot.slane %v1957_v54, 4  ;;  %v2262_v54 = vpack.c.b16 %v2258_v62, %v2256_v29  ;;  %v2050_v29 = vrot.slane %v5388_v14, 4 }
 0x70d   : > { %v1976_v59 = vsel %vm6122_vm6, %v1968_v49, %v1969_v20  ;;  %vm6136_vm6 = vmmov %vm6135_vm8 }
 0x711   : > { %v5423_v15 = vpop.permute.xlu1 %2164 }
 0x712   : > { %v2203_v18 = vpop.permute.xlu0 %2202  ;;  %v2169_v42 = vsel %vm6125_vm2, %v2163_v63, %v5423_v15 }
 0x713   : > { %v2210_v36 = vsel %vm6120_vm1, %v2203_v18, %v2205_v0  ;;  %2396 = vrot.lane.b32.xlu0 %v2211_v37, %s4300_s12  ;;  %v1977_v18 = vsel %vm6124_vm12, %v1976_v59, %v1959_v19  ;;  %v2259_v19 = vunpack.c.h.b16 %v2027_v22  ;;  %v2257_v37 = vunpack.c.h.b16 %v2026_v13  ;;  %v2437_v59 = vpop.permute.xlu2 %2436 }
 0x714   : > { %2394 = vrot.lane.b32.xlu1 %v2210_v36, %s4300_s12  ;;  %v1986_v41 = vsel %vm4469_vm5, %v1977_v18, 0  ;;  %v2232_v36 = vunpack.c.l.b16 %v1987_v9  ;;  %v2126_v22 = vsel %vm6127_vm0, %v5077_v52, %v5404_v3  ;;  %v2058_v13 = vsel %vm6129_vm13, %v2050_v29, %v2051_v8 }
 0x715   : > { %v2231_v0 = vunpack.c.h.b16 %v1986_v41  ;;  %v2263_v20 = vpack.c.b16 %v2259_v19, %v2257_v37  ;;  %v2230_v62 = vunpack.c.l.b16 %v1986_v41  ;;  %v2059_v14 = vsel %vm6130_vm7, %v2058_v13, %v5390_v23 }
 0x716   : > { %v2067_v52 = vsel %vm4469_vm5, %v2059_v14, 0 }
 0x717   : > { %v2237_v49 = vpack.c.b16 %v2233_v39, %v2231_v0  ;;  %v2236_v57 = vpack.c.b16 %v2232_v36, %v2230_v62  ;;  %v2307_v23 = vunpack.c.h.b16 %v2067_v52 }
 0x71a   : > { %v2161_v10 = vpop.permute.xlu0 %2160 }
 0x71b   : > { %v2168_v40 = vsel %vm6126_vm15, %v2161_v10, %v2163_v63  ;;  %2268 = vrot.lane.b32.xlu0 %v2262_v54, %s4296_s29  ;;  %v2124_v54 = vsel %vm6131_vm9, %v5079_v12, %v5328_v50  ;;  %v5458_v18 = vpop.permute.xlu2 %2402 }
 0x71c   : > { %2384 = vrot.lane.b32.xlu1 %v2169_v42, %s4300_s12  ;;  %2382 = vrot.lane.b32.xlu2 %v2168_v40, %s4300_s12  ;;  %v2127_v42 = vsel %vm6132_vm14, %v5404_v3, %v5400_v61 }
 0x723   : > { %2398 = vrot.lane.b32.xlu0 %v2207_v7, %s4300_s12  ;;  %v2167_v7 = vsel %vm6128_vm4, %v5370_v25, %v5350_v35  ;;  %v2066_v25 = vsel %vm4469_vm5, %v5386_v30, 0  ;;  %vm6133_vm5 = vmmov %vm6130_vm7 }
 0x724   : > { %2244 = vrot.lane.b32.xlu1 %v2237_v49, %s4296_s29  ;;  %2270 = vrot.lane.b32.xlu2 %v2263_v20, %s4296_s29  ;;  %v2305_v12 = vunpack.c.h.b16 %v2066_v25  ;;  %v2304_v30 = vunpack.c.l.b16 %v2066_v25  ;;  %vm6134_vm1 = vmmov %vm6133_vm5  ;;  %v1923_v49 = vsel %vm4676_vm3, %v5260_v16, 0  ;;  %v1921_v20 = vsel %vm4676_vm3, %v5243_v27, 0 }
 0x725   : > { %v2087_v36 = vunpack.c.l.b16 %v1923_v49  ;;  %v2084_v62 = vunpack.c.l.b16 %v1921_v20  ;;  %vm6137_vm3 = vmmov %vm6136_vm6 }
 0x726   : > { %v2311_v10 = vpack.c.b16 %v2307_v23, %v2305_v12  ;;  %vm6138_vm11 = vmmov %vm6137_vm3 }
 0x727   : > { %v2093_v8 = vpack.c.b16 %v2087_v36, %v2084_v62  ;;  %vm6139_vm12 = vmmov %vm6134_vm1 }
 0x728   : > { %vm6140_vm2 = vmmov %vm6137_vm3 }
 0x729   : > { %vm6141_vm15 = vmmov %vm6140_vm2 }
 0x72a   : > { %vm6142_vm0 = vmmov %vm6134_vm1 }
 0x72b   : > { %2370 = vrot.lane.b32.xlu0 %v2126_v22, %s4300_s12  ;;  %vm6143_vm4 = vmmov %vm6131_vm9  ;;  %vm6147_vm9 = vcmask 777216  }
 0x72c   : > { %2378 = vrot.lane.b32.xlu1 %v2167_v7, %s4300_s12  ;;  %2242 = vrot.lane.b32.xlu2 %v2236_v57, %s4296_s29  ;;  %vm6144_vm13 = vmmov %vm6140_vm2 }
 0x72d   : > { %v5468_v63 = vpop.permute.xlu0 %2400  ;;  %v5470_v9 = vpop.permute.xlu2 %2390  ;;  %vm6146_vm7 = vmmov %vm6140_vm2 }
 0x72e   : > { %vm6148_vm14 = vmmov %vm6147_vm9 }
 0x733   : > { %2364 = vrot.lane.b32.xlu0 %v2124_v54, %s4300_s12 }
 0x734   : > { %2314 = vrot.lane.b32.xlu1 %v5342_v17, %s4296_s29  ;;  %2312 = vrot.lane.b32.xlu2 %v5340_v6, %s4296_s29  ;;  %v2306_v6 = vunpack.c.l.b16 %v2067_v52 }
 0x735   : > { %v5481_v41 = vpop.permute.xlu2 %2376 }
 0x736   : > { %v2310_v40 = vpack.c.b16 %v2306_v6, %v2304_v30 }
 0x73b   : > { %2318 = vrot.lane.b32.xlu0 %v2311_v10, %s4296_s29  ;;  %v1922_v10 = vsel %vm4680_vm10, %v5252_v48, 0 }
 0x73c   : > { %2392 = vrot.lane.b32.xlu1 %v5364_v2, %s4300_s12  ;;  %2372 = vrot.lane.b32.xlu2 %v2127_v42, %s4300_s12 }
 0x73d   : > { %v5479_v11 = vpop.permute.xlu1 %2438  ;;  %v2241_v3 = vpop.permute.xlu2 %2240 }
 0x73e   : > { %v2389_v17 = vpop.permute.xlu0 %2388  ;;  %v2488_v16 = vsel %vm6136_vm6, %v2437_v59, %v5479_v11 }
 0x73f   : > { %v2472_v14 = vsel %vm6138_vm11, %v2389_v17, %v5470_v9 }
 0x744   : > { %2316 = vrot.lane.b32.xlu1 %v2310_v40, %s4296_s29  ;;  %v2085_v40 = vunpack.c.l.b16 %v1922_v10 }
 0x745   : > { %v2265_v19 = vpop.permute.xlu1 %2264 }
 0x746   : > { %v5484_v39 = vpop.permute.xlu0 %2266  ;;  %2424 = vrot.lane.b32.xlu0 %v2265_v19, %s4300_s12 }
 0x747   : > { %v2272_v37 = vsel %vm6134_vm1, %v2265_v19, %v5484_v39  ;;  %vm6151_vm1 = vmmov %vm6140_vm2 }
 0x748   : > { %vm6153_vm6 = vmmov %vm6151_vm1 }
 0x749   : > { %vm6155_vm11 = vmmov %vm6151_vm1 }
 0x74e   : > { %v2239_v0 = vpop.permute.xlu0 %2238 }
 0x74f   : > { %v2246_v2 = vsel %vm6133_vm5, %v2239_v0, %v2241_v3  ;;  %2412 = vrot.lane.b32.xlu2 %v2239_v0, %s4300_s12  ;;  %v2125_v0 = vsel %vm6143_vm4, %v5328_v50, %v5319_v46  ;;  %vm6150_vm5 = vmmov %vm6142_vm0 }
 0x750   : > { %2414 = vrot.lane.b32.xlu1 %v2246_v2, %s4300_s12 }
 0x757   : > { %2426 = vrot.lane.b32.xlu2 %v2272_v37, %s4300_s12 }
 0x758   : > { %2386 = vrot.lane.b32.xlu1 %v5423_v15, %s4300_s12 }
 0x760   : > { %2380 = vrot.lane.b32.xlu1 %v5350_v35, %s4300_s12 }
 0x768   : > { %2374 = vrot.lane.b32.xlu1 %v5400_v61, %s4300_s12 }
 0x770   : > { %2362 = vrot.lane.b32.xlu1 %v2093_v8, %s4300_s12 }
 0x774   : > { %v2443_v15 = vpop.permute.xlu1 %2442 }
 0x775   : > { %v5506_v29 = vpop.permute.xlu0 %2444 }
 0x776   : > { %v2490_v35 = vsel %vm6135_vm8, %v2443_v15, %v5506_v29  ;;  %v2383_v57 = vpop.permute.xlu2 %2382  ;;  %vm6152_vm8 = vmmov %vm6142_vm0 }
 0x777   : > { %2557 = vmatpush.bf16.msra.mxu3 %v2490_v35 }
 0x77b   : > { %2558 = vmatpush.bf16.msra.mxu3 %v2488_v16 }
 0x77c   : > { %v5512_v61 = vpop.permute.xlu1 %2406 }
 0x77d   : > { %v5514_v31 = vpop.permute.xlu0 %2408 }
 0x77e   : > { %v2271_v27 = vpop.permute.xlu2 %2270 }
 0x77f   : > { %2434 = vrot.lane.b32.xlu1 %v2271_v27, %s4300_s12 }
 0x785   : > { %v2397_v22 = vpop.permute.xlu0 %2396 }
 0x786   : > { %v2395_v7 = vpop.permute.xlu1 %2394  ;;  %v2243_v54 = vpop.permute.xlu2 %2242 }
 0x787   : > { %v2474_v13 = vsel %vm6137_vm3, %v2395_v7, %v2397_v22  ;;  %2416 = vrot.lane.b32.xlu1 %v2241_v3, %s4300_s12  ;;  %vm6154_vm3 = vmmov %vm6151_vm1 }
 0x788   : > { %2538 = vmatpush.bf16.msra.mxu1 %v2474_v13 }
 0x78c   : > { %2539 = vmatpush.bf16.msra.mxu1 %v2472_v14 }
 0x78d   : > { %v2269_v59 = vpop.permute.xlu0 %2268 }
 0x78e   : > { %v2273_v52 = vsel %vm6139_vm12, %v2269_v59, %v2271_v27  ;;  %v2385_v25 = vpop.permute.xlu1 %2384  ;;  %2430 = vrot.lane.b32.xlu0 %v2269_v59, %s4300_s12  ;;  %v2313_v30 = vpop.permute.xlu2 %2312  ;;  %vm6156_vm12 = vmmov %vm6151_vm1 }
 0x78f   : > { %2410 = vrot.lane.b32.xlu1 %v5394_v56, %s4300_s12  ;;  %v2470_v23 = vsel %vm6140_vm2, %v2383_v57, %v2385_v25  ;;  %2432 = vrot.lane.b32.xlu2 %v2273_v52, %s4300_s12  ;;  %v1920_v56 = vsel %vm4680_vm10, %v5236_v58, 0  ;;  %v2086_v58 = vunpack.c.h.b16 %v1922_v10  ;;  %vm6145_vm10 = vmmov %vm6140_vm2 }
 0x790   : > { %2540 = vmatpush.bf16.msra.mxu1 %v2470_v23  ;;  %v2082_v19 = vunpack.c.l.b16 %v1920_v56  ;;  %v2083_v20 = vunpack.c.h.b16 %v1920_v56  ;;  %vm6157_vm2 = vmmov %vm6151_vm1 }
 0x792   : > { %v2091_v48 = vpack.c.b16 %v2085_v40, %v2082_v19  ;;  %v2092_v62 = vpack.c.b16 %v2086_v58, %v2083_v20  ;;  %v3988_v19 = vld [vmem:[%s6013_s2 + $0x4] sm:$0xf] }
 0x795   : > { %v2399_v12 = vpop.permute.xlu0 %2398 }
 0x796   : > { %v5531_v42 = vsel %vm6141_vm15, %v2397_v22, %v2399_v12  ;;  %v2245_v6 = vpop.permute.xlu1 %2244  ;;  %2418 = vrot.lane.b32.xlu0 %v2243_v54, %s4300_s12  ;;  %v2373_v34 = vpop.permute.xlu2 %2372  ;;  %vm6158_vm15 = vmmov %vm6151_vm1 }
 0x797   : > { %v2247_v17 = vsel %vm6142_vm0, %v2243_v54, %v2245_v6  ;;  %2595 = vmatpush.bf16.msra.mxu2 %v5531_v42  ;;  %vm6159_vm0 = vmmov %vm6151_vm1 }
 0x798   : > { %2420 = vrot.lane.b32.xlu2 %v2247_v17, %s4300_s12  ;;  %vm6160_vm4 = vmmov %vm6159_vm0 }
 0x79d   : > { %v2371_v37 = vpop.permute.xlu0 %2370 }
 0x79e   : > { %v2379_v3 = vpop.permute.xlu1 %2378  ;;  %2358 = vrot.lane.b32.xlu0 %v2091_v48, %s4300_s12  ;;  %v2466_v49 = vsel %vm6145_vm10, %v2371_v37, %v2373_v34  ;;  %v3897_v48 = vld [vmem:[%s6013_s2 + $0xc] sm:$0xf0]  ;;  %vm6162_vm10 = vmmov %vm6159_vm0 }
 0x79f   : > { %v2468_v2 = vsel %vm6144_vm13, %v5481_v41, %v2379_v3  ;;  %vm6161_vm13 = vmmov %vm6159_vm0 }
 0x7a0   : > { %2541 = vmatpush.bf16.msra.mxu1 %v2468_v2  ;;  %2366 = vrot.lane.b32.xlu2 %v2125_v0, %s4300_s12  ;;  %v5618_v0 = vor.u32 %v3988_v19, %v3897_v48  ;;  %v3989_v2 = vld [vmem:[%s6013_s2 + $0x8] sm:$0xf0] }
 0x7a4   : > { %2542 = vmatpush.bf16.msra.mxu1 %v2466_v49 }
 0x7a6   : > { %v2315_v36 = vpop.permute.xlu1 %2314  ;;  %2352 = vrot.lane.b32.xlu0 %v5186_v55, %s4300_s12  ;;  %v2293_v55 = vsel %vm6147_vm9, %v5344_v33, %v5093_v60  ;;  %v2365_v60 = vpop.permute.xlu0 %2364  ;;  %vm6164_vm9 = vmmov %vm6159_vm0 }
 0x7a8   : > { %2360 = vrot.lane.b32.xlu2 %v2092_v62, %s4300_s12  ;;  %v3991_v62 = vld [vmem:[%s6013_s2 + $0x1c] sm:$0xf] }
 0x7a9   : > { %v2413_v35 = vpop.permute.xlu2 %2412 }
 0x7ae   : > { %v2393_v50 = vpop.permute.xlu1 %2392  ;;  %2368 = vrot.lane.b32.xlu0 %v5319_v46, %s4300_s12  ;;  %v2295_v46 = vsel %vm6148_vm14, %v5392_v44, %v5083_v51  ;;  %v2319_v15 = vpop.permute.xlu0 %2318  ;;  %vm6165_vm14 = vmmov %vm6159_vm0 }
 0x7af   : > { %v5555_v41 = vsel %vm6146_vm7, %v5470_v9, %v2393_v50  ;;  %v2320_v9 = vsel %vm6150_vm5, %v2313_v30, %v2315_v36  ;;  %vm6163_vm7 = vmmov %vm6159_vm0 }
 0x7b0   : > { %2596 = vmatpush.bf16.msra.mxu2 %v5555_v41  ;;  %2354 = vrot.lane.b32.xlu2 %v5188_v53, %s4300_s12  ;;  %v6149_v53 = vpack.c.b16 %v5182_v28, %v5180_v38  ;;  %vm6166_vm5 = vmmov %vm6159_vm0 }
 0x7b1   : > { %v5590_v27 = vpop.permute.xlu2 %2426 }
 0x7b6   : > { %v2317_v8 = vpop.permute.xlu1 %2316  ;;  %2440 = vrot.lane.b32.xlu0 %v2293_v55, %s4300_s12 }
 0x7b7   : > { %2454 = vrot.lane.b32.xlu1 %v2317_v8, %s4300_s12 }
 0x7b8   : > { %2446 = vrot.lane.b32.xlu2 %v2295_v46, %s4300_s12  ;;  %v2425_v13 = vpop.permute.xlu0 %2424  ;;  %v3907_v46 = vld [vmem:[%s6013_s2 + $0x18] sm:$0xf] }
 0x7be   : > { %2428 = vrot.lane.b32.xlu0 %v5484_v39, %s4300_s12  ;;  %v2321_v39 = vsel %vm6152_vm8, %v2317_v8, %v2319_v15  ;;  %vm6168_vm8 = vmmov %vm6159_vm0 }
 0x7c0   : > { %2356 = vrot.lane.b32.xlu2 %v6149_v53, %s4300_s12  ;;  %v3992_v53 = vld [vmem:[%s6013_s2 + $0x20] sm:$0xf0] }
 0x7c2   : > { %v5575_v33 = vpop.permute.xlu1 %2414 }
 0x7c6   : > { %2450 = vrot.lane.b32.xlu0 %v2320_v9, %s4300_s12 }
 0x7c8   : > { %2422 = vrot.lane.b32.xlu2 %v2245_v6, %s4300_s12  ;;  %v2480_v6 = vsel %vm6159_vm0, %v2413_v35, %v5575_v33 }
 0x7ca   : > { %v2387_v51 = vpop.permute.xlu1 %2386 }
 0x7cb   : > { %v2471_v44 = vsel %vm6151_vm1, %v2385_v25, %v2387_v51  ;;  %v2484_v25 = vsel %vm6157_vm2, %v2425_v13, %v5590_v27  ;;  %vm6167_vm1 = vmmov %vm6159_vm0 }
 0x7cc   : > { %2597 = vmatpush.bf16.msra.mxu2 %v2471_v44  ;;  %vm6173_vm2 = vmmov %vm6159_vm0 }
 0x7ce   : > { %2456 = vrot.lane.b32.xlu0 %v2321_v39, %s4300_s12 }
 0x7d0   : > { %2458 = vrot.lane.b32.xlu2 %v2319_v15, %s4300_s12 }
 0x7d2   : > { %v2381_v38 = vpop.permute.xlu1 %2380 }
 0x7d3   : > { %v2469_v28 = vsel %vm6153_vm6, %v2379_v3, %v2381_v38  ;;  %v2476_v3 = vsel %vm6162_vm10, %v5468_v63, %v5458_v18  ;;  %vm6169_vm6 = vmmov %vm6159_vm0  ;;  %vm6177_vm10 = vcmask 261120  }
 0x7d4   : > { %2598 = vmatpush.bf16.msra.mxu2 %v2469_v28 }
 0x7d6   : > { %2404 = vrot.lane.b32.xlu0 %v5316_v21, %s4300_s12 }
 0x7d8   : > { %2452 = vrot.lane.b32.xlu2 %v2315_v36, %s4300_s12 }
 0x7da   : > { %v2375_v57 = vpop.permute.xlu1 %2374 }
 0x7db   : > { %v2467_v16 = vsel %vm6154_vm3, %v2373_v34, %v2375_v57  ;;  %vm6170_vm3 = vmmov %vm6159_vm0 }
 0x7dc   : > { %2599 = vmatpush.bf16.msra.mxu2 %v2467_v16 }
 0x7e0   : > { %2448 = vrot.lane.b32.xlu2 %v2313_v30, %s4300_s12  ;;  %v2478_v30 = vsel %vm6161_vm13, %v5512_v61, %v5514_v31  ;;  %v3895_v61 = vld [vmem:[%s6013_s2] sm:$0xf]  ;;  %vm6176_vm13 = vmmov %vm6159_vm0  ;;  %s4240_s12 = scalar_lea.hbm %s6017_s6, 128 }
 0x7e1   : > { %v3896_v58 = vor.u32 %v3989_v2, %v3895_v61 }
 0x7e2   : > { %v2363_v20 = vpop.permute.xlu1 %2362 }
 0x7e9   : > { %v5592_v22 = vpop.permute.xlu2 %2432 }
 0x7f1   : > { %v2435_v50 = vpop.permute.xlu1 %2434 }
 0x7f2   : > { %v5594_v7 = vpop.permute.xlu2 %2420  ;;  %v2487_v39 = vsel %vm6169_vm6, %v5592_v22, %v2435_v50 }
 0x7f9   : > { %v2417_v15 = vpop.permute.xlu1 %2416 }
 0x7fa   : > { %v2367_v14 = vpop.permute.xlu2 %2366 }
 0x7fb   : > { %v2464_v59 = vsel %vm6155_vm11, %v2365_v60, %v2367_v14  ;;  %vm6171_vm11 = vmmov %vm6159_vm0 }
 0x7fc   : > { %2543 = vmatpush.bf16.msra.mxu1 %v2464_v59 }
 0x800   : > { %v2431_v21 = vpop.permute.xlu0 %2430 }
 0x801   : > { %v2486_v54 = vsel %vm6156_vm12, %v2431_v21, %v5592_v22  ;;  %v2411_v57 = vpop.permute.xlu1 %2410  ;;  %vm6172_vm12 = vmmov %vm6159_vm0 }
 0x802   : > { %v2361_v52 = vpop.permute.xlu2 %2360  ;;  %2559 = vmatpush.bf16.msra.mxu3 %v2486_v54  ;;  %v2481_v22 = vsel %vm6172_vm12, %v5575_v33, %v2417_v15  ;;  %v3990_v33 = vld [vmem:[%s6013_s2 + $0x10] sm:$0xf0] }
 0x806   : > { %2560 = vmatpush.bf16.msra.mxu3 %v2484_v25 }
 0x808   : > { %v2419_v23 = vpop.permute.xlu0 %2418 }
 0x809   : > { %v2482_v12 = vsel %vm6158_vm15, %v2419_v23, %v5594_v7  ;;  %vm6174_vm15 = vmmov %vm6159_vm0 }
 0x80a   : > { %v2355_v10 = vpop.permute.xlu2 %2354  ;;  %2561 = vmatpush.bf16.msra.mxu3 %v2482_v12 }
 0x80e   : > { %2562 = vmatpush.bf16.msra.mxu3 %v2480_v6  ;;  %v3915_v6 = vld [vmem:[%s6013_s2 + $0x20] sm:$0xf] }
 0x810   : > { %v2359_v17 = vpop.permute.xlu0 %2358 }
 0x811   : > { %v2462_v56 = vsel %vm6160_vm4, %v2359_v17, %v2361_v52  ;;  %vm6175_vm4 = vmmov %vm6159_vm0  ;;  %v3993_v17 = vld [vmem:[%s6013_s2 + $0x28] sm:$0xf0] }
 0x812   : > { %v2447_v40 = vpop.permute.xlu2 %2446  ;;  %2544 = vmatpush.bf16.msra.mxu1 %v2462_v56  ;;  %2563 = vmatpush.bf16.msra.mxu3 %v2478_v30  ;;  %v3916_v56 = vor.u32 %v3993_v17, %v3915_v6 }
 0x813   : > { %v2491_v63 = vsel %vm6164_vm9, %v5506_v29, %v2447_v40  ;;  %v3909_v29 = vld [vmem:[%s6013_s2 + $0x24] sm:$0xf0]  ;;  %vm6179_vm9 = vmmov %vm6159_vm0 }
 0x814   : > { %v3912_v8 = vor.u32 %v3991_v62, %v3909_v29 }
 0x816   : > { %2564 = vmatpush.bf16.msra.mxu3 %v2476_v3 }
 0x818   : > { %v2353_v37 = vpop.permute.xlu0 %2352 }
 0x819   : > { %2565 = vmatmul.bf16.vlgmr.msra.gmra.mxu3 %v5618_v0  ;;  %v2460_v34 = vsel %vm6163_vm7, %v2353_v37, %v2355_v10  ;;  %vm6178_vm7 = vmmov %vm6177_vm10 }
 0x81a   : > { %3997 = vmatpush.bf16.msrb.mxu3 %v5531_v42  ;;  %v2357_v49 = vpop.permute.xlu2 %2356  ;;  %2545 = vmatpush.bf16.msra.mxu1 %v2460_v34 }
 0x81b   : > { %v2461_v9 = vsel %vm6167_vm1, %v2355_v10, %v2357_v49 }
 0x81d   : > { %2546 = vmatmul.bf16.vlgmr.msra.gmra.mxu1 %v3896_v58 }
 0x81e   : > { %3998 = vmatpush.bf16.msrb.mxu3 %v5555_v41  ;;  %2614 = vmatpush.bf16.msrb.mxu1 %v2491_v63  ;;  %v2463_v41 = vsel %vm6166_vm5, %v2361_v52, %v2363_v20  ;;  %v3903_v52 = vld [vmem:[%s6013_s2 + $0x8] sm:$0xf]  ;;  %vm6181_vm5 = vmmov %vm6178_vm7 }
 0x81f   : > { %v3904_v23 = vor.u32 %v3990_v33, %v3903_v52  ;;  %v5710_v33 = vld [vmem:[%s6014_s3 + $0x8] sm:$0xff]  ;;  %vm6182_vm1 = vmmov %vm6181_vm5 }
 0x820   : > { %v2369_v36 = vpop.permute.xlu0 %2368  ;;  %vm6189_vm6 = vmmov %vm6182_vm1 }
 0x821   : > { %v2465_v42 = vsel %vm6165_vm14, %v2367_v14, %v2369_v36  ;;  %v2479_v14 = vsel %vm6173_vm2, %v5514_v31, %v2411_v57  ;;  %vm6180_vm14 = vmmov %vm6178_vm7 }
 0x822   : > { %3999 = vmatpush.bf16.msrb.mxu3 %v2471_v44  ;;  %2600 = vmatpush.bf16.msra.mxu2 %v2465_v42  ;;  %v2423_v55 = vpop.permute.xlu2 %2422  ;;  %v3908_v44 = vor.u32 %v3992_v53, %v3907_v46  ;;  %vm6195_vm12 = vmmov %vm6182_vm1 }
 0x823   : > { %vm6196_vm2 = vmmov %vm6182_vm1 }
 0x826   : > { %4000 = vmatpush.bf16.msrb.mxu3 %v2469_v28  ;;  %2601 = vmatpush.bf16.msra.mxu2 %v2463_v41 }
 0x828   : > { %v2441_v60 = vpop.permute.xlu0 %2440 }
 0x829   : > { %2570 = vmatmul.bf16.gmra.mxu3 %v3912_v8  ;;  %v2489_v51 = vsel %vm6168_vm8, %v5479_v11, %v2441_v60  ;;  %v2483_v11 = vsel %vm6171_vm11, %v5594_v7, %v2423_v55  ;;  %v2455_v59 = vpop.permute.xlu1 %2454  ;;  %vm6184_vm8 = vmmov %vm6182_vm1 }
 0x82a   : > { %4001 = vmatpush.bf16.msrb.mxu3 %v2467_v16  ;;  %2602 = vmatpush.bf16.msra.mxu2 %v2461_v9  ;;  %v2459_v38 = vpop.permute.xlu2 %2458  ;;  %vm6194_vm11 = vmmov %vm6182_vm1 }
 0x82b   : > { %2615 = vmatpush.bf16.msrb.mxu1 %v2489_v51 }
 0x82d   : > { %2551 = vmatmul.bf16.gmra.mxu1 %v3908_v44  ;;  %2603 = vmatmul.bf16.vlgmr.msra.gmra.mxu2 %v3896_v58 }
 0x82e   : > { %4002 = vmatpush.bf16.msrb.mxu3 %v2465_v42 }
 0x82f   : > { %2616 = vmatpush.bf16.msrb.mxu1 %v2487_v39 }
 0x830   : > { %v2429_v28 = vpop.permute.xlu0 %2428 }
 0x831   : > { %v2485_v35 = vsel %vm6170_vm3, %v5590_v27, %v2429_v28  ;;  %vm6193_vm3 = vmmov %vm6182_vm1 }
 0x832   : > { %4003 = vmatpush.bf16.msrb.mxu3 %v2463_v41  ;;  %v2453_v16 = vpop.permute.xlu2 %2452 }
 0x833   : > { %2617 = vmatpush.bf16.msrb.mxu1 %v2485_v35 }
 0x836   : > { %4004 = vmatpush.bf16.msrb.mxu3 %v2461_v9 }
 0x837   : > { %2618 = vmatpush.bf16.msrb.mxu1 %v2483_v11 }
 0x838   : > { %v2451_v13 = vpop.permute.xlu0 %2450 }
 0x839   : > { %2608 = vmatmul.bf16.vlgmr.msrb.gmra.mxu3 %v3908_v44  ;;  %v2493_v25 = vsel %vm6176_vm13, %v2451_v13, %v2453_v16 }
 0x83a   : > { %v2449_v7 = vpop.permute.xlu2 %2448 }
 0x83b   : > { %2619 = vmatpush.bf16.msrb.mxu1 %v2481_v22  ;;  %v2492_v31 = vsel %vm6175_vm4, %v2449_v7, %v2451_v13 }
 0x83f   : > { %2620 = vmatpush.bf16.msrb.mxu1 %v2479_v14 }
 0x840   : > { %v2457_v27 = vpop.permute.xlu0 %2456 }
 0x841   : > { %v2494_v21 = vsel %vm6174_vm15, %v2455_v59, %v2457_v27  ;;  %v2495_v54 = vsel %vm6159_vm0, %v2457_v27, %v2459_v38  ;;  %vm6197_vm15 = vmmov %vm6182_vm1 }
 0x842   : > { %2582 = vmatpush.bf16.msra.mxu0 %v2494_v21  ;;  %2639 = vmatpush.bf16.msra.mxu3 %v2495_v54  ;;  %vm6198_vm0 = vmmov %vm6182_vm1 }
 0x843   : > { %vm6199_vm4 = vmmov %vm6198_vm0 }
 0x844   : > { %vm6200_vm13 = vmmov %vm6198_vm0 }
 0x846   : > { %2583 = vmatpush.bf16.msra.mxu0 %v2492_v31  ;;  %2640 = vmatpush.bf16.msra.mxu3 %v2493_v25 }
 0x848   : > { %v2405_v12 = vpop.permute.xlu0 %2404 }
 0x849   : > { %3917 = vmatmul.msk.bf16.vlgmr.msra.gmra.mxu0 %vm6177_vm10, %v3904_v23  ;;  %3919 = vmatmul.msk.bf16.vlgmr.msra.gmra.mxu3 %vm6178_vm7, %v3904_v23  ;;  %v2477_v10 = vsel %vm6179_vm9, %v5458_v18, %v2405_v12  ;;  %v5717_v12 = vld [vmem:[%s6014_s3 + $0x10] sm:$0xff]  ;;  %vm6201_vm10 = vmmov %vm6198_vm0 }
 0x84a   : > { %2621 = vmatpush.bf16.msrb.mxu1 %v2477_v10  ;;  %vm6202_vm7 = vmmov %vm6198_vm0 }
 0x84b   : > { %vm6203_vm9 = vmmov %vm6198_vm0 }
 0x84d   : > { %2622 = vmatmul.bf16.vlgmr.msrb.gmra.mxu1 %v5618_v0 }
 0x859   : > { %3918 = vmatmul.msk.bf16.gmra.mxu0 %vm6180_vm14, %v3916_v56  ;;  %3920 = vmatmul.msk.bf16.gmra.mxu3 %vm6181_vm5, %v3916_v56  ;;  %v5725_v56 = vld [vmem:[%s6014_s3 + $0x18] sm:$0xff]  ;;  %vm6204_vm14 = vmmov %vm6198_vm0 }
 0x85a   : > { %vm6205_vm5 = vmmov %vm6198_vm0 }
 0x85d   : > { %2627 = vmatmul.bf16.gmra.mxu1 %v3912_v8 }
 0x89a   : > { %v2547_v30 = vpop.f32.mrf.mxu1 }
 0x89c   : > { %v2566_v40 = vpop.f32.mrf.mxu3 }
 0x89d   : > { %v2567_v18 = vadd.f32 %v2566_v40, %v2547_v30 }
 0x8a2   : > { %v2549_v3 = vpop.f32.mrf.mxu1 }
 0x8a4   : > { %v2568_v19 = vpop.f32.mrf.mxu3 }
 0x8a5   : > { %v2569_v29 = vadd.f32 %v2568_v19, %v2549_v3  ;;  %v5733_v19 = vld [vmem:[%s6014_s3] sm:$0xff] }
 0x8aa   : > { %v2552_v61 = vpop.f32.mrf.mxu1 }
 0x8ac   : > { %v2571_v48 = vpop.f32.mrf.mxu3 }
 0x8ad   : > { %v2572_v9 = vadd.f32 %v2571_v48, %v2552_v61 }
 0x8b0   : > { %v2604_v63 = vpop.f32.mrf.mxu2 }
 0x8b2   : > { %v2554_v37 = vpop.f32.mrf.mxu1 }
 0x8b4   : > { %v2573_v0 = vpop.f32.mrf.mxu3 }
 0x8b5   : > { %v2574_v11 = vadd.f32 %v2573_v0, %v2554_v37 }
 0x8b8   : > { %v2606_v42 = vpop.f32.mrf.mxu2 }
 0x8bc   : > { %v2609_v2 = vpop.f32.mrf.mxu3 }
 0x8c4   : > { %v2611_v34 = vpop.f32.mrf.mxu3 }
 0x8c6   : > { %v2585_v58 = vpop.f32.mrf.mxu0 }
 0x8c7   : > { %v5702_v21 = vadd.f32 %v2585_v58, %v2567_v18 }
 0x8ca   : > { %v2623_v49 = vpop.f32.mrf.mxu1 }
 0x8cb   : > { %v2624_v14 = vadd.f32 %v2623_v49, %v2604_v63 }
 0x8cc   : > { %v2642_v20 = vpop.f32.mrf.mxu3 }
 0x8cd   : > { %v5700_v27 = vadd.f32 %v2642_v20, %v2624_v14  ;;  %v6188_v14 = vld [vmem:[#allocation16_spill] sm:$0xff] }
 0x8ce   : > { %v2587_v36 = vpop.f32.mrf.mxu0 }
 0x8cf   : > { %v5682_v41 = vadd.f32 %v2587_v36, %v2569_v29  ;;  %v2652_v54 = vadd.f32 %v5700_v27, %v5702_v21 }
 0x8d2   : > { %v2625_v62 = vpop.f32.mrf.mxu1 }
 0x8d3   : > { %v2626_v50 = vadd.f32 %v2625_v62, %v2606_v42 }
 0x8d4   : > { %v2644_v55 = vpop.f32.mrf.mxu3 }
 0x8d5   : > { %v5684_v8 = vadd.f32 %v2644_v55, %v2626_v50 }
 0x8d6   : > { %v2590_v53 = vpop.f32.mrf.mxu0 }
 0x8d7   : > { %v2655_v46 = vadd.f32 %v5684_v8, %v5682_v41  ;;  %v5688_v15 = vadd.f32 %v2590_v53, %v2572_v9 }
 0x8d9   : > { %2656 = vadd.xlane.f32.xlu2 %v2655_v46 }
 0x8da   : > { %v2628_v60 = vpop.f32.mrf.mxu1 }
 0x8db   : > { %v2629_v51 = vadd.f32 %v2628_v60, %v2609_v2 }
 0x8dc   : > { %v2647_v44 = vpop.f32.mrf.mxu3 }
 0x8dd   : > { %v5690_v39 = vadd.f32 %v2647_v44, %v2629_v51 }
 0x8de   : > { %v2592_v28 = vpop.f32.mrf.mxu0 }
 0x8df   : > { %v2658_v38 = vadd.f32 %v5690_v39, %v5688_v15  ;;  %v5694_v13 = vadd.f32 %v2592_v28, %v2574_v11  ;;  %v6185_v11 = vld [vmem:[#allocation19_spill] sm:$0xff] }
 0x8e1   : > { %2659 = vadd.xlane.f32.xlu0 %v2658_v38 }
 0x8e2   : > { %v2630_v35 = vpop.f32.mrf.mxu1 }
 0x8e3   : > { %v2631_v57 = vadd.f32 %v2630_v35, %v2611_v34  ;;  %v6183_v35 = vld [vmem:[#allocation15_spill] sm:$0xff] }
 0x8e4   : > { %v2649_v16 = vpop.f32.mrf.mxu3 }
 0x8e5   : > { %v5696_v22 = vadd.f32 %v2649_v16, %v2631_v57  ;;  %v6186_v57 = vld [vmem:[#allocation17_spill] sm:$0xff]  ;;  %v6187_v16 = vld [vmem:[#allocation22_spill] sm:$0xff] }
 0x8e7   : > { %v2661_v59 = vadd.f32 %v5696_v22, %v5694_v13 }
 0x8e9   : > { %2662 = vadd.xlane.f32.xlu1 %v2661_v59  ;;  %v6190_v59 = vld [vmem:[#allocation21_spill] sm:$0xff] }
 0x8f1   : > { %2653 = vadd.xlane.f32.xlu1 %v2652_v54  ;;  %v6191_v54 = vld [vmem:[#allocation20_spill] sm:$0xff] }
 0x94c   : > { %v2657_v7 = vpop.xlane.xlu2 %2656 }
 0x94d   : > { %v2665_v52 = vmul.f32 %v2657_v7, %v4774_v24  ;;  %v6192_v7 = vld [vmem:[#allocation18_spill] sm:$0xff] }
 0x94f   : > { %v2669_v31 = vadd.f32 %v5710_v33, %v2665_v52 }
 0x951   : > { %2678 = vrot.lane.b32.xlu1 %v2669_v31, %s4306_s18 }
 0x954   : > { %v2660_v25 = vpop.xlane.xlu0 %2659 }
 0x955   : > { %v2666_v23 = vmul.f32 %v2660_v25, %v4774_v24 }
 0x957   : > { %v2670_v10 = vadd.f32 %v5717_v12, %v2666_v23 }
 0x959   : > { %2680 = vrot.lane.b32.xlu2 %v2670_v10, %s4306_s18  ;;  %2968 = vrot.lane.b32.xlu1 %v5710_v33, %s4306_s18 }
 0x95c   : > { %v2663_v6 = vpop.xlane.xlu1 %2662 }
 0x95d   : > { %v2667_v17 = vmul.f32 %v2663_v6, %v4774_v24 }
 0x95f   : > { %v2671_v30 = vadd.f32 %v5725_v56, %v2667_v17 }
 0x961   : > { %2682 = vrot.lane.b32.xlu0 %v2671_v30, %s4306_s18  ;;  %2972 = vrot.lane.b32.xlu2 %v5725_v56, %s4306_s18 }
 0x964   : > { %v2654_v40 = vpop.xlane.xlu1 %2653 }
 0x965   : > { %v2664_v18 = vmul.f32 %v2654_v40, %v4774_v24 }
 0x967   : > { %v2668_v48 = vadd.f32 %v5733_v19, %v2664_v18 }
 0x969   : > { %2676 = vrot.lane.b32.xlu0 %v2668_v48, %s4306_s18  ;;  %2966 = vrot.lane.b32.xlu2 %v5733_v19, %s4306_s18 }
 0x971   : > { %2970 = vrot.lane.b32.xlu0 %v5717_v12, %s4306_s18  ;;  %s3996_s18 = sshll.u32 %s4368_s25, 6 }
 0x972   : > { %s3692_s16 = scalar_lea.hbm %s6017_s6, %s3996_s18 }
 0x973   : > { %s3695_s26 = sshll.u32 %s3692_s16, 4  ;;  %s3696_s26 = int_to_ptr.hbm [resolvable:$true] %s3695_s26 }
 0x974   : > { %s4234_s29 = sshra.s32 %s3696_s26, 4  ;;  %s4235_s29 = int_to_ptr.hbm [resolvable:$true] %s4234_s29 }
 0x975   : > { %p4241_p3 = scmp.lt.s32.totalorder %s4235_s29, %s6017_s6 }
 0x9b3   : > { %v2681_v3 = vpop.permute.xlu2 %2680 }
 0x9b4   : > { %v2702_v61 = vand.u32 4294901760, %v2681_v3 }
 0x9b6   : > { %v2760_v37 = vsub.f32 %v2681_v3, %v2702_v61 }
 0x9b8   : > { %v2761_v49 = vand.u32 4294901760, %v2760_v37 }
 0x9ba   : > { %v2762_v29 = vsub.f32 %v2760_v37, %v2761_v49 }
 0x9bc   : > { %v2763_v9 = vand.u32 4294901760, %v2762_v29 }
 0x9c3   : > { %v2679_v0 = vpop.permute.xlu1 %2678 }
 0x9c4   : > { %v2704_v2 = vand.u32 4294901760, %v2679_v0 }
 0x9c6   : > { %v2766_v58 = vsub.f32 %v2679_v0, %v2704_v2 }
 0x9c8   : > { %v2767_v36 = vand.u32 4294901760, %v2766_v58 }
 0x9ca   : > { %v2768_v53 = vsub.f32 %v2766_v58, %v2767_v36 }
 0x9cc   : > { %v2769_v51 = vand.u32 4294901760, %v2768_v53 }
 0x9d3   : > { %v2683_v34 = vpop.permute.xlu0 %2682 }
 0x9d4   : > { %v2700_v63 = vand.u32 4294901760, %v2683_v34 }
 0x9d6   : > { %v2754_v20 = vsub.f32 %v2683_v34, %v2700_v63  ;;  %2701 = vmatpush.msrb.mxu0 %v2700_v63  ;;  %2852 = vmatpush.msrb.mxu3 %v2700_v63 }
 0x9d8   : > { %v2755_v42 = vand.u32 4294901760, %v2754_v20  ;;  %2703 = vmatpush.msrb.mxu0 %v2702_v61  ;;  %2808 = vmatpush.msra.mxu1 %v2754_v20 }
 0x9d9   : > { %2854 = vmatpush.msrb.mxu3 %v2702_v61 }
 0x9da   : > { %v2756_v62 = vsub.f32 %v2754_v20, %v2755_v42  ;;  %2705 = vmatpush.msrb.mxu0 %v2704_v2  ;;  %2811 = vmatpush.msra.mxu1 %v2760_v37 }
 0x9db   : > { %2856 = vmatpush.msrb.mxu3 %v2704_v2  ;;  %v2677_v50 = vpop.permute.xlu0 %2676 }
 0x9dc   : > { %v2757_v55 = vand.u32 4294901760, %v2756_v62  ;;  %v2706_v46 = vand.u32 4294901760, %v2677_v50  ;;  %2814 = vmatpush.msra.mxu1 %v2766_v58  ;;  %v2969_v62 = vpop.permute.xlu1 %2968 }
 0x9de   : > { %v2772_v60 = vsub.f32 %v2677_v50, %v2706_v46  ;;  %2707 = vmatpush.msrb.mxu0 %v2706_v46  ;;  %2758 = vmatpush.msrb.mxu2 %v2757_v55 }
 0x9df   : > { %2858 = vmatpush.msrb.mxu3 %v2706_v46  ;;  %2713 = vmatmul.f32.vlgmr.msrb.gmra.mxu0 %v4847_v43 }
 0x9e0   : > { %2899 = vmatpush.msra.mxu0 %v2755_v42  ;;  %2764 = vmatpush.msrb.mxu2 %v2763_v9  ;;  %v2773_v44 = vand.u32 4294901760, %v2772_v60 }
 0x9e1   : > { %2817 = vmatpush.msra.mxu1 %v2772_v60  ;;  %2862 = vmatmul.f32.vlgmr.msrb.gmra.mxu3 %v4817_v26 }
 0x9e2   : > { %2903 = vmatpush.msra.mxu0 %v2761_v49  ;;  %2770 = vmatpush.msrb.mxu2 %v2769_v51  ;;  %v2774_v38 = vsub.f32 %v2772_v60, %v2773_v44  ;;  %v2973_v51 = vpop.permute.xlu2 %2972 }
 0x9e3   : > { %2820 = vmatmul.f32.vlgmr.msra.gmra.mxu1 %v4806_v45 }
 0x9e4   : > { %2907 = vmatpush.msra.mxu0 %v2767_v36  ;;  %v2775_v28 = vand.u32 4294901760, %v2774_v38 }
 0x9e6   : > { %2911 = vmatpush.msra.mxu0 %v2773_v44  ;;  %2776 = vmatpush.msrb.mxu2 %v2775_v28 }
 0x9e7   : > { %2721 = vmatmul.f32.gmra.mxu0 %v4864_v4  ;;  %3921 = vmatmul.msk.f32.vlgmr.msrb.gmra.mxu2 %vm6182_vm1, %v4791_v5  ;;  %vm6206_vm1 = vmmov %vm6198_vm0 }
 0x9e8   : > { %2942 = vmatpush.msra.mxu2 %v2700_v63 }
 0x9e9   : > { %2868 = vmatmul.f32.gmra.mxu3 %v4850_v1 }
 0x9ea   : > { %2944 = vmatpush.msra.mxu2 %v2702_v61 }
 0x9eb   : > { %2825 = vmatmul.f32.gmra.mxu1 %v4836_v32 }
 0x9ec   : > { %2946 = vmatpush.msra.mxu2 %v2704_v2 }
 0x9ee   : > { %2948 = vmatpush.msra.mxu2 %v2706_v46 }
 0x9ef   : > { %2729 = vmatmul.f32.gmra.mxu0 %v4882_v47  ;;  %3922 = vmatmul.msk.f32.gmra.mxu2 %vm6184_vm8, %v6183_v35  ;;  %vm6207_vm8 = vmmov %vm6198_vm0 }
 0x9f1   : > { %2874 = vmatmul.f32.gmra.mxu3 %v6185_v11 }
 0x9f3   : > { %2830 = vmatmul.f32.gmra.mxu1 %v6186_v57 }
 0x9f7   : > { %2737 = vmatmul.f32.gmra.mxu0 %v6187_v16  ;;  %3923 = vmatmul.msk.f32.gmra.mxu2 %vm6189_vm6, %v6188_v14  ;;  %vm6208_vm6 = vmmov %vm6198_vm0 }
 0x9f9   : > { %2880 = vmatmul.f32.gmra.mxu3 %v6190_v59 }
 0x9fb   : > { %2835 = vmatmul.f32.gmra.mxu1 %v6191_v54 }
 0x9ff   : > { %3924 = vmatmul.msk.f32.gmra.mxu2 %vm6193_vm3, %v6192_v7  ;;  %3925 = vmatmul.msk.f32.vlgmr.msra.gmra.mxu0 %vm6194_vm11, %v4791_v5  ;;  %vm6209_vm3 = vmmov %vm6198_vm0 }
 0xa00   : > { %vm6210_vm11 = vmmov %vm6198_vm0 }
 0xa07   : > { %3926 = vmatmul.msk.f32.gmra.mxu0 %vm6195_vm12, %v6183_v35  ;;  %3929 = vmatmul.msk.f32.vlgmr.msra.gmra.mxu2 %vm6196_vm2, %v4791_v5  ;;  %vm6211_vm12 = vmmov %vm6198_vm0 }
 0xa08   : > { %vm6212_vm2 = vmmov %vm6198_vm0 }
 0xa0f   : > { %3927 = vmatmul.msk.f32.gmra.mxu0 %vm6197_vm15, %v6188_v14  ;;  %3930 = vmatmul.msk.f32.gmra.mxu2 %vm6198_vm0, %v6183_v35  ;;  %vm6213_vm15 = vmmov %vm6198_vm0  ;;  %vm6215_vm0 = vcmask 130048  }
 0xa17   : > { %3928 = vmatmul.msk.f32.gmra.mxu0 %vm6199_vm4, %v6192_v7  ;;  %3931 = vmatmul.msk.f32.gmra.mxu2 %vm6200_vm13, %v6188_v14  ;;  %vm6216_vm4 = vmmov %vm6215_vm0 }
 0xa1f   : > { %3932 = vmatmul.msk.f32.gmra.mxu2 %vm6201_vm10, %v6192_v7  ;;  %vm6217_vm10 = vmmov %vm6215_vm0 }
 0xa5c   : > { %v2714_v52 = vpop.f32.mrf.mxu0 }
 0xa60   : > { %v2821_v17 = vpop.f32.mrf.mxu1 }
 0xa64   : > { %v2722_v31 = vpop.f32.mrf.mxu0  ;;  %v2863_v40 = vpop.f32.mrf.mxu3 }
 0xa68   : > { %v2826_v3 = vpop.f32.mrf.mxu1 }
 0xa6a   : > { %v2779_v25 = vpop.f32.mrf.mxu2 }
 0xa6b   : > { %v2780_v46 = vadd.f32 %v2779_v25, %v2714_v52 }
 0xa6c   : > { %v2730_v23 = vpop.f32.mrf.mxu0  ;;  %v2869_v61 = vpop.f32.mrf.mxu3 }
 0xa6d   : > { %v2822_v38 = vadd.f32 %v2821_v17, %v2780_v46 }
 0xa70   : > { %v2831_v58 = vpop.f32.mrf.mxu1 }
 0xa72   : > { %v2783_v10 = vpop.f32.mrf.mxu2 }
 0xa73   : > { %v2784_v0 = vadd.f32 %v2783_v10, %v2722_v31  ;;  %v2971_v10 = vpop.permute.xlu0 %2970 }
 0xa74   : > { %v2738_v6 = vpop.f32.mrf.mxu0  ;;  %v2875_v20 = vpop.f32.mrf.mxu3 }
 0xa75   : > { %v2827_v34 = vadd.f32 %v2826_v3, %v2784_v0  ;;  %v2864_v0 = vadd.f32 %v2863_v40, %v2822_v38 }
 0xa77   : > { %v2870_v63 = vadd.f32 %v2869_v61, %v2827_v34 }
 0xa78   : > { %v2836_v44 = vpop.f32.mrf.mxu1 }
 0xa7a   : > { %v2787_v30 = vpop.f32.mrf.mxu2 }
 0xa7b   : > { %v2788_v49 = vadd.f32 %v2787_v30, %v2730_v23 }
 0xa7c   : > { %v2914_v18 = vpop.f32.mrf.mxu0  ;;  %v2881_v30 = vpop.f32.mrf.mxu3 }
 0xa7d   : > { %v2832_v29 = vadd.f32 %v2831_v58, %v2788_v49  ;;  %v2915_v34 = vadd.f32 %v2914_v18, %v2864_v0 }
 0xa7f   : > { %v2876_v60 = vadd.f32 %v2875_v20, %v2832_v29 }
 0xa82   : > { %v2791_v48 = vpop.f32.mrf.mxu2 }
 0xa83   : > { %v2792_v9 = vadd.f32 %v2791_v48, %v2738_v6 }
 0xa84   : > { %v2918_v2 = vpop.f32.mrf.mxu0 }
 0xa85   : > { %v2919_v36 = vadd.f32 %v2918_v2, %v2870_v63  ;;  %v2837_v3 = vadd.f32 %v2836_v44, %v2792_v9  ;;  %v2967_v63 = vpop.permute.xlu2 %2966 }
 0xa87   : > { %v2882_v58 = vadd.f32 %v2881_v30, %v2837_v3 }
 0xa8a   : > { %v2951_v37 = vpop.f32.mrf.mxu2 }
 0xa8b   : > { %v2952_v52 = vadd.f32 %v2951_v37, %v2915_v34 }
 0xa8c   : > { %v2922_v55 = vpop.f32.mrf.mxu0 }
 0xa8d   : > { %v2923_v28 = vadd.f32 %v2922_v55, %v2876_v60  ;;  %v2978_v49 = vsub.f32 %v2952_v52, %v2967_v63 }
 0xa92   : > { %v2955_v42 = vpop.f32.mrf.mxu2 }
 0xa93   : > { %v2956_v50 = vadd.f32 %v2955_v42, %v2919_v36 }
 0xa94   : > { %v2926_v2 = vpop.f32.mrf.mxu0 }
 0xa95   : > { %v2979_v53 = vsub.f32 %v2956_v50, %v2969_v62  ;;  %v2927_v25 = vadd.f32 %v2926_v2, %v2882_v58 }
 0xa97   : > { %2989 = vperm.xlu2 %4084, %v2979_v53  }
 0xa9a   : > { %v2959_v31 = vpop.f32.mrf.mxu2 }
 0xa9b   : > { %v2960_v23 = vadd.f32 %v2959_v31, %v2923_v28 }
 0xa9d   : > { %v2980_v61 = vsub.f32 %v2960_v23, %v2971_v10 }
 0xa9f   : > { %2994 = vperm.xlu1 %4083, %v2980_v61  }
 0xaa2   : > { %v2963_v6 = vpop.f32.mrf.mxu2 }
 0xaa3   : > { %v2964_v48 = vadd.f32 %v2963_v6, %v2927_v25 }
 0xaa5   : > { %v2981_v20 = vsub.f32 %v2964_v48, %v2973_v51 }
 0xaa7   : > { %2984 = vperm.xlu1 %4083, %v2978_v49   ;;  %2999 = vperm.xlu0 %4085, %v2981_v20  }
 0xaf1   : > { %v2990_v17 = vpop.permute.xlu2 %2989 }
 0xaf2   : > { %v5775_v36 = vsub.f32 %v5682_v41, %v2990_v17  ;;  %v5778_v40 = vsub.f32 %v5684_v8, %v2990_v17 }
 0xaf4   : > { %v3012_v18 = vmul.f32 %v5775_v36, %v5775_v36  ;;  %v3013_v37 = vmul.f32 %v5778_v40, %v5778_v40 }
 0xaf6   : > { %v3021_v42 = vadd.f32 %v3013_v37, %v3012_v18 }
 0xaf8   : > { %3022 = vadd.xlane.f32.xlu1 %v3021_v42 }
 0xb11   : > { %v2995_v62 = vpop.permute.xlu1 %2994  ;;  %3354 = vrot.lane.b32.xlu1 %v5710_v33, %s4307_s9 }
 0xb12   : > { %v5785_v29 = vsub.f32 %v5688_v15, %v2995_v62  ;;  %v5788_v50 = vsub.f32 %v5690_v39, %v2995_v62 }
 0xb14   : > { %v3014_v41 = vmul.f32 %v5785_v29, %v5785_v29  ;;  %v3015_v8 = vmul.f32 %v5788_v50, %v5788_v50 }
 0xb16   : > { %v3024_v55 = vadd.f32 %v3015_v8, %v3014_v41 }
 0xb18   : > { %3025 = vadd.xlane.f32.xlu0 %v3024_v55 }
 0xb19   : > { %v3000_v46 = vpop.permute.xlu0 %2999  ;;  %v2985_v15 = vpop.permute.xlu1 %2984 }
 0xb1a   : > { %v5795_v53 = vsub.f32 %v5694_v13, %v3000_v46  ;;  %v5798_v60 = vsub.f32 %v5696_v22, %v3000_v46  ;;  %v5805_v51 = vsub.f32 %v5702_v21, %v2985_v15  ;;  %v5808_v44 = vsub.f32 %v5700_v27, %v2985_v15 }
 0xb1b   : > { %v4308_v15 = vmov 5  }
 0xb1c   : > { %v3016_v39 = vmul.f32 %v5795_v53, %v5795_v53  ;;  %v3017_v9 = vmul.f32 %v5798_v60, %v5798_v60  ;;  %v3010_v13 = vmul.f32 %v5805_v51, %v5805_v51  ;;  %v3011_v22 = vmul.f32 %v5808_v44, %v5808_v44  ;;  %4086 = vset.pattern.permute.xlu1 %v4308_v15 }
 0xb1d   : > { %3397 = vperm.xlu1 %4086, %v5733_v19  }
 0xb1e   : > { %v3027_v38 = vadd.f32 %v3017_v9, %v3016_v39  ;;  %v3018_v28 = vadd.f32 %v3011_v22, %v3010_v13 }
 0xb20   : > { %3028 = vadd.xlane.f32.xlu2 %v3027_v38 }
 0xb28   : > { %3019 = vadd.xlane.f32.xlu2 %v3018_v28 }
 0xb2c   : > { %3352 = vrot.lane.b32.xlu0 %v5733_v19, %s4307_s9 }
 0xb34   : > { %3358 = vrot.lane.b32.xlu0 %v5725_v56, %s4307_s9 }
 0xb40   : > { %3356 = vrot.lane.b32.xlu2 %v5717_v12, %s4307_s9  ;;  %s4236_s9 = scalar_lea.hbm %s4235_s29, 64 }
 0xb41   : > { %p4237_p0 = scmp.ne.s32.totalorder %s4235_s29, %s4236_s9  ;;  %p4242_p4 = scmp.lt.s32.totalorder %s4240_s12, %s4236_s9 }
 0xb43   : > { %p4238_p1 = pnand %p4237_p0, %p4385_p5  ;;  %p4243_p7 = por %p4242_p4, %p4241_p3 }
 0xb45   : > { %p4239_p2 = pneg %p4238_p1 }
 0xb47   : > { %p4244_p8 = pnand %p4243_p7, %p4239_p2 }
 0xb6b   : > { %v3023_v27 = vpop.xlane.xlu1 %3022 }
 0xb6c   : > { %v3031_v10 = vmul.f32 %v3023_v27, %v4774_v24 }
 0xb6e   : > { %v3050_v23 = vand.u32 4294901760, %v3031_v10 }
 0xb70   : > { %v3112_v2 = vsub.f32 %v3031_v10, %v3050_v23 }
 0xb72   : > { %v3113_v63 = vand.u32 4294901760, %v3112_v2 }
 0xb74   : > { %v3114_v37 = vsub.f32 %v3112_v2, %v3113_v63 }
 0xb76   : > { %v3115_v41 = vand.u32 4294901760, %v3114_v37 }
 0xb8b   : > { %v3026_v21 = vpop.xlane.xlu0 %3025 }
 0xb8c   : > { %v3032_v31 = vmul.f32 %v3026_v21, %v4774_v24 }
 0xb8e   : > { %v3048_v3 = vand.u32 4294901760, %v3032_v31 }
 0xb90   : > { %v3106_v0 = vsub.f32 %v3032_v31, %v3048_v3 }
 0xb92   : > { %v3107_v52 = vand.u32 4294901760, %v3106_v0 }
 0xb93   : > { %v3029_v30 = vpop.xlane.xlu2 %3028 }
 0xb94   : > { %v3033_v61 = vmul.f32 %v3029_v30, %v4774_v24  ;;  %v3108_v20 = vsub.f32 %v3106_v0, %v3107_v52  ;;  %v4188_v30 = vld [vmem:[#allocation2 + $0x4] sm:$0xf] }
 0xb96   : > { %v3046_v34 = vand.u32 4294901760, %v3033_v61  ;;  %v3109_v62 = vand.u32 4294901760, %v3108_v20 }
 0xb98   : > { %v3100_v58 = vsub.f32 %v3033_v61, %v3046_v34  ;;  %3047 = vmatpush.msrb.mxu1 %v3046_v34  ;;  %3198 = vmatpush.msrb.mxu2 %v3046_v34  ;;  %v4273_v61 = vld [vmem:[#allocation2 + $0x10] sm:$0xf0] }
 0xb9a   : > { %v3101_v25 = vand.u32 4294901760, %v3100_v58  ;;  %3049 = vmatpush.msrb.mxu1 %v3048_v3  ;;  %3154 = vmatpush.msrb.mxu0 %v3100_v58 }
 0xb9b   : > { %3200 = vmatpush.msrb.mxu2 %v3048_v3  ;;  %v3020_v6 = vpop.xlane.xlu2 %3019 }
 0xb9c   : > { %v3102_v48 = vsub.f32 %v3100_v58, %v3101_v25  ;;  %v3030_v49 = vmul.f32 %v3020_v6, %v4774_v24  ;;  %3051 = vmatpush.msrb.mxu1 %v3050_v23  ;;  %3157 = vmatpush.msrb.mxu0 %v3106_v0  ;;  %v4272_v0 = vld [vmem:[#allocation2 + $0x8] sm:$0xf] }
 0xb9d   : > { %3202 = vmatpush.msrb.mxu2 %v3050_v23 }
 0xb9e   : > { %v3052_v17 = vand.u32 4294901760, %v3030_v49  ;;  %3160 = vmatpush.msrb.mxu0 %v3112_v2  ;;  %v3103_v18 = vand.u32 4294901760, %v3102_v48  ;;  %v4182_v2 = vld [vmem:[#allocation2 + $0x14] sm:$0xf0] }
 0xb9f   : > { %v4185_v58 = vor.u32 %v4272_v0, %v4182_v2 }
 0xba0   : > { %v3118_v42 = vsub.f32 %v3030_v49, %v3052_v17  ;;  %3053 = vmatpush.msrb.mxu1 %v3052_v17  ;;  %3104 = vmatpush.msra.mxu3 %v3103_v18 }
 0xba1   : > { %3204 = vmatpush.msrb.mxu2 %v3052_v17  ;;  %3059 = vmatmul.f32.vlgmr.msrb.gmra.mxu1 %v4847_v43 }
 0xba2   : > { %3245 = vmatpush.msra.mxu1 %v3101_v25  ;;  %3110 = vmatpush.msra.mxu3 %v3109_v62  ;;  %v3119_v8 = vand.u32 4294901760, %v3118_v42 }
 0xba3   : > { %3163 = vmatpush.msrb.mxu0 %v3118_v42  ;;  %3208 = vmatmul.f32.vlgmr.msrb.gmra.mxu2 %v4817_v26 }
 0xba4   : > { %3249 = vmatpush.msra.mxu1 %v3107_v52  ;;  %3116 = vmatpush.msra.mxu3 %v3115_v41  ;;  %v3120_v24 = vsub.f32 %v3118_v42, %v3119_v8 }
 0xba5   : > { %3166 = vmatmul.f32.vlgmr.msrb.gmra.mxu0 %v4806_v45  ;;  %3652 = vmatpush.bf16.msra.mxu2 %v4185_v58 }
 0xba6   : > { %3253 = vmatpush.msra.mxu1 %v3113_v63  ;;  %v3121_v55 = vand.u32 4294901760, %v3120_v24  ;;  %v3994_v63 = vld [vmem:[%s6016_s5] sm:$0xff] }
 0xba8   : > { %3257 = vmatpush.msra.mxu1 %v3119_v8  ;;  %3122 = vmatpush.msra.mxu3 %v3121_v55 }
 0xba9   : > { %3933 = vmatmul.msk.f32.vlgmr.msra.gmra.mxu3 %vm6202_vm7, %v4791_v5  ;;  %3067 = vmatmul.f32.gmra.mxu1 %v4864_v4 }
 0xbaa   : > { %3288 = vmatpush.msrb.mxu3 %v3046_v34 }
 0xbab   : > { %3214 = vmatmul.f32.gmra.mxu2 %v4850_v1 }
 0xbac   : > { %3290 = vmatpush.msrb.mxu3 %v3048_v3 }
 0xbad   : > { %3171 = vmatmul.f32.gmra.mxu0 %v4836_v32 }
 0xbae   : > { %3292 = vmatpush.msrb.mxu3 %v3050_v23  ;;  %v6214_v23 = vmov 0  }
 0xbaf   : > { %4087 = vset.pattern.permute.xlu1 %v6214_v23 }
 0xbb0   : > { %3294 = vmatpush.msrb.mxu3 %v3052_v17  ;;  %v4189_v17 = vor.u32 %v4273_v61, %v4188_v30  ;;  %v3357_v61 = vpop.permute.xlu2 %3356 }
 0xbb1   : > { %3934 = vmatmul.msk.f32.gmra.mxu3 %vm6203_vm9, %v6183_v35  ;;  %3075 = vmatmul.f32.gmra.mxu1 %v4882_v47 }
 0xbb2   : > { %3633 = vmatpush.bf16.msra.mxu0 %v4189_v17  ;;  %4005 = vmatpush.bf16.msrb.mxu1 %v4189_v17  ;;  %v4309_v17 = vmov 6  }
 0xbb3   : > { %3220 = vmatmul.f32.gmra.mxu2 %v6185_v11 }
 0xbb5   : > { %3176 = vmatmul.f32.gmra.mxu0 %v6186_v57 }
 0xbb9   : > { %3935 = vmatmul.msk.f32.gmra.mxu3 %vm6204_vm14, %v6188_v14  ;;  %3083 = vmatmul.f32.gmra.mxu1 %v6187_v16 }
 0xbbb   : > { %3226 = vmatmul.f32.gmra.mxu2 %v6190_v59 }
 0xbbd   : > { %3181 = vmatmul.f32.gmra.mxu0 %v6191_v54 }
 0xbc1   : > { %3936 = vmatmul.msk.f32.gmra.mxu3 %vm6205_vm5, %v6192_v7  ;;  %3937 = vmatmul.msk.f32.vlgmr.msra.gmra.mxu1 %vm6206_vm1, %v4791_v5 }
 0xbc3   : > { %3963 = vmatmul.msk.bf16.vlgmr.msra.gmra.mxu2 %vm6215_vm0, %v3994_v63 }
 0xbc5   : > { %3961 = vmatmul.msk.bf16.vlgmr.msra.gmra.mxu0 %vm6216_vm4, %v3994_v63 }
 0xbc9   : > { %3941 = vmatmul.msk.f32.vlgmr.msrb.gmra.mxu3 %vm6207_vm8, %v4791_v5  ;;  %3938 = vmatmul.msk.f32.gmra.mxu1 %vm6208_vm6, %v6183_v35  ;;  %vm6218_vm8 = vmmov %vm6215_vm0 }
 0xbd1   : > { %3942 = vmatmul.msk.f32.gmra.mxu3 %vm6209_vm3, %v6183_v35  ;;  %3939 = vmatmul.msk.f32.gmra.mxu1 %vm6210_vm11, %v6188_v14 }
 0xbd9   : > { %3943 = vmatmul.msk.f32.gmra.mxu3 %vm6211_vm12, %v6188_v14  ;;  %3940 = vmatmul.msk.f32.gmra.mxu1 %vm6212_vm2, %v6192_v7 }
 0xbe1   : > { %3944 = vmatmul.msk.f32.gmra.mxu3 %vm6213_vm15, %v6192_v7 }
 0xc1e   : > { %v3060_v45 = vpop.f32.mrf.mxu1 }
 0xc1f   : > { %v3061_v35 = vadd.f32 1e-05, %v3060_v45  ;;  %v3995_v45 = vld [vmem:[%s6016_s5 + $0x8] sm:$0xff] }
 0xc20   : > { %3962 = vmatmul.msk.bf16.vlgmr.msrb.gmra.mxu1 %vm6217_vm10, %v3995_v45  ;;  %3964 = vmatmul.msk.bf16.gmra.mxu2 %vm6218_vm8, %v3995_v45 }
 0xc22   : > { %v3167_v47 = vpop.f32.mrf.mxu0 }
 0xc26   : > { %v3068_v5 = vpop.f32.mrf.mxu1  ;;  %v3209_v11 = vpop.f32.mrf.mxu2 }
 0xc27   : > { %v3069_v14 = vadd.f32 1e-05, %v3068_v5 }
 0xc2a   : > { %v3172_v46 = vpop.f32.mrf.mxu0 }
 0xc2c   : > { %v3125_v26 = vpop.f32.mrf.mxu3 }
 0xc2d   : > { %v3126_v57 = vadd.f32 %v3125_v26, %v3061_v35  ;;  %v3353_v35 = vpop.permute.xlu0 %3352 }
 0xc2e   : > { %v3076_v32 = vpop.f32.mrf.mxu1  ;;  %v3215_v9 = vpop.f32.mrf.mxu2 }
 0xc2f   : > { %v3168_v54 = vadd.f32 %v3167_v47, %v3126_v57  ;;  %v3077_v28 = vadd.f32 1e-05, %v3076_v32 }
 0xc31   : > { %v3210_v39 = vadd.f32 %v3209_v11, %v3168_v54 }
 0xc32   : > { %v3177_v31 = vpop.f32.mrf.mxu0 }
 0xc34   : > { %v3129_v43 = vpop.f32.mrf.mxu3 }
 0xc35   : > { %v3130_v7 = vadd.f32 %v3129_v43, %v3069_v14 }
 0xc36   : > { %v3084_v1 = vpop.f32.mrf.mxu1  ;;  %v3221_v25 = vpop.f32.mrf.mxu2 }
 0xc37   : > { %v3173_v21 = vadd.f32 %v3172_v46, %v3130_v7  ;;  %v3085_v48 = vadd.f32 1e-05, %v3084_v1 }
 0xc39   : > { %v3216_v3 = vadd.f32 %v3215_v9, %v3173_v21  ;;  %v3355_v21 = vpop.permute.xlu1 %3354 }
 0xc3a   : > { %v3182_v24 = vpop.f32.mrf.mxu0 }
 0xc3c   : > { %v3133_v4 = vpop.f32.mrf.mxu3 }
 0xc3d   : > { %v3134_v10 = vadd.f32 %v3133_v4, %v3077_v28 }
 0xc3e   : > { %v3260_v16 = vpop.f32.mrf.mxu1  ;;  %v3227_v47 = vpop.f32.mrf.mxu2 }
 0xc3f   : > { %v3261_v38 = vadd.f32 %v3260_v16, %v3210_v39  ;;  %v3178_v20 = vadd.f32 %v3177_v31, %v3134_v10 }
 0xc41   : > { %v3222_v41 = vadd.f32 %v3221_v25, %v3178_v20 }
 0xc44   : > { %v3137_v59 = vpop.f32.mrf.mxu3 }
 0xc45   : > { %v3138_v62 = vadd.f32 %v3137_v59, %v3085_v48 }
 0xc46   : > { %v3264_v22 = vpop.f32.mrf.mxu1 }
 0xc47   : > { %v3265_v34 = vadd.f32 %v3264_v22, %v3216_v3  ;;  %v3183_v1 = vadd.f32 %v3182_v24, %v3138_v62 }
 0xc49   : > { %v3228_v14 = vadd.f32 %v3227_v47, %v3183_v1 }
 0xc4c   : > { %v3297_v13 = vpop.f32.mrf.mxu3 }
 0xc4d   : > { %v3298_v27 = vadd.f32 %v3297_v13, %v3261_v38 }
 0xc4e   : > { %v3268_v37 = vpop.f32.mrf.mxu1 }
 0xc4f   : > { %4136 = vrsqrt.f32 %v3298_v27  ;;  %v3269_v55 = vadd.f32 %v3268_v37, %v3222_v41  ;;  %vm3318_vm7 = vweird.f32 %v3298_v27 }
 0xc54   : > { %v3301_v52 = vpop.f32.mrf.mxu3 }
 0xc55   : > { %v4137_v6 = vpop.eup %4136  ;;  %v3302_v49 = vadd.f32 %v3301_v52, %v3265_v34 }
 0xc56   : > { %v3313_v18 = vmul.f32 %v4137_v6, %v3298_v27  ;;  %vm3319_vm13 = vweird.f32 %v4137_v6  ;;  %v3272_v59 = vpop.f32.mrf.mxu1 }
 0xc57   : > { %4138 = vrsqrt.f32 %v3302_v49  ;;  %vm3320_vm9 = vmor %vm3318_vm7, %vm3319_vm13  ;;  %v3273_v7 = vadd.f32 %v3272_v59, %v3228_v14  ;;  %vm3328_vm5 = vweird.f32 %v3302_v49 }
 0xc58   : > { %v3314_v42 = vmul.f32 %v4137_v6, %v3313_v18  ;;  %v3398_v18 = vpop.permute.xlu1 %3397 }
 0xc5a   : > { %v3315_v8 = vmul.f32 0.5, %v3314_v42 }
 0xc5c   : > { %v3305_v5 = vpop.f32.mrf.mxu3  ;;  %v3316_v26 = vsub.f32 1.5, %v3315_v8 }
 0xc5d   : > { %v4139_v32 = vpop.eup %4138  ;;  %v3306_v43 = vadd.f32 %v3305_v5, %v3269_v55 }
 0xc5e   : > { %v3323_v4 = vmul.f32 %v4139_v32, %v3302_v49  ;;  %v3317_v11 = vmul.f32 %v4137_v6, %v3316_v26  ;;  %vm3329_vm14 = vweird.f32 %v4139_v32 }
 0xc5f   : > { %4140 = vrsqrt.f32 %v3306_v43  ;;  %vm3330_vm1 = vmor %vm3328_vm5, %vm3329_vm14  ;;  %vm3338_vm3 = vweird.f32 %v3306_v43 }
 0xc60   : > { %v3324_v57 = vmul.f32 %v4139_v32, %v3323_v4  ;;  %v3321_v16 = vsel %vm3320_vm9, %v4137_v6, %v3317_v11  ;;  %v3359_v6 = vpop.permute.xlu0 %3358  ;;  %v3654_v11 = vpop.f32.mrf.mxu2 }
 0xc61   : > { %v3364_v54 = vmul.f32 %v3353_v35, %v3321_v16 }
 0xc62   : > { %v3325_v46 = vmul.f32 0.5, %v3324_v57 }
 0xc63   : > { %3370 = vperm.xlu0 %4085, %v3364_v54  }
 0xc64   : > { %v3309_v39 = vpop.f32.mrf.mxu3  ;;  %v3326_v9 = vsub.f32 1.5, %v3325_v46 }
 0xc65   : > { %v4141_v38 = vpop.eup %4140  ;;  %v3310_v13 = vadd.f32 %v3309_v39, %v3273_v7 }
 0xc66   : > { %v3333_v22 = vmul.f32 %v4141_v38, %v3306_v43  ;;  %v3327_v28 = vmul.f32 %v4139_v32, %v3326_v9  ;;  %vm3339_vm6 = vweird.f32 %v4141_v38 }
 0xc67   : > { %4142 = vrsqrt.f32 %v3310_v13  ;;  %vm3340_vm11 = vmor %vm3338_vm3, %vm3339_vm6  ;;  %vm3348_vm2 = vweird.f32 %v3310_v13 }
 0xc68   : > { %v3334_v27 = vmul.f32 %v4141_v38, %v3333_v22  ;;  %v3331_v31 = vsel %vm3330_vm1, %v4139_v32, %v3327_v28 }
 0xc69   : > { %v3365_v10 = vmul.f32 %v3355_v21, %v3331_v31 }
 0xc6a   : > { %v3335_v3 = vmul.f32 0.5, %v3334_v27 }
 0xc6b   : > { %3375 = vperm.xlu1 %4087, %v3365_v10  }
 0xc6c   : > { %v3336_v23 = vsub.f32 1.5, %v3335_v3 }
 0xc6d   : > { %v4143_v30 = vpop.eup %4142 }
 0xc6e   : > { %v3343_v0 = vmul.f32 %v4143_v30, %v3310_v13  ;;  %v3337_v2 = vmul.f32 %v4141_v38, %v3336_v23  ;;  %vm3349_vm12 = vweird.f32 %v4143_v30 }
 0xc6f   : > { %vm3350_vm15 = vmor %vm3348_vm2, %vm3349_vm12 }
 0xc70   : > { %v3344_v34 = vmul.f32 %v4143_v30, %v3343_v0  ;;  %v3341_v58 = vsel %vm3340_vm11, %v4141_v38, %v3337_v2 }
 0xc71   : > { %v3366_v52 = vmul.f32 %v3357_v61, %v3341_v58 }
 0xc72   : > { %v3345_v25 = vmul.f32 0.5, %v3344_v34 }
 0xc73   : > { %3380 = vperm.xlu2 %4084, %v3366_v52   ;;  %4090 = vset.pattern.permute.xlu1 %v4308_v15 }
 0xc74   : > { %v3346_v63 = vsub.f32 1.5, %v3345_v25  ;;  %3409 = vperm.xlu1 %4090, %v5725_v56  }
 0xc76   : > { %v3347_v48 = vmul.f32 %v4143_v30, %v3346_v63 }
 0xc78   : > { %v3351_v49 = vsel %vm3350_vm15, %v4143_v30, %v3347_v48 }
 0xc79   : > { %v3367_v20 = vmul.f32 %v3359_v6, %v3351_v49 }
 0xc7b   : > { %3385 = vperm.xlu0 %4085, %v3367_v20   ;;  %4088 = vset.pattern.permute.xlu2 %v4308_v15 }
 0xc7c   : > { %3401 = vperm.xlu2 %4088, %v5710_v33   ;;  %4092 = vset.pattern.permute.xlu1 %v4309_v17 }
 0xc7d   : > { %3589 = vperm.xlu1 %4092, %v5710_v33  }
 0xc83   : > { %4089 = vset.pattern.permute.xlu0 %v4308_v15 }
 0xc84   : > { %3405 = vperm.xlu0 %4089, %v5717_v12   ;;  %4091 = vset.pattern.permute.xlu2 %v4309_v17 }
 0xc85   : > { %3585 = vperm.xlu2 %4091, %v5733_v19  }
 0xc8c   : > { %4093 = vset.pattern.permute.xlu0 %v4309_v17  ;;  %v3656_v17 = vpop.f32.mrf.mxu2 }
 0xc8d   : > { %3597 = vperm.xlu0 %4093, %v5725_v56   ;;  %3593 = vperm.xlu2 %4091, %v5717_v12  }
 0xccd   : > { %v3381_v37 = vpop.permute.xlu2 %3380 }
 0xcce   : > { %v3392_v16 = vmul.f32 %v3381_v37, %v5785_v29  ;;  %v3393_v59 = vmul.f32 %v3381_v37, %v5788_v50 }
 0xcd5   : > { %v3371_v42 = vpop.permute.xlu0 %3370 }
 0xcd6   : > { %v3388_v62 = vmul.f32 %v3371_v42, %v5805_v51  ;;  %v3389_v41 = vmul.f32 %v3371_v42, %v5808_v44  ;;  %v3402_v24 = vpop.permute.xlu2 %3401 }
 0xcd8   : > { %v5883_v33 = vadd.f32 %v3398_v18, %v3388_v62  ;;  %v5885_v15 = vadd.f32 %v3398_v18, %v3389_v41 }
 0xcda   : > { %v3945_v8 = vmul.f32 -1.442695, %v5883_v33  ;;  %v3946_v19 = vmul.f32 -1.442695, %v5885_v15 }
 0xcdc   : > { %4144 = vpow2.f32 %v3945_v8 }
 0xcdd   : > { %4146 = vpow2.f32 %v3946_v19  ;;  %v3376_v56 = vpop.permute.xlu1 %3375 }
 0xcde   : > { %v3390_v12 = vmul.f32 %v3376_v56, %v5775_v36  ;;  %v3391_v55 = vmul.f32 %v3376_v56, %v5778_v40  ;;  %v3635_v36 = vpop.f32.mrf.mxu0 }
 0xcdf   : > { %v3586_v47 = vpop.permute.xlu2 %3585 }
 0xce0   : > { %v5891_v45 = vadd.f32 %v3402_v24, %v3390_v12  ;;  %v5893_v51 = vadd.f32 %v3402_v24, %v3391_v55  ;;  %v3636_v9 = vadd.f32 %v3635_v36, %v3586_v47  ;;  %v3655_v3 = vadd.f32 %v3654_v11, %v3586_v47 }
 0xce2   : > { %v4145_v44 = vpop.eup %4144  ;;  %v3947_v5 = vmul.f32 -1.442695, %v5891_v45  ;;  %v3948_v43 = vmul.f32 -1.442695, %v5893_v51 }
 0xce3   : > { %v4147_v26 = vpop.eup %4146  ;;  %v3444_v32 = vadd.f32 1.0, %v4145_v44 }
 0xce4   : > { %v3445_v1 = vadd.f32 1.0, %v4147_v26  ;;  %4148 = vpow2.f32 %v3947_v5 }
 0xce5   : > { %4150 = vrcp.f32 %v3444_v32  ;;  %v3461_v46 = vand.u32 2147483647, %v3444_v32  ;;  %v3463_v13 = vand.u32 2147483648, %v3444_v32  ;;  %vm3457_vm4 = vweird.f32 %v3444_v32 }
 0xce6   : > { %4152 = vrcp.f32 %v3445_v1  ;;  %v3476_v22 = vand.u32 2147483647, %v3445_v1  ;;  %v3478_v27 = vand.u32 2147483648, %v3445_v1  ;;  %v3410_v31 = vpop.permute.xlu1 %3409  ;;  %vm3472_vm13 = vweird.f32 %v3445_v1  ;;  %v3637_v36 = vpop.f32.mrf.mxu0 }
 0xce7   : > { %4154 = vpow2.f32 %v3948_v43  ;;  %vm3462_vm7 = vcmp.eq.f32.partialorder %v3461_v46, 8.507059e+37 }
 0xce8   : > { %vm3477_vm14 = vcmp.eq.f32.partialorder %v3476_v22, 8.507059e+37  ;;  %v3479_v34 = vor.u32 1.1754944e-38, %v3478_v27 }
 0xcea   : > { %v4149_v4 = vpop.eup %4148 }
 0xceb   : > { %v4151_v40 = vpop.eup %4150  ;;  %v5897_v35 = vadd.f32 1.0, %v4149_v4 }
 0xcec   : > { %v4153_v57 = vpop.eup %4152  ;;  %v3453_v14 = vmul.f32 %v4151_v40, %v3444_v32  ;;  %vm3458_vm0 = vweird.f32 %v4151_v40 }
 0xced   : > { %v4155_v54 = vpop.eup %4154  ;;  %v3468_v7 = vmul.f32 %v4153_v57, %v3445_v1  ;;  %4156 = vrcp.f32 %v5897_v35  ;;  %v3386_v39 = vpop.permute.xlu0 %3385  ;;  %vm3473_vm10 = vweird.f32 %v4153_v57  ;;  %vm3459_vm9 = vmor %vm3457_vm4, %vm3458_vm0  ;;  %v3491_v25 = vand.u32 2147483647, %v5897_v35 }
 0xcee   : > { %v3454_v38 = vsub.f32 1.0, %v3453_v14  ;;  %v5902_v28 = vadd.f32 1.0, %v4155_v54  ;;  %v3394_v29 = vmul.f32 %v3386_v39, %v5795_v53  ;;  %v3395_v50 = vmul.f32 %v3386_v39, %v5798_v60  ;;  %vm3474_vm5 = vmor %vm3472_vm13, %vm3473_vm10  ;;  %v5939_v39 = vpop.f32.mrf.mxu1 }
 0xcef   : > { %v3469_v21 = vsub.f32 1.0, %v3468_v7  ;;  %v3464_v60 = vor.u32 1.1754944e-38, %v3463_v13  ;;  %v3493_v49 = vand.u32 2147483648, %v5897_v35  ;;  %vm3487_vm8 = vweird.f32 %v5897_v35  ;;  %v3590_v47 = vpop.permute.xlu1 %3589  ;;  %v5941_v13 = vpop.f32.mrf.mxu2 }
 0xcf0   : > { %v3455_v10 = vmul.f32 %v4151_v40, %v3454_v38  ;;  %4158 = vrcp.f32 %v5902_v28  ;;  %v5908_v0 = vadd.f32 %v3410_v31, %v3394_v29  ;;  %v5910_v61 = vadd.f32 %v3410_v31, %v3395_v50 }
 0xcf1   : > { %v3470_v23 = vmul.f32 %v4153_v57, %v3469_v21  ;;  %v3508_v26 = vand.u32 2147483648, %v5902_v28  ;;  %v3494_v43 = vor.u32 1.1754944e-38, %v3493_v49  ;;  %v3506_v4 = vand.u32 2147483647, %v5902_v28 }
 0xcf2   : > { %v3456_v30 = vadd.f32 %v4151_v40, %v3455_v10  ;;  %v3951_v63 = vmul.f32 -1.442695, %v5908_v0  ;;  %v3952_v20 = vmul.f32 -1.442695, %v5910_v61  ;;  %vm3492_vm11 = vcmp.eq.f32.partialorder %v3491_v25, 8.507059e+37 }
 0xcf3   : > { %v4157_v53 = vpop.eup %4156  ;;  %v3471_v2 = vadd.f32 %v4153_v57, %v3470_v23  ;;  %vm3502_vm12 = vweird.f32 %v5902_v28  ;;  %v3509_v14 = vor.u32 1.1754944e-38, %v3508_v26  ;;  %v3638_v7 = vadd.f32 %v3637_v36, %v3590_v47 }
 0xcf4   : > { %v3460_v58 = vsel %vm3459_vm9, %v4151_v40, %v3456_v30  ;;  %v3483_v52 = vmul.f32 %v4157_v53, %v5897_v35  ;;  %4160 = vpow2.f32 %v3951_v63  ;;  %vm3488_vm1 = vweird.f32 %v4157_v53 }
 0xcf5   : > { %v3465_v6 = vsel %vm3462_vm7, %v3464_v60, %v3460_v58  ;;  %v3475_v48 = vsel %vm3474_vm5, %v4153_v57, %v3471_v2  ;;  %4162 = vpow2.f32 %v3952_v20  ;;  %vm3489_vm6 = vmor %vm3487_vm8, %vm3488_vm1  ;;  %vm3507_vm15 = vcmp.eq.f32.partialorder %v3506_v4, 8.507059e+37 }
 0xcf6   : > { %v4159_v18 = vpop.eup %4158  ;;  %v3480_v37 = vsel %vm3477_vm14, %v3479_v34, %v3475_v48  ;;  %v3572_v42 = vmul.f32 %v3465_v6, %v5883_v33  ;;  %v3484_v62 = vsub.f32 1.0, %v3483_v52  ;;  %v3406_v41 = vpop.permute.xlu0 %3405  ;;  %v3657_v38 = vadd.f32 %v3656_v17, %v3590_v47 }
 0xcf7   : > { %v3573_v8 = vmul.f32 %v3480_v37, %v5885_v15  ;;  %v3498_v19 = vmul.f32 %v4159_v18, %v5902_v28  ;;  %v5922_v12 = vadd.f32 %v3406_v41, %v3392_v16  ;;  %v5924_v55 = vadd.f32 %v3406_v41, %v3393_v59  ;;  %v3642_v2 = vpop.f32.mrf.mxu1  ;;  %v3661_v25 = vpop.f32.mrf.mxu2 }
 0xcf8   : > { %v3485_v56 = vmul.f32 %v4157_v53, %v3484_v62  ;;  %v3664_v24 = vadd.f32 %v3636_v9, %v3572_v42  ;;  %vm3503_vm3 = vweird.f32 %v4159_v18 }
 0xcf9   : > { %v3499_v44 = vsub.f32 1.0, %v3498_v19  ;;  %v3665_v5 = vadd.f32 %v3655_v3, %v3573_v8  ;;  %v3949_v15 = vmul.f32 -1.442695, %v5922_v12  ;;  %v3950_v32 = vmul.f32 -1.442695, %v5924_v55  ;;  %vm3504_vm2 = vmor %vm3502_vm12, %vm3503_vm3 }
 0xcfa   : > { %v3486_v33 = vadd.f32 %v4157_v53, %v3485_v56  ;;  %3672 = vst [vmem:[%s5928_s15] sm:$0xff] %v3664_v24  ;;  %v4161_v40 = vpop.eup %4160 }
 0xcfb   : > { %v3500_v1 = vmul.f32 %v4159_v18, %v3499_v44  ;;  %3673 = vst [vmem:[%s5928_s15 + $0x8] sm:$0xff] %v3665_v5  ;;  %4164 = vpow2.f32 %v3949_v15  ;;  %v4163_v11 = vpop.eup %4162  ;;  %v3450_v59 = vadd.f32 1.0, %v4161_v40 }
 0xcfc   : > { %v3490_v35 = vsel %vm3489_vm6, %v4157_v53, %v3486_v33  ;;  %4166 = vpow2.f32 %v3950_v32  ;;  %v3451_v46 = vadd.f32 1.0, %v4163_v11 }
 0xcfd   : > { %v3495_v57 = vsel %vm3492_vm11, %v3494_v43, %v3490_v35  ;;  %v3501_v16 = vadd.f32 %v4159_v18, %v3500_v1  ;;  %4168 = vrcp.f32 %v3450_v59  ;;  %v3551_v30 = vand.u32 2147483647, %v3450_v59 }
 0xcfe   : > { %v3574_v54 = vmul.f32 %v3495_v57, %v5891_v45  ;;  %4170 = vrcp.f32 %v3451_v46  ;;  %v3553_v53 = vand.u32 2147483648, %v3450_v59  ;;  %v3566_v58 = vand.u32 2147483647, %v3451_v46 }
 0xcff   : > { %v3505_v9 = vsel %vm3504_vm2, %v4159_v18, %v3501_v16  ;;  %v3568_v52 = vand.u32 2147483648, %v3451_v46  ;;  %v3598_v63 = vpop.permute.xlu0 %3597  ;;  %vm3547_vm0 = vweird.f32 %v3450_v59  ;;  %vm3562_vm13 = vweird.f32 %v3451_v46 }
 0xd00   : > { %v3510_v22 = vsel %vm3507_vm15, %v3509_v14, %v3505_v9  ;;  %v3666_v27 = vadd.f32 %v3638_v7, %v3574_v54  ;;  %vm5952_vm10 = vcmp.eq.f32.partialorder %v3551_v30, 8.507059e+37  ;;  %v3554_v20 = vor.u32 1.1754944e-38, %v3553_v53  ;;  %v3594_v14 = vpop.permute.xlu2 %3593 }
 0xd01   : > { %v3575_v28 = vmul.f32 %v3510_v22, %v5893_v51  ;;  %v4165_v21 = vpop.eup %4164  ;;  %v3643_v62 = vadd.f32 %v3642_v2, %v3598_v63  ;;  %v3662_v41 = vadd.f32 %v3661_v25, %v3598_v63  ;;  %vm3567_vm14 = vcmp.eq.f32.partialorder %v3566_v58, 8.507059e+37 }
 0xd02   : > { %v4167_v29 = vpop.eup %4166  ;;  %v5944_v45 = vadd.f32 1.0, %v4165_v21  ;;  %3674 = vst [vmem:[%s5928_s15 + $0x10] sm:$0xff] %v3666_v27  ;;  %v3569_v19 = vor.u32 1.1754944e-38, %v3568_v52  ;;  %v3641_v22 = vadd.f32 %v5939_v39, %v3594_v14  ;;  %v3660_v21 = vadd.f32 %v5941_v13, %v3594_v14 }
 0xd03   : > { %v3667_v50 = vadd.f32 %v3657_v38, %v3575_v28  ;;  %v5946_v31 = vadd.f32 1.0, %v4167_v29  ;;  %v4169_v10 = vpop.eup %4168 }
 0xd04   : > { %4172 = vrcp.f32 %v5944_v45  ;;  %v4171_v3 = vpop.eup %4170  ;;  %v3543_v23 = vmul.f32 %v4169_v10, %v3450_v59  ;;  %vm3548_vm4 = vweird.f32 %v4169_v10  ;;  %v3521_v5 = vand.u32 2147483647, %v5944_v45 }
 0xd05   : > { %3675 = vst [vmem:[%s5928_s15 + $0x18] sm:$0xff] %v3667_v50  ;;  %4174 = vrcp.f32 %v5946_v31  ;;  %v3558_v51 = vmul.f32 %v4171_v3, %v3451_v46  ;;  %vm3563_vm7 = vweird.f32 %v4171_v3  ;;  %vm3549_vm9 = vmor %vm3547_vm0, %vm3548_vm4  ;;  %v3523_v33 = vand.u32 2147483648, %v5944_v45 }
 0xd06   : > { %v3544_v60 = vsub.f32 1.0, %v3543_v23  ;;  %vm3564_vm5 = vmor %vm3562_vm13, %vm3563_vm7  ;;  %v3538_v43 = vand.u32 2147483648, %v5946_v31  ;;  %v3536_v35 = vand.u32 2147483647, %v5946_v31  ;;  %vm3517_vm6 = vweird.f32 %v5944_v45 }
 0xd07   : > { %v3559_v34 = vsub.f32 1.0, %v3558_v51  ;;  %v3524_v16 = vor.u32 1.1754944e-38, %v3523_v33  ;;  %vm3532_vm11 = vweird.f32 %v5946_v31  ;;  %vm3522_vm12 = vcmp.eq.f32.partialorder %v3521_v5, 8.507059e+37 }
 0xd08   : > { %v3545_v6 = vmul.f32 %v4169_v10, %v3544_v60  ;;  %v3539_v54 = vor.u32 1.1754944e-38, %v3538_v43  ;;  %vm3537_vm15 = vcmp.eq.f32.partialorder %v3536_v35, 8.507059e+37 }
 0xd09   : > { %v3560_v17 = vmul.f32 %v4171_v3, %v3559_v34 }
 0xd0a   : > { %v4173_v48 = vpop.eup %4172  ;;  %v3546_v37 = vadd.f32 %v4169_v10, %v3545_v6 }
 0xd0b   : > { %v4175_v18 = vpop.eup %4174  ;;  %v3513_v42 = vmul.f32 %v4173_v48, %v5944_v45  ;;  %v3561_v8 = vadd.f32 %v4171_v3, %v3560_v17  ;;  %vm3518_vm1 = vweird.f32 %v4173_v48 }
 0xd0c   : > { %v3528_v56 = vmul.f32 %v4175_v18, %v5946_v31  ;;  %v3550_v24 = vsel %vm3549_vm9, %v4169_v10, %v3546_v37  ;;  %vm3533_vm8 = vweird.f32 %v4175_v18  ;;  %vm3519_vm3 = vmor %vm3517_vm6, %vm3518_vm1 }
 0xd0d   : > { %v3514_v44 = vsub.f32 1.0, %v3513_v42  ;;  %v3555_v26 = vsel %vm5952_vm10, %v3554_v20, %v3550_v24  ;;  %v3565_v15 = vsel %vm3564_vm5, %v4171_v3, %v3561_v8  ;;  %vm3534_vm2 = vmor %vm3532_vm11, %vm3533_vm8 }
 0xd0e   : > { %v3529_v32 = vsub.f32 1.0, %v3528_v56  ;;  %v3570_v1 = vsel %vm3567_vm14, %v3569_v19, %v3565_v15  ;;  %v3578_v4 = vmul.f32 %v3555_v26, %v5908_v0 }
 0xd0f   : > { %v3515_v36 = vmul.f32 %v4173_v48, %v3514_v44  ;;  %v3579_v47 = vmul.f32 %v3570_v1, %v5910_v61 }
 0xd10   : > { %v3530_v40 = vmul.f32 %v4175_v18, %v3529_v32  ;;  %v3670_v57 = vadd.f32 %v3643_v62, %v3578_v4 }
 0xd11   : > { %v3516_v11 = vadd.f32 %v4173_v48, %v3515_v36  ;;  %v3671_v0 = vadd.f32 %v3662_v41, %v3579_v47 }
 0xd12   : > { %v3531_v59 = vadd.f32 %v4175_v18, %v3530_v40  ;;  %3678 = vst [vmem:[%s5928_s15 + $0x30] sm:$0xff] %v3670_v57 }
 0xd13   : > { %v3520_v61 = vsel %vm3519_vm3, %v4173_v48, %v3516_v11  ;;  %3679 = vst [vmem:[%s5928_s15 + $0x38] sm:$0xff] %v3671_v0 }
 0xd14   : > { %v3525_v46 = vsel %vm3522_vm12, %v3524_v16, %v3520_v61  ;;  %v3535_v7 = vsel %vm3534_vm2, %v4175_v18, %v3531_v59 }
 0xd15   : > { %v3540_v9 = vsel %vm3537_vm15, %v3539_v54, %v3535_v7  ;;  %v3576_v38 = vmul.f32 %v3525_v46, %v5922_v12 }
 0xd16   : > { %v3577_v28 = vmul.f32 %v3540_v9, %v5924_v55 }
 0xd17   : > { %v3668_v27 = vadd.f32 %v3641_v22, %v3576_v38 }
 0xd18   : > { %v3669_v29 = vadd.f32 %v3660_v21, %v3577_v28 }
 0xd19   : > { %3676 = vst [vmem:[%s5928_s15 + $0x20] sm:$0xff] %v3668_v27 }
 0xd1a   : > { %3677 = vst [vmem:[%s5928_s15 + $0x28] sm:$0xff] %v3669_v29 }
 0xd1b   : > { %4247 = shalt.err (!%p4244_p8)
}
 0xd1c   : > { %s4310_s13 = smov 256   ;;  %s4311_s15 = smov 16  }
 0xd1d   : > { %4010 = dma.vmem_to_hbm [thread:$0]  (%p4385_p5), %s3694_s17, 1024, %s3696_s26, %s3681_s28, %s4310_s13, %s4310_s13, %s4311_s15  }
 0xd1e PF: > { %p4022_p9 = scmp.ge.s32.totalorder %s4288_s24, 2  ;;  %s3710_s18 = sand.u32 1, %s4276_s21  }
 0xd1f   : > { %s3711_s25 = scalar_lea.sflag [#allocation6], %s3710_s18 }
 0xd20   : > { %p4017_p10 = pnand %p4022_p9, %p4389_p6 }
 0xd22   : > { %p4018_p11 = pneg %p4017_p10 }
 0xd24   : > { %4269 = dma.done.wait (%p4018_p11), %s3711_s25, 1024  }
 0xd25   : > { %4271 = vsyncadd (%p4018_p11), %s3711_s25, 4294966272  ;;  %p17_p12 = scmp.ge.s32.totalorder %s4372_s27, 4   ;;  %s6221_s21 = smov %s4280_s22 }
 0xd26   : > { %s6222_s22 = smov %s4284_s23  ;;  %s6223_s23 = smov %s4383_s30 }
 0xd27   : > { %s6224_s24 = smov %s4372_s27  ;;  %19 = sbr.rel (!%p17_p12) target bundleno = 4 (0x4), region = 87 }
 0xd2c   :  { %3717 = vsyncpa [#allocation5], 1 }
 0xd2d   :  { %3719 = vsyncpa [#allocation5 + $0x1], 1 }
 0xd2e   :  { %3720 = vsyncpa [#allocation6], 1 }
 0xd2f   :  { %3722 = vsyncpa [#allocation6 + $0x1], 1 }

</bundles_post_ra>
